<compile_context>
chip_gen: v6e
topology: v6e:2x2x1
jax: 0.10.0
libtpu: 0.0.40
codegen_flags: <defaults>
</compile_context>

<pallas_src>
import functools

import jax
import jax.numpy as jnp
import numpy as np
from jax import lax
from jax.experimental import pallas as pl
from jax.experimental.pallas import tpu as pltpu

N_EMBD = 256
N_HEAD = 6
HEAD_SIZE = N_EMBD // N_HEAD        # 42  (matches PyTorch integer division)
CAT = N_HEAD * HEAD_SIZE            # 252 (concat of heads, != n_embd!)
D_PAD = 64                          # padded per-head width (lane friendly)
CAT_PAD = N_HEAD * D_PAD            # 384
BLOCK_SIZE = 32
HIDDEN = 4 * N_EMBD                 # 1024
EPS = 1e-5                          # torch.nn.LayerNorm default
TARGET_ROWS = 256                   # aim for bblk*T ~ 256 matmul rows (use 128 on v5e)
NEG_BIG = -1e30                     # large finite negative for the additive mask


def _layernorm(x, g, b):
    mu = jnp.mean(x, axis=-1, keepdims=True)
    var = jnp.mean((x - mu) ** 2, axis=-1, keepdims=True)
    return (x - mu) * lax.rsqrt(var + EPS) * g + b


def block_kernel(x_ref,
                 bias_ref,                      # (1, T, T) additive causal bias
                 ln1_g_ref, ln1_b_ref,
                 wqkv_ref,                      # (C, 3*CAT_PAD) bf16, scale folded into Q part
                 wproj_ref, bproj_ref,          # (CAT_PAD, C) bf16, (1, C) f32
                 ln2_g_ref, ln2_b_ref,
                 w1_ref, b1_ref, w2_ref, b2_ref,
                 o_ref,
                 *, bblk, seq):
    M = bblk * seq
    x = x_ref[...].reshape(M, N_EMBD)                        # f32 residual path

    # ---------------- Multi-head causal self-attention on ln1(x) -------------
    xn = _layernorm(x, ln1_g_ref[...], ln1_b_ref[...])
    qkv = jnp.dot(xn.astype(jnp.bfloat16), wqkv_ref[...],
                  preferred_element_type=jnp.float32).astype(jnp.bfloat16)
    q_all = qkv[:, :CAT_PAD]                                 # already scaled
    k_all = qkv[:, CAT_PAD:2 * CAT_PAD]
    v_all = qkv[:, 2 * CAT_PAD:]

    bias = bias_ref[...]                                     # (1, T, T) f32

    head_outs = []
    for h in range(N_HEAD):                                  # static unroll over 6 heads
        lo = h * D_PAD
        q = q_all[:, lo:lo + D_PAD].reshape(bblk, seq, D_PAD)   # bf16 (bblk, T, 64)
        k = k_all[:, lo:lo + D_PAD].reshape(bblk, seq, D_PAD)
        v = v_all[:, lo:lo + D_PAD].reshape(bblk, seq, D_PAD)

        # Batched scores: (bblk, T, T) -- no cross-batch waste.
        s = jnp.einsum('bqd,bkd->bqk', q, k,
                       preferred_element_type=jnp.float32)
        s = s + bias                                         # additive causal mask
        m = jnp.max(s, axis=-1, keepdims=True)
        p = jnp.exp(s - m)
        denom = jnp.sum(p, axis=-1, keepdims=True)
        o_h = jnp.einsum('bqk,bkd->bqd', p.astype(jnp.bfloat16), v,
                         preferred_element_type=jnp.float32)
        o_h = o_h / denom                                    # normalize the (T, 64) output
        head_outs.append(o_h.astype(jnp.bfloat16).reshape(M, D_PAD))

    sa = jnp.concatenate(head_outs, axis=-1)                 # (M, CAT_PAD) bf16
    sa = jnp.dot(sa, wproj_ref[...],
                 preferred_element_type=jnp.float32) + bproj_ref[...]
    x = x + sa

    # ---------------- FeedForward on ln2(x) ----------------------------------
    xn2 = _layernorm(x, ln2_g_ref[...], ln2_b_ref[...])
    h1 = jnp.dot(xn2.astype(jnp.bfloat16), w1_ref[...],
                 preferred_element_type=jnp.float32) + b1_ref[...]
    h1 = jnp.maximum(h1, 0.0)                                # ReLU
    ff = jnp.dot(h1.astype(jnp.bfloat16), w2_ref[...],
                 preferred_element_type=jnp.float32) + b2_ref[...]

    o_ref[...] = (x + ff).reshape(bblk, seq, N_EMBD)
    # TODO(synk): dropout (p=0.2) is identity here (eval-mode semantics).


def _pack_params(params):
    """Fuse Q/K/V, zero-pad heads 42->64, fold softmax scale into Q, cast to bf16."""
    scale = HEAD_SIZE ** (-0.5)

    def pad_cols(w):                     # (C, CAT) -> (C, CAT_PAD), per-head zero pad
        w3 = w.reshape(N_EMBD, N_HEAD, HEAD_SIZE)
        w3 = jnp.pad(w3, ((0, 0), (0, 0), (0, D_PAD - HEAD_SIZE)))
        return w3.reshape(N_EMBD, CAT_PAD)

    def pad_rows(w):                     # (CAT, C) -> (CAT_PAD, C), per-head zero pad
        w3 = w.reshape(N_HEAD, HEAD_SIZE, N_EMBD)
        w3 = jnp.pad(w3, ((0, 0), (0, D_PAD - HEAD_SIZE), (0, 0)))
        return w3.reshape(CAT_PAD, N_EMBD)

    wqkv = jnp.concatenate(
        [pad_cols(params["wq"] * scale), pad_cols(params["wk"]), pad_cols(params["wv"])],
        axis=1).astype(jnp.bfloat16)                          # (C, 3*CAT_PAD)

    return dict(
        ln1_g=params["ln1_g"], ln1_b=params["ln1_b"],
        wqkv=wqkv,
        wproj=pad_rows(params["wproj"]).astype(jnp.bfloat16),
        bproj=params["bproj"],
        ln2_g=params["ln2_g"], ln2_b=params["ln2_b"],
        w1=params["w1"].astype(jnp.bfloat16), b1=params["b1"],
        w2=params["w2"].astype(jnp.bfloat16), b2=params["b2"],
    )


def transformer_block(x, params, target_rows=TARGET_ROWS):
    """x: (B, T, C) float32. params: dict of weights (see init_params)."""
    B, T, C = x.shape
    assert C == N_EMBD and T <= BLOCK_SIZE and T % 8 == 0

    packed = _pack_params(params)

    # Pack batch rows so matmul M approaches target_rows, but keep >= 2 grid
    # steps whenever possible so both TensorCores get work on v7x.
    bblk = max(1, min(B, target_rows // T))
    if B >= 2:
        bblk = min(bblk, max(1, B // 2))
    b_pad = ((B + bblk - 1) // bblk) * bblk
    if b_pad != B:
        x = jnp.pad(x, ((0, b_pad - B), (0, 0), (0, 0)))

    # Additive causal bias: 0 where attending is allowed, -1e30 elsewhere.
    tril = jnp.tril(jnp.ones((T, T), dtype=bool))
    bias = jnp.where(tril, 0.0, NEG_BIG).astype(jnp.float32)[None]   # (1, T, T)

    ordered = [
        bias,
        packed["ln1_g"], packed["ln1_b"],
        packed["wqkv"],
        packed["wproj"], packed["bproj"],
        packed["ln2_g"], packed["ln2_b"],
        packed["w1"], packed["b1"], packed["w2"], packed["b2"],
    ]

    def full_spec(a):
        nd = a.ndim
        return pl.BlockSpec(a.shape, lambda b, _nd=nd: (0,) * _nd)

    in_specs = [pl.BlockSpec((bblk, T, C), lambda b: (b, 0, 0))] + [full_spec(a) for a in ordered]
    out_spec = pl.BlockSpec((bblk, T, C), lambda b: (b, 0, 0))

    kernel = functools.partial(block_kernel, bblk=bblk, seq=T)

    out = pl.pallas_call(
        kernel,
        out_shape=jax.ShapeDtypeStruct((b_pad, T, C), jnp.float32),
        grid_spec=pltpu.PrefetchScalarGridSpec(
            num_scalar_prefetch=0,
            grid=(b_pad // bblk,),
            in_specs=in_specs,
            out_specs=out_spec,
        ),
        compiler_params=pltpu.CompilerParams(
            dimension_semantics=("parallel",),   # shards tiles across TCs on v7x
        ),
    )(x, *ordered)
    return out[:B]


def init_params(key):
    ks = jax.random.split(key, 8)
    s = 0.02
    return {
        "ln1_g": jnp.ones((1, N_EMBD), jnp.float32),
        "ln1_b": jnp.zeros((1, N_EMBD), jnp.float32),
        "wq": (jax.random.normal(ks[0], (N_EMBD, CAT)) * s).astype(jnp.float32),
        "wk": (jax.random.normal(ks[1], (N_EMBD, CAT)) * s).astype(jnp.float32),
        "wv": (jax.random.normal(ks[2], (N_EMBD, CAT)) * s).astype(jnp.float32),
        "wproj": (jax.random.normal(ks[3], (CAT, N_EMBD)) * s).astype(jnp.float32),
        "bproj": jnp.zeros((1, N_EMBD), jnp.float32),
        "ln2_g": jnp.ones((1, N_EMBD), jnp.float32),
        "ln2_b": jnp.zeros((1, N_EMBD), jnp.float32),
        "w1": (jax.random.normal(ks[4], (N_EMBD, HIDDEN)) * s).astype(jnp.float32),
        "b1": jnp.zeros((1, HIDDEN), jnp.float32),
        "w2": (jax.random.normal(ks[5], (HIDDEN, N_EMBD)) * s).astype(jnp.float32),
        "b2": jnp.zeros((1, N_EMBD), jnp.float32),
    }


def reference_block(x, p):
    """Pure-JAX f32 reference replicating the PyTorch forward (eval mode)."""
    def ln(v, g, b):
        mu = jnp.mean(v, -1, keepdims=True)
        var = jnp.mean((v - mu) ** 2, -1, keepdims=True)
        return (v - mu) / jnp.sqrt(var + EPS) * g + b

    B, T, C = x.shape
    xn = ln(x, p["ln1_g"], p["ln1_b"])
    q = xn @ p["wq"]; k = xn @ p["wk"]; v = xn @ p["wv"]       # (B, T, CAT)
    mask = jnp.tril(jnp.ones((T, T), bool))
    outs = []
    for h in range(N_HEAD):
        lo, hi = h * HEAD_SIZE, (h + 1) * HEAD_SIZE
        s = q[..., lo:hi] @ jnp.swapaxes(k[..., lo:hi], -1, -2) * HEAD_SIZE ** -0.5
        s = jnp.where(mask, s, -jnp.inf)
        w = jax.nn.softmax(s, axis=-1)
        outs.append(w @ v[..., lo:hi])
    sa = jnp.concatenate(outs, -1) @ p["wproj"] + p["bproj"]
    x = x + sa
    xn2 = ln(x, p["ln2_g"], p["ln2_b"])
    ff = jnp.maximum(xn2 @ p["w1"] + p["b1"], 0.0) @ p["w2"] + p["b2"]
    return x + ff


if __name__ == "__main__":
    key = jax.random.PRNGKey(0)
    kx, kp = jax.random.split(key)
    B, T = 2, BLOCK_SIZE
    x = jax.random.normal(kx, (B, T, N_EMBD), jnp.float32)
    params = init_params(kp)

    out = jax.block_until_ready(transformer_block(x, params))
    ref = jax.block_until_ready(reference_block(x, params))

    # bf16 matmul operands (f32 accumulation) -> relaxed tolerance.
    np.testing.assert_allclose(np.asarray(out), np.asarray(ref), rtol=2e-2, atol=2e-2)

    print("KERNEL_OK")
</pallas_src>

<mosaic_0001>
module attributes {stable_mosaic.version = 11 : i64} {
  func.func @block_kernel(%arg0: i32, %arg1: memref<1x32x256xf32, #tpu.memory_space<vmem>>, %arg2: memref<1x32x32xf32, #tpu.memory_space<vmem>>, %arg3: memref<1x256xf32, #tpu.memory_space<vmem>>, %arg4: memref<1x256xf32, #tpu.memory_space<vmem>>, %arg5: memref<256x1152xbf16, #tpu.memory_space<vmem>>, %arg6: memref<384x256xbf16, #tpu.memory_space<vmem>>, %arg7: memref<1x256xf32, #tpu.memory_space<vmem>>, %arg8: memref<1x256xf32, #tpu.memory_space<vmem>>, %arg9: memref<1x256xf32, #tpu.memory_space<vmem>>, %arg10: memref<256x1024xbf16, #tpu.memory_space<vmem>>, %arg11: memref<1x1024xf32, #tpu.memory_space<vmem>>, %arg12: memref<1024x256xbf16, #tpu.memory_space<vmem>>, %arg13: memref<1x256xf32, #tpu.memory_space<vmem>>, %arg14: memref<1x32x256xf32, #tpu.memory_space<vmem>>) attributes {dimension_semantics = [#tpu.dimension_semantics<parallel>], iteration_bounds = array<i64: 2>, scalar_prefetch = 0 : i64, scratch_operands = 0 : i64, tpu.core_type = #tpu.core_type<tc>, window_params = [{transform_indices = @transform_0, window_bounds = array<i64: 1, 32, 256>}, {pipeline_mode = #tpu.pipeline_mode<synchronous>, transform_indices = @transform_1, window_bounds = array<i64: 1, 32, 32>}, {pipeline_mode = #tpu.pipeline_mode<synchronous>, transform_indices = @transform_2, window_bounds = array<i64: 1, 256>}, {pipeline_mode = #tpu.pipeline_mode<synchronous>, transform_indices = @transform_3, window_bounds = array<i64: 1, 256>}, {pipeline_mode = #tpu.pipeline_mode<synchronous>, transform_indices = @transform_4, window_bounds = array<i64: 256, 1152>}, {pipeline_mode = #tpu.pipeline_mode<synchronous>, transform_indices = @transform_5, window_bounds = array<i64: 384, 256>}, {pipeline_mode = #tpu.pipeline_mode<synchronous>, transform_indices = @transform_6, window_bounds = array<i64: 1, 256>}, {pipeline_mode = #tpu.pipeline_mode<synchronous>, transform_indices = @transform_7, window_bounds = array<i64: 1, 256>}, {pipeline_mode = #tpu.pipeline_mode<synchronous>, transform_indices = @transform_8, window_bounds = array<i64: 1, 256>}, {pipeline_mode = #tpu.pipeline_mode<synchronous>, transform_indices = @transform_9, window_bounds = array<i64: 256, 1024>}, {pipeline_mode = #tpu.pipeline_mode<synchronous>, transform_indices = @transform_10, window_bounds = array<i64: 1, 1024>}, {pipeline_mode = #tpu.pipeline_mode<synchronous>, transform_indices = @transform_11, window_bounds = array<i64: 1024, 256>}, {pipeline_mode = #tpu.pipeline_mode<synchronous>, transform_indices = @transform_12, window_bounds = array<i64: 1, 256>}, {transform_indices = @transform_13, window_bounds = array<i64: 1, 32, 256>}]} {
    %c0 = arith.constant 0 : index
    %c0_0 = arith.constant 0 : index
    %c0_1 = arith.constant 0 : index
    %0 = vector.load %arg1[%c0, %c0_0, %c0_1] : memref<1x32x256xf32, #tpu.memory_space<vmem>>, vector<1x32x256xf32>
    %1 = vector.shape_cast %0 : vector<1x32x256xf32> to vector<32x256xf32>
    %c0_2 = arith.constant 0 : index
    %c0_3 = arith.constant 0 : index
    %2 = vector.load %arg3[%c0_2, %c0_3] : memref<1x256xf32, #tpu.memory_space<vmem>>, vector<1x256xf32>
    %c0_4 = arith.constant 0 : index
    %c0_5 = arith.constant 0 : index
    %3 = vector.load %arg4[%c0_4, %c0_5] : memref<1x256xf32, #tpu.memory_space<vmem>>, vector<1x256xf32>
    %cst = arith.constant dense<0.000000e+00> : vector<32xf32>
    %4 = vector.multi_reduction <add>, %1, %cst [1] : vector<32x256xf32> to vector<32xf32>
    %5 = vector.shape_cast %4 : vector<32xf32> to vector<32x1xf32>
    %cst_6 = arith.constant 2.560000e+02 : f32
    %6 = vector.broadcast %cst_6 : f32 to vector<32x1xf32>
    %7 = arith.divf %5, %6 : vector<32x1xf32>
    %8 = vector.broadcast %7 : vector<32x1xf32> to vector<32x256xf32>
    %9 = arith.subf %1, %8 : vector<32x256xf32>
    %10 = arith.mulf %9, %9 : vector<32x256xf32>
    %cst_7 = arith.constant dense<0.000000e+00> : vector<32xf32>
    %11 = vector.multi_reduction <add>, %10, %cst_7 [1] : vector<32x256xf32> to vector<32xf32>
    %12 = vector.shape_cast %11 : vector<32xf32> to vector<32x1xf32>
    %cst_8 = arith.constant 2.560000e+02 : f32
    %13 = vector.broadcast %cst_8 : f32 to vector<32x1xf32>
    %14 = arith.divf %12, %13 : vector<32x1xf32>
    %15 = vector.broadcast %7 : vector<32x1xf32> to vector<32x256xf32>
    %16 = arith.subf %1, %15 : vector<32x256xf32>
    %cst_9 = arith.constant 9.99999974E-6 : f32
    %17 = vector.broadcast %cst_9 : f32 to vector<32x1xf32>
    %18 = arith.addf %14, %17 : vector<32x1xf32>
    %19 = math.rsqrt %18 : vector<32x1xf32>
    %20 = vector.broadcast %19 : vector<32x1xf32> to vector<32x256xf32>
    %21 = arith.mulf %16, %20 : vector<32x256xf32>
    %22 = vector.broadcast %2 : vector<1x256xf32> to vector<32x256xf32>
    %23 = arith.mulf %21, %22 : vector<32x256xf32>
    %24 = vector.broadcast %3 : vector<1x256xf32> to vector<32x256xf32>
    %25 = arith.addf %23, %24 : vector<32x256xf32>
    %26 = arith.truncf %25 : vector<32x256xf32> to vector<32x256xbf16>
    %c0_10 = arith.constant 0 : index
    %c0_11 = arith.constant 0 : index
    %27 = vector.load %arg5[%c0_10, %c0_11] : memref<256x1152xbf16, #tpu.memory_space<vmem>>, vector<256x1152xbf16>
    %cst_12 = arith.constant dense<0.000000e+00> : vector<32x1152xf32>
    %28 = tpu.matmul %26, %27, %cst_12 {dimension_numbers = #tpu.dot_dimension_numbers<[1], [0], [0], [1], [0, 0, 1, 1], [], []>} : vector<32x256xbf16>, vector<256x1152xbf16>, vector<32x1152xf32> -> vector<32x1152xf32>
    %29 = arith.truncf %28 : vector<32x1152xf32> to vector<32x1152xbf16>
    %30 = vector.extract_strided_slice %29 {offsets = [0, 0], sizes = [32, 384], strides = [1, 1]} : vector<32x1152xbf16> to vector<32x384xbf16>
    %31 = vector.extract_strided_slice %29 {offsets = [0, 384], sizes = [32, 384], strides = [1, 1]} : vector<32x1152xbf16> to vector<32x384xbf16>
    %32 = vector.extract_strided_slice %29 {offsets = [0, 768], sizes = [32, 384], strides = [1, 1]} : vector<32x1152xbf16> to vector<32x384xbf16>
    %c0_13 = arith.constant 0 : index
    %c0_14 = arith.constant 0 : index
    %c0_15 = arith.constant 0 : index
    %33 = vector.load %arg2[%c0_13, %c0_14, %c0_15] : memref<1x32x32xf32, #tpu.memory_space<vmem>>, vector<1x32x32xf32>
    %34 = vector.extract_strided_slice %30 {offsets = [0, 0], sizes = [32, 64], strides = [1, 1]} : vector<32x384xbf16> to vector<32x64xbf16>
    %35 = vector.shape_cast %34 : vector<32x64xbf16> to vector<1x32x64xbf16>
    %36 = vector.extract_strided_slice %31 {offsets = [0, 0], sizes = [32, 64], strides = [1, 1]} : vector<32x384xbf16> to vector<32x64xbf16>
    %37 = vector.shape_cast %36 : vector<32x64xbf16> to vector<1x32x64xbf16>
    %38 = vector.extract_strided_slice %32 {offsets = [0, 0], sizes = [32, 64], strides = [1, 1]} : vector<32x384xbf16> to vector<32x64xbf16>
    %39 = vector.shape_cast %38 : vector<32x64xbf16> to vector<1x32x64xbf16>
    "tpu.trace_start"() <{level = 10 : i32, message = "bqd,bkd->bqk"}> : () -> ()
    %cst_16 = arith.constant dense<0.000000e+00> : vector<1x32x32xf32>
    %40 = tpu.matmul %35, %37, %cst_16 {dimension_numbers = #tpu.dot_dimension_numbers<[2], [2], [1], [1], [0, 0, 0, 1, 1, 1], [0], [0]>} : vector<1x32x64xbf16>, vector<1x32x64xbf16>, vector<1x32x32xf32> -> vector<1x32x32xf32>
    "tpu.trace_stop"() : () -> ()
    %41 = arith.addf %40, %33 : vector<1x32x32xf32>
    %cst_17 = arith.constant dense<0xFF800000> : vector<1x32xf32>
    %42 = vector.multi_reduction <maximumf>, %41, %cst_17 [2] : vector<1x32x32xf32> to vector<1x32xf32>
    %43 = vector.shape_cast %42 : vector<1x32xf32> to vector<1x32x1xf32>
    %44 = vector.broadcast %43 : vector<1x32x1xf32> to vector<1x32x32xf32>
    %45 = arith.subf %41, %44 : vector<1x32x32xf32>
    %46 = math.exp %45 : vector<1x32x32xf32>
    %cst_18 = arith.constant dense<0.000000e+00> : vector<1x32xf32>
    %47 = vector.multi_reduction <add>, %46, %cst_18 [2] : vector<1x32x32xf32> to vector<1x32xf32>
    %48 = vector.shape_cast %47 : vector<1x32xf32> to vector<1x32x1xf32>
    %49 = arith.truncf %46 : vector<1x32x32xf32> to vector<1x32x32xbf16>
    "tpu.trace_start"() <{level = 10 : i32, message = "bqk,bkd->bqd"}> : () -> ()
    %cst_19 = arith.constant dense<0.000000e+00> : vector<1x32x64xf32>
    %50 = tpu.matmul %49, %39, %cst_19 {dimension_numbers = #tpu.dot_dimension_numbers<[2], [1], [1], [2], [0, 0, 0, 1, 1, 2], [0], [0]>} : vector<1x32x32xbf16>, vector<1x32x64xbf16>, vector<1x32x64xf32> -> vector<1x32x64xf32>
    "tpu.trace_stop"() : () -> ()
    %51 = vector.broadcast %48 : vector<1x32x1xf32> to vector<1x32x64xf32>
    %52 = arith.divf %50, %51 : vector<1x32x64xf32>
    %53 = arith.truncf %52 : vector<1x32x64xf32> to vector<1x32x64xbf16>
    %54 = vector.shape_cast %53 : vector<1x32x64xbf16> to vector<32x64xbf16>
    %55 = vector.extract_strided_slice %30 {offsets = [0, 64], sizes = [32, 64], strides = [1, 1]} : vector<32x384xbf16> to vector<32x64xbf16>
    %56 = vector.shape_cast %55 : vector<32x64xbf16> to vector<1x32x64xbf16>
    %57 = vector.extract_strided_slice %31 {offsets = [0, 64], sizes = [32, 64], strides = [1, 1]} : vector<32x384xbf16> to vector<32x64xbf16>
    %58 = vector.shape_cast %57 : vector<32x64xbf16> to vector<1x32x64xbf16>
    %59 = vector.extract_strided_slice %32 {offsets = [0, 64], sizes = [32, 64], strides = [1, 1]} : vector<32x384xbf16> to vector<32x64xbf16>
    %60 = vector.shape_cast %59 : vector<32x64xbf16> to vector<1x32x64xbf16>
    "tpu.trace_start"() <{level = 10 : i32, message = "bqd,bkd->bqk"}> : () -> ()
    %cst_20 = arith.constant dense<0.000000e+00> : vector<1x32x32xf32>
    %61 = tpu.matmul %56, %58, %cst_20 {dimension_numbers = #tpu.dot_dimension_numbers<[2], [2], [1], [1], [0, 0, 0, 1, 1, 1], [0], [0]>} : vector<1x32x64xbf16>, vector<1x32x64xbf16>, vector<1x32x32xf32> -> vector<1x32x32xf32>
    "tpu.trace_stop"() : () -> ()
    %62 = arith.addf %61, %33 : vector<1x32x32xf32>
    %cst_21 = arith.constant dense<0xFF800000> : vector<1x32xf32>
    %63 = vector.multi_reduction <maximumf>, %62, %cst_21 [2] : vector<1x32x32xf32> to vector<1x32xf32>
    %64 = vector.shape_cast %63 : vector<1x32xf32> to vector<1x32x1xf32>
    %65 = vector.broadcast %64 : vector<1x32x1xf32> to vector<1x32x32xf32>
    %66 = arith.subf %62, %65 : vector<1x32x32xf32>
    %67 = math.exp %66 : vector<1x32x32xf32>
    %cst_22 = arith.constant dense<0.000000e+00> : vector<1x32xf32>
    %68 = vector.multi_reduction <add>, %67, %cst_22 [2] : vector<1x32x32xf32> to vector<1x32xf32>
    %69 = vector.shape_cast %68 : vector<1x32xf32> to vector<1x32x1xf32>
    %70 = arith.truncf %67 : vector<1x32x32xf32> to vector<1x32x32xbf16>
    "tpu.trace_start"() <{level = 10 : i32, message = "bqk,bkd->bqd"}> : () -> ()
    %cst_23 = arith.constant dense<0.000000e+00> : vector<1x32x64xf32>
    %71 = tpu.matmul %70, %60, %cst_23 {dimension_numbers = #tpu.dot_dimension_numbers<[2], [1], [1], [2], [0, 0, 0, 1, 1, 2], [0], [0]>} : vector<1x32x32xbf16>, vector<1x32x64xbf16>, vector<1x32x64xf32> -> vector<1x32x64xf32>
    "tpu.trace_stop"() : () -> ()
    %72 = vector.broadcast %69 : vector<1x32x1xf32> to vector<1x32x64xf32>
    %73 = arith.divf %71, %72 : vector<1x32x64xf32>
    %74 = arith.truncf %73 : vector<1x32x64xf32> to vector<1x32x64xbf16>
    %75 = vector.shape_cast %74 : vector<1x32x64xbf16> to vector<32x64xbf16>
    %76 = vector.extract_strided_slice %30 {offsets = [0, 128], sizes = [32, 64], strides = [1, 1]} : vector<32x384xbf16> to vector<32x64xbf16>
    %77 = vector.shape_cast %76 : vector<32x64xbf16> to vector<1x32x64xbf16>
    %78 = vector.extract_strided_slice %31 {offsets = [0, 128], sizes = [32, 64], strides = [1, 1]} : vector<32x384xbf16> to vector<32x64xbf16>
    %79 = vector.shape_cast %78 : vector<32x64xbf16> to vector<1x32x64xbf16>
    %80 = vector.extract_strided_slice %32 {offsets = [0, 128], sizes = [32, 64], strides = [1, 1]} : vector<32x384xbf16> to vector<32x64xbf16>
    %81 = vector.shape_cast %80 : vector<32x64xbf16> to vector<1x32x64xbf16>
    "tpu.trace_start"() <{level = 10 : i32, message = "bqd,bkd->bqk"}> : () -> ()
    %cst_24 = arith.constant dense<0.000000e+00> : vector<1x32x32xf32>
    %82 = tpu.matmul %77, %79, %cst_24 {dimension_numbers = #tpu.dot_dimension_numbers<[2], [2], [1], [1], [0, 0, 0, 1, 1, 1], [0], [0]>} : vector<1x32x64xbf16>, vector<1x32x64xbf16>, vector<1x32x32xf32> -> vector<1x32x32xf32>
    "tpu.trace_stop"() : () -> ()
    %83 = arith.addf %82, %33 : vector<1x32x32xf32>
    %cst_25 = arith.constant dense<0xFF800000> : vector<1x32xf32>
    %84 = vector.multi_reduction <maximumf>, %83, %cst_25 [2] : vector<1x32x32xf32> to vector<1x32xf32>
    %85 = vector.shape_cast %84 : vector<1x32xf32> to vector<1x32x1xf32>
    %86 = vector.broadcast %85 : vector<1x32x1xf32> to vector<1x32x32xf32>
    %87 = arith.subf %83, %86 : vector<1x32x32xf32>
    %88 = math.exp %87 : vector<1x32x32xf32>
    %cst_26 = arith.constant dense<0.000000e+00> : vector<1x32xf32>
    %89 = vector.multi_reduction <add>, %88, %cst_26 [2] : vector<1x32x32xf32> to vector<1x32xf32>
    %90 = vector.shape_cast %89 : vector<1x32xf32> to vector<1x32x1xf32>
    %91 = arith.truncf %88 : vector<1x32x32xf32> to vector<1x32x32xbf16>
    "tpu.trace_start"() <{level = 10 : i32, message = "bqk,bkd->bqd"}> : () -> ()
    %cst_27 = arith.constant dense<0.000000e+00> : vector<1x32x64xf32>
    %92 = tpu.matmul %91, %81, %cst_27 {dimension_numbers = #tpu.dot_dimension_numbers<[2], [1], [1], [2], [0, 0, 0, 1, 1, 2], [0], [0]>} : vector<1x32x32xbf16>, vector<1x32x64xbf16>, vector<1x32x64xf32> -> vector<1x32x64xf32>
    "tpu.trace_stop"() : () -> ()
    %93 = vector.broadcast %90 : vector<1x32x1xf32> to vector<1x32x64xf32>
    %94 = arith.divf %92, %93 : vector<1x32x64xf32>
    %95 = arith.truncf %94 : vector<1x32x64xf32> to vector<1x32x64xbf16>
    %96 = vector.shape_cast %95 : vector<1x32x64xbf16> to vector<32x64xbf16>
    %97 = vector.extract_strided_slice %30 {offsets = [0, 192], sizes = [32, 64], strides = [1, 1]} : vector<32x384xbf16> to vector<32x64xbf16>
    %98 = vector.shape_cast %97 : vector<32x64xbf16> to vector<1x32x64xbf16>
    %99 = vector.extract_strided_slice %31 {offsets = [0, 192], sizes = [32, 64], strides = [1, 1]} : vector<32x384xbf16> to vector<32x64xbf16>
    %100 = vector.shape_cast %99 : vector<32x64xbf16> to vector<1x32x64xbf16>
    %101 = vector.extract_strided_slice %32 {offsets = [0, 192], sizes = [32, 64], strides = [1, 1]} : vector<32x384xbf16> to vector<32x64xbf16>
    %102 = vector.shape_cast %101 : vector<32x64xbf16> to vector<1x32x64xbf16>
    "tpu.trace_start"() <{level = 10 : i32, message = "bqd,bkd->bqk"}> : () -> ()
    %cst_28 = arith.constant dense<0.000000e+00> : vector<1x32x32xf32>
    %103 = tpu.matmul %98, %100, %cst_28 {dimension_numbers = #tpu.dot_dimension_numbers<[2], [2], [1], [1], [0, 0, 0, 1, 1, 1], [0], [0]>} : vector<1x32x64xbf16>, vector<1x32x64xbf16>, vector<1x32x32xf32> -> vector<1x32x32xf32>
    "tpu.trace_stop"() : () -> ()
    %104 = arith.addf %103, %33 : vector<1x32x32xf32>
    %cst_29 = arith.constant dense<0xFF800000> : vector<1x32xf32>
    %105 = vector.multi_reduction <maximumf>, %104, %cst_29 [2] : vector<1x32x32xf32> to vector<1x32xf32>
    %106 = vector.shape_cast %105 : vector<1x32xf32> to vector<1x32x1xf32>
    %107 = vector.broadcast %106 : vector<1x32x1xf32> to vector<1x32x32xf32>
    %108 = arith.subf %104, %107 : vector<1x32x32xf32>
    %109 = math.exp %108 : vector<1x32x32xf32>
    %cst_30 = arith.constant dense<0.000000e+00> : vector<1x32xf32>
    %110 = vector.multi_reduction <add>, %109, %cst_30 [2] : vector<1x32x32xf32> to vector<1x32xf32>
    %111 = vector.shape_cast %110 : vector<1x32xf32> to vector<1x32x1xf32>
    %112 = arith.truncf %109 : vector<1x32x32xf32> to vector<1x32x32xbf16>
    "tpu.trace_start"() <{level = 10 : i32, message = "bqk,bkd->bqd"}> : () -> ()
    %cst_31 = arith.constant dense<0.000000e+00> : vector<1x32x64xf32>
    %113 = tpu.matmul %112, %102, %cst_31 {dimension_numbers = #tpu.dot_dimension_numbers<[2], [1], [1], [2], [0, 0, 0, 1, 1, 2], [0], [0]>} : vector<1x32x32xbf16>, vector<1x32x64xbf16>, vector<1x32x64xf32> -> vector<1x32x64xf32>
    "tpu.trace_stop"() : () -> ()
    %114 = vector.broadcast %111 : vector<1x32x1xf32> to vector<1x32x64xf32>
    %115 = arith.divf %113, %114 : vector<1x32x64xf32>
    %116 = arith.truncf %115 : vector<1x32x64xf32> to vector<1x32x64xbf16>
    %117 = vector.shape_cast %116 : vector<1x32x64xbf16> to vector<32x64xbf16>
    %118 = vector.extract_strided_slice %30 {offsets = [0, 256], sizes = [32, 64], strides = [1, 1]} : vector<32x384xbf16> to vector<32x64xbf16>
    %119 = vector.shape_cast %118 : vector<32x64xbf16> to vector<1x32x64xbf16>
    %120 = vector.extract_strided_slice %31 {offsets = [0, 256], sizes = [32, 64], strides = [1, 1]} : vector<32x384xbf16> to vector<32x64xbf16>
    %121 = vector.shape_cast %120 : vector<32x64xbf16> to vector<1x32x64xbf16>
    %122 = vector.extract_strided_slice %32 {offsets = [0, 256], sizes = [32, 64], strides = [1, 1]} : vector<32x384xbf16> to vector<32x64xbf16>
    %123 = vector.shape_cast %122 : vector<32x64xbf16> to vector<1x32x64xbf16>
    "tpu.trace_start"() <{level = 10 : i32, message = "bqd,bkd->bqk"}> : () -> ()
    %cst_32 = arith.constant dense<0.000000e+00> : vector<1x32x32xf32>
    %124 = tpu.matmul %119, %121, %cst_32 {dimension_numbers = #tpu.dot_dimension_numbers<[2], [2], [1], [1], [0, 0, 0, 1, 1, 1], [0], [0]>} : vector<1x32x64xbf16>, vector<1x32x64xbf16>, vector<1x32x32xf32> -> vector<1x32x32xf32>
    "tpu.trace_stop"() : () -> ()
    %125 = arith.addf %124, %33 : vector<1x32x32xf32>
    %cst_33 = arith.constant dense<0xFF800000> : vector<1x32xf32>
    %126 = vector.multi_reduction <maximumf>, %125, %cst_33 [2] : vector<1x32x32xf32> to vector<1x32xf32>
    %127 = vector.shape_cast %126 : vector<1x32xf32> to vector<1x32x1xf32>
    %128 = vector.broadcast %127 : vector<1x32x1xf32> to vector<1x32x32xf32>
    %129 = arith.subf %125, %128 : vector<1x32x32xf32>
    %130 = math.exp %129 : vector<1x32x32xf32>
    %cst_34 = arith.constant dense<0.000000e+00> : vector<1x32xf32>
    %131 = vector.multi_reduction <add>, %130, %cst_34 [2] : vector<1x32x32xf32> to vector<1x32xf32>
    %132 = vector.shape_cast %131 : vector<1x32xf32> to vector<1x32x1xf32>
    %133 = arith.truncf %130 : vector<1x32x32xf32> to vector<1x32x32xbf16>
    "tpu.trace_start"() <{level = 10 : i32, message = "bqk,bkd->bqd"}> : () -> ()
    %cst_35 = arith.constant dense<0.000000e+00> : vector<1x32x64xf32>
    %134 = tpu.matmul %133, %123, %cst_35 {dimension_numbers = #tpu.dot_dimension_numbers<[2], [1], [1], [2], [0, 0, 0, 1, 1, 2], [0], [0]>} : vector<1x32x32xbf16>, vector<1x32x64xbf16>, vector<1x32x64xf32> -> vector<1x32x64xf32>
    "tpu.trace_stop"() : () -> ()
    %135 = vector.broadcast %132 : vector<1x32x1xf32> to vector<1x32x64xf32>
    %136 = arith.divf %134, %135 : vector<1x32x64xf32>
    %137 = arith.truncf %136 : vector<1x32x64xf32> to vector<1x32x64xbf16>
    %138 = vector.shape_cast %137 : vector<1x32x64xbf16> to vector<32x64xbf16>
    %139 = vector.extract_strided_slice %30 {offsets = [0, 320], sizes = [32, 64], strides = [1, 1]} : vector<32x384xbf16> to vector<32x64xbf16>
    %140 = vector.shape_cast %139 : vector<32x64xbf16> to vector<1x32x64xbf16>
    %141 = vector.extract_strided_slice %31 {offsets = [0, 320], sizes = [32, 64], strides = [1, 1]} : vector<32x384xbf16> to vector<32x64xbf16>
    %142 = vector.shape_cast %141 : vector<32x64xbf16> to vector<1x32x64xbf16>
    %143 = vector.extract_strided_slice %32 {offsets = [0, 320], sizes = [32, 64], strides = [1, 1]} : vector<32x384xbf16> to vector<32x64xbf16>
    %144 = vector.shape_cast %143 : vector<32x64xbf16> to vector<1x32x64xbf16>
    "tpu.trace_start"() <{level = 10 : i32, message = "bqd,bkd->bqk"}> : () -> ()
    %cst_36 = arith.constant dense<0.000000e+00> : vector<1x32x32xf32>
    %145 = tpu.matmul %140, %142, %cst_36 {dimension_numbers = #tpu.dot_dimension_numbers<[2], [2], [1], [1], [0, 0, 0, 1, 1, 1], [0], [0]>} : vector<1x32x64xbf16>, vector<1x32x64xbf16>, vector<1x32x32xf32> -> vector<1x32x32xf32>
    "tpu.trace_stop"() : () -> ()
    %146 = arith.addf %145, %33 : vector<1x32x32xf32>
    %cst_37 = arith.constant dense<0xFF800000> : vector<1x32xf32>
    %147 = vector.multi_reduction <maximumf>, %146, %cst_37 [2] : vector<1x32x32xf32> to vector<1x32xf32>
    %148 = vector.shape_cast %147 : vector<1x32xf32> to vector<1x32x1xf32>
    %149 = vector.broadcast %148 : vector<1x32x1xf32> to vector<1x32x32xf32>
    %150 = arith.subf %146, %149 : vector<1x32x32xf32>
    %151 = math.exp %150 : vector<1x32x32xf32>
    %cst_38 = arith.constant dense<0.000000e+00> : vector<1x32xf32>
    %152 = vector.multi_reduction <add>, %151, %cst_38 [2] : vector<1x32x32xf32> to vector<1x32xf32>
    %153 = vector.shape_cast %152 : vector<1x32xf32> to vector<1x32x1xf32>
    %154 = arith.truncf %151 : vector<1x32x32xf32> to vector<1x32x32xbf16>
    "tpu.trace_start"() <{level = 10 : i32, message = "bqk,bkd->bqd"}> : () -> ()
    %cst_39 = arith.constant dense<0.000000e+00> : vector<1x32x64xf32>
    %155 = tpu.matmul %154, %144, %cst_39 {dimension_numbers = #tpu.dot_dimension_numbers<[2], [1], [1], [2], [0, 0, 0, 1, 1, 2], [0], [0]>} : vector<1x32x32xbf16>, vector<1x32x64xbf16>, vector<1x32x64xf32> -> vector<1x32x64xf32>
    "tpu.trace_stop"() : () -> ()
    %156 = vector.broadcast %153 : vector<1x32x1xf32> to vector<1x32x64xf32>
    %157 = arith.divf %155, %156 : vector<1x32x64xf32>
    %158 = arith.truncf %157 : vector<1x32x64xf32> to vector<1x32x64xbf16>
    %159 = vector.shape_cast %158 : vector<1x32x64xbf16> to vector<32x64xbf16>
    %160 = tpu.concatenate %54, %75, %96, %117, %138, %159 in 1 : vector<32x64xbf16>, vector<32x64xbf16>, vector<32x64xbf16>, vector<32x64xbf16>, vector<32x64xbf16>, vector<32x64xbf16> -> vector<32x384xbf16>
    %c0_40 = arith.constant 0 : index
    %c0_41 = arith.constant 0 : index
    %161 = vector.load %arg6[%c0_40, %c0_41] : memref<384x256xbf16, #tpu.memory_space<vmem>>, vector<384x256xbf16>
    %cst_42 = arith.constant dense<0.000000e+00> : vector<32x256xf32>
    %162 = tpu.matmul %160, %161, %cst_42 {dimension_numbers = #tpu.dot_dimension_numbers<[1], [0], [0], [1], [0, 0, 1, 1], [], []>} : vector<32x384xbf16>, vector<384x256xbf16>, vector<32x256xf32> -> vector<32x256xf32>
    %c0_43 = arith.constant 0 : index
    %c0_44 = arith.constant 0 : index
    %163 = vector.load %arg7[%c0_43, %c0_44] : memref<1x256xf32, #tpu.memory_space<vmem>>, vector<1x256xf32>
    %164 = vector.broadcast %163 : vector<1x256xf32> to vector<32x256xf32>
    %165 = arith.addf %162, %164 : vector<32x256xf32>
    %166 = arith.addf %1, %165 : vector<32x256xf32>
    %c0_45 = arith.constant 0 : index
    %c0_46 = arith.constant 0 : index
    %167 = vector.load %arg8[%c0_45, %c0_46] : memref<1x256xf32, #tpu.memory_space<vmem>>, vector<1x256xf32>
    %c0_47 = arith.constant 0 : index
    %c0_48 = arith.constant 0 : index
    %168 = vector.load %arg9[%c0_47, %c0_48] : memref<1x256xf32, #tpu.memory_space<vmem>>, vector<1x256xf32>
    %cst_49 = arith.constant dense<0.000000e+00> : vector<32xf32>
    %169 = vector.multi_reduction <add>, %166, %cst_49 [1] : vector<32x256xf32> to vector<32xf32>
    %170 = vector.shape_cast %169 : vector<32xf32> to vector<32x1xf32>
    %cst_50 = arith.constant 2.560000e+02 : f32
    %171 = vector.broadcast %cst_50 : f32 to vector<32x1xf32>
    %172 = arith.divf %170, %171 : vector<32x1xf32>
    %173 = vector.broadcast %172 : vector<32x1xf32> to vector<32x256xf32>
    %174 = arith.subf %166, %173 : vector<32x256xf32>
    %175 = arith.mulf %174, %174 : vector<32x256xf32>
    %cst_51 = arith.constant dense<0.000000e+00> : vector<32xf32>
    %176 = vector.multi_reduction <add>, %175, %cst_51 [1] : vector<32x256xf32> to vector<32xf32>
    %177 = vector.shape_cast %176 : vector<32xf32> to vector<32x1xf32>
    %cst_52 = arith.constant 2.560000e+02 : f32
    %178 = vector.broadcast %cst_52 : f32 to vector<32x1xf32>
    %179 = arith.divf %177, %178 : vector<32x1xf32>
    %180 = vector.broadcast %172 : vector<32x1xf32> to vector<32x256xf32>
    %181 = arith.subf %166, %180 : vector<32x256xf32>
    %cst_53 = arith.constant 9.99999974E-6 : f32
    %182 = vector.broadcast %cst_53 : f32 to vector<32x1xf32>
    %183 = arith.addf %179, %182 : vector<32x1xf32>
    %184 = math.rsqrt %183 : vector<32x1xf32>
    %185 = vector.broadcast %184 : vector<32x1xf32> to vector<32x256xf32>
    %186 = arith.mulf %181, %185 : vector<32x256xf32>
    %187 = vector.broadcast %167 : vector<1x256xf32> to vector<32x256xf32>
    %188 = arith.mulf %186, %187 : vector<32x256xf32>
    %189 = vector.broadcast %168 : vector<1x256xf32> to vector<32x256xf32>
    %190 = arith.addf %188, %189 : vector<32x256xf32>
    %191 = arith.truncf %190 : vector<32x256xf32> to vector<32x256xbf16>
    %c0_54 = arith.constant 0 : index
    %c0_55 = arith.constant 0 : index
    %192 = vector.load %arg10[%c0_54, %c0_55] : memref<256x1024xbf16, #tpu.memory_space<vmem>>, vector<256x1024xbf16>
    %cst_56 = arith.constant dense<0.000000e+00> : vector<32x1024xf32>
    %193 = tpu.matmul %191, %192, %cst_56 {dimension_numbers = #tpu.dot_dimension_numbers<[1], [0], [0], [1], [0, 0, 1, 1], [], []>} : vector<32x256xbf16>, vector<256x1024xbf16>, vector<32x1024xf32> -> vector<32x1024xf32>
    %c0_57 = arith.constant 0 : index
    %c0_58 = arith.constant 0 : index
    %194 = vector.load %arg11[%c0_57, %c0_58] : memref<1x1024xf32, #tpu.memory_space<vmem>>, vector<1x1024xf32>
    %195 = vector.broadcast %194 : vector<1x1024xf32> to vector<32x1024xf32>
    %196 = arith.addf %193, %195 : vector<32x1024xf32>
    %cst_59 = arith.constant 0.000000e+00 : f32
    %197 = vector.broadcast %cst_59 : f32 to vector<32x1024xf32>
    %198 = arith.maximumf %196, %197 : vector<32x1024xf32>
    %199 = arith.truncf %198 : vector<32x1024xf32> to vector<32x1024xbf16>
    %c0_60 = arith.constant 0 : index
    %c0_61 = arith.constant 0 : index
    %200 = vector.load %arg12[%c0_60, %c0_61] : memref<1024x256xbf16, #tpu.memory_space<vmem>>, vector<1024x256xbf16>
    %cst_62 = arith.constant dense<0.000000e+00> : vector<32x256xf32>
    %201 = tpu.matmul %199, %200, %cst_62 {dimension_numbers = #tpu.dot_dimension_numbers<[1], [0], [0], [1], [0, 0, 1, 1], [], []>} : vector<32x1024xbf16>, vector<1024x256xbf16>, vector<32x256xf32> -> vector<32x256xf32>
    %c0_63 = arith.constant 0 : index
    %c0_64 = arith.constant 0 : index
    %202 = vector.load %arg13[%c0_63, %c0_64] : memref<1x256xf32, #tpu.memory_space<vmem>>, vector<1x256xf32>
    %203 = vector.broadcast %202 : vector<1x256xf32> to vector<32x256xf32>
    %204 = arith.addf %201, %203 : vector<32x256xf32>
    %205 = arith.addf %166, %204 : vector<32x256xf32>
    %206 = vector.shape_cast %205 : vector<32x256xf32> to vector<1x32x256xf32>
    %c0_65 = arith.constant 0 : index
    %c0_66 = arith.constant 0 : index
    %c0_67 = arith.constant 0 : index
    %207 = vector.load %arg14[%c0_65, %c0_66, %c0_67] : memref<1x32x256xf32, #tpu.memory_space<vmem>>, vector<1x32x256xf32>
    tpu.vector_store %arg14[%c0_65, %c0_66, %c0_67], %206 {strides = array<i32>} : memref<1x32x256xf32, #tpu.memory_space<vmem>>, vector<1x32x256xf32>,
    return
  }
  func.func @transform_0(%arg0: i32) -> (i32, i32, i32) {
    %c0_i32 = arith.constant 0 : i32
    %c0_i32_0 = arith.constant 0 : i32
    %c0_i32_1 = arith.constant 0 : i32
    return %arg0, %c0_i32, %c0_i32_0 : i32, i32, i32
  }
  func.func @transform_1(%arg0: i32) -> (i32, i32, i32) {
    %c0_i32 = arith.constant 0 : i32
    %c0_i32_0 = arith.constant 0 : i32
    %c0_i32_1 = arith.constant 0 : i32
    %c0_i32_2 = arith.constant 0 : i32
    return %c0_i32, %c0_i32_0, %c0_i32_1 : i32, i32, i32
  }
  func.func @transform_2(%arg0: i32) -> (i32, i32) {
    %c0_i32 = arith.constant 0 : i32
    %c0_i32_0 = arith.constant 0 : i32
    %c0_i32_1 = arith.constant 0 : i32
    return %c0_i32, %c0_i32_0 : i32, i32
  }
  func.func @transform_3(%arg0: i32) -> (i32, i32) {
    %c0_i32 = arith.constant 0 : i32
    %c0_i32_0 = arith.constant 0 : i32
    %c0_i32_1 = arith.constant 0 : i32
    return %c0_i32, %c0_i32_0 : i32, i32
  }
  func.func @transform_4(%arg0: i32) -> (i32, i32) {
    %c0_i32 = arith.constant 0 : i32
    %c0_i32_0 = arith.constant 0 : i32
    %c0_i32_1 = arith.constant 0 : i32
    return %c0_i32, %c0_i32_0 : i32, i32
  }
  func.func @transform_5(%arg0: i32) -> (i32, i32) {
    %c0_i32 = arith.constant 0 : i32
    %c0_i32_0 = arith.constant 0 : i32
    %c0_i32_1 = arith.constant 0 : i32
    return %c0_i32, %c0_i32_0 : i32, i32
  }
  func.func @transform_6(%arg0: i32) -> (i32, i32) {
    %c0_i32 = arith.constant 0 : i32
    %c0_i32_0 = arith.constant 0 : i32
    %c0_i32_1 = arith.constant 0 : i32
    return %c0_i32, %c0_i32_0 : i32, i32
  }
  func.func @transform_7(%arg0: i32) -> (i32, i32) {
    %c0_i32 = arith.constant 0 : i32
    %c0_i32_0 = arith.constant 0 : i32
    %c0_i32_1 = arith.constant 0 : i32
    return %c0_i32, %c0_i32_0 : i32, i32
  }
  func.func @transform_8(%arg0: i32) -> (i32, i32) {
    %c0_i32 = arith.constant 0 : i32
    %c0_i32_0 = arith.constant 0 : i32
    %c0_i32_1 = arith.constant 0 : i32
    return %c0_i32, %c0_i32_0 : i32, i32
  }
  func.func @transform_9(%arg0: i32) -> (i32, i32) {
    %c0_i32 = arith.constant 0 : i32
    %c0_i32_0 = arith.constant 0 : i32
    %c0_i32_1 = arith.constant 0 : i32
    return %c0_i32, %c0_i32_0 : i32, i32
  }
  func.func @transform_10(%arg0: i32) -> (i32, i32) {
    %c0_i32 = arith.constant 0 : i32
    %c0_i32_0 = arith.constant 0 : i32
    %c0_i32_1 = arith.constant 0 : i32
    return %c0_i32, %c0_i32_0 : i32, i32
  }
  func.func @transform_11(%arg0: i32) -> (i32, i32) {
    %c0_i32 = arith.constant 0 : i32
    %c0_i32_0 = arith.constant 0 : i32
    %c0_i32_1 = arith.constant 0 : i32
    return %c0_i32, %c0_i32_0 : i32, i32
  }
  func.func @transform_12(%arg0: i32) -> (i32, i32) {
    %c0_i32 = arith.constant 0 : i32
    %c0_i32_0 = arith.constant 0 : i32
    %c0_i32_1 = arith.constant 0 : i32
    return %c0_i32, %c0_i32_0 : i32, i32
  }
  func.func @transform_13(%arg0: i32) -> (i32, i32, i32) {
    %c0_i32 = arith.constant 0 : i32
    %c0_i32_0 = arith.constant 0 : i32
    %c0_i32_1 = arith.constant 0 : i32
    return %arg0, %c0_i32, %c0_i32_0 : i32, i32, i32
  }
}

</mosaic_0001>

<bundles_post_ra>
// kernel: tpu_custom_call.1
= control target key start
LH: loop header
LB: loop body
LE: loop exit
PB: predicated region body
PF: predicated region fallthrough
CT: control target
= control target key end

     0   :  { %s8425_s0 = inlined_call_operand.hbm [shape: f32[2,32,256], index: 0, kind: input, shape index: {}]   ;;  %s8426_s1 = inlined_call_operand.hbm [shape: f32[1,32,32], index: 1, kind: input, shape index: {}]   ;;  %s8427_s2 = inlined_call_operand.vmem [shape: f32[1,256], index: 2, kind: input, shape index: {}]   ;;  %s8428_s3 = inlined_call_operand.vmem [shape: f32[1,256], index: 3, kind: input, shape index: {}]   ;;  %s8429_s4 = inlined_call_operand.hbm [shape: bf16[256,1152], index: 4, kind: input, shape index: {}]   ;;  %s8430_s5 = inlined_call_operand.hbm [shape: bf16[384,256], index: 5, kind: input, shape index: {}]   ;;  %s8431_s6 = inlined_call_operand.vmem [shape: f32[1,256], index: 6, kind: input, shape index: {}]   ;;  %s8432_s7 = inlined_call_operand.vmem [shape: f32[1,256], index: 7, kind: input, shape index: {}]   ;;  %s8433_s8 = inlined_call_operand.hbm [shape: f32[1,256], index: 8, kind: input, shape index: {}]   ;;  %s8434_s9 = inlined_call_operand.hbm [shape: bf16[256,1024], index: 9, kind: input, shape index: {}]   ;;  %s8435_s10 = inlined_call_operand.vmem [shape: f32[1,1024], index: 10, kind: input, shape index: {}]   ;;  %s8436_s11 = inlined_call_operand.hbm [shape: bf16[1024,256], index: 11, kind: input, shape index: {}]   ;;  %s8437_s12 = inlined_call_operand.vmem [shape: f32[1,256], index: 12, kind: input, shape index: {}]   ;;  %s8438_s13 = inlined_call_operand.hbm [shape: f32[2,32,256], index: 13, kind: output, shape index: {}]  }
   0x1   :  { %8445 = sst [smem:[#allocation21_spill]] %s8426_s1 }
   0x2   :  { %8446 = sst [smem:[#allocation22_spill]] %s8429_s4 }
   0x3   :  { %8447 = sst [smem:[#allocation23_spill]] %s8430_s5 }
   0x4   :  { %8448 = sst [smem:[#allocation24_spill]] %s8433_s8 }
   0x5   :  { %8449 = sst [smem:[#allocation25_spill]] %s8434_s9 }
   0x6   :  { %8450 = sst [smem:[#allocation26_spill]] %s8436_s11 }
   0x7   :  { %18 = vsyncpa [#allocation3], 0 }
   0x8   :  { %20 = vsyncpa [#allocation3 + $0x1], 0 }
   0x9   :  { %21 = vsyncpa [#allocation6], 0 }
   0xa   :  { %22 = vsyncpa [#allocation9], 0 }
   0xb   :  { %23 = vsyncpa [#allocation12], 0 }
   0xc   :  { %24 = vsyncpa [#allocation4], 0 }
   0xd   :  { %26 = vsyncpa [#allocation4 + $0x1], 0  ;;  %s7420_s25 = smov 0   ;;  %s7422_s26 = smov 0  }
   0xe   :  { %s7424_s27 = smov 0   ;;  %s7426_s28 = smov 0  }
   0xf LB: > { %s7330_s29 = smov [#allocation5]   ;;  %s7441_s14 = sadd.s32 4294967295, %s7328_s28   ;;  %s7328_s28 = sphi %s7426_s28, %s8484_s28   ;;  %s7324_s27 = sphi %s7424_s27, %s8483_s27   ;;  %s7320_s26 = sphi %s7422_s26, %s8482_s26   ;;  %s7316_s25 = sphi %s7420_s25, %s8481_s25  }
  0x10   : > { %s353_s30 = sshll.u32 %s7330_s29, 4  ;;  %p5674_p0 = scmp.ge.s32.totalorder %s7328_s28, 1  ;;  %s354_s30 = int_to_ptr.vmem [resolvable:$true] %s353_s30 }
  0x11   : > { %p8441_p1 = scmp.eq.s32.totalorder %s7441_s14, 0  ;;  %p341_p2 = scmp.lt.s32.totalorder %s7328_s28, 3 }
  0x12   : > { %s7331_s16 = smov [#allocation8]   ;;  %s7332_s19 = smov [#allocation11]  }
  0x13   : > { %p7446_p3 = pnand %p5674_p0, %p341_p2  ;;  %s385_s17 = sshll.u32 %s7331_s16, 4  ;;  %s7459_s17 = int_to_ptr.vmem [resolvable:$true] %s385_s17 }
  0x14   : > { %s415_s20 = sshll.u32 %s7332_s19, 4  ;;  %s7079_s22 = scalar_lea.vmem %s354_s30, 512  ;;  %s7461_s20 = int_to_ptr.vmem [resolvable:$true] %s415_s20 }
  0x15   : > { %s8451_s15 = scalar_select %p7446_p3, 1, 0 }
  0x16   : > { %p6385_p5 = pneg %p7446_p3  ;;  %p7080_p8 = scmp.ne.s32.totalorder %s354_s30, %s7079_s22 }
  0x17   : > { %p7087_p11 = scmp.lt.s32.totalorder %s354_s30, %s354_s30  ;;  %p7088_p12 = scmp.lt.s32.totalorder %s7079_s22, %s7079_s22 }
  0x18   : > { %p7455_p6 = pnand %p6385_p5, %p8441_p1 }
  0x19   : > { %p7089_p13 = por %p7088_p12, %p7087_p11 }
  0x1a   : > { %p7465_p7 = pneg %p7455_p6 }
  0x1c   : > { %p7082_p9 = pnand %p7080_p8, %p7465_p7 }
  0x1e   : > { %p7083_p10 = pneg %p7082_p9 }
  0x20   : > { %p7090_p0 = pnand %p7089_p13, %p7083_p10 }
  0x22   : > { %7093 = shalt.err (!%p7090_p0)
}
  0x23   : > { %s8439_s23 = smov 128   ;;  %s8440_s24 = smov 8  }
  0x24   : > { %s8454_s1 = sld [smem:[#allocation21_spill]]  ;;  %s7105_s19 = scalar_lea.vmem %s7459_s17, 6144 }
  0x25   : > { %p7106_p2 = scmp.ne.s32.totalorder %s7459_s17, %s7105_s19  ;;  %p7113_p9 = scmp.lt.s32.totalorder %s7459_s17, %s7459_s17 }
  0x26   : > { %p7114_p10 = scmp.lt.s32.totalorder %s7105_s19, %s7105_s19 }
  0x27   : > { %p7108_p5 = pnand %p7106_p2, %p7465_p7 }
  0x28   : > { %p7115_p11 = por %p7114_p10, %p7113_p9 }
  0x29   : > { %p7109_p8 = pneg %p7108_p5 }
  0x2a   : > { %6388 = dma.hbm_to_vmem [thread:$0]  (!%p7455_p6), %s8454_s1, 512, %s354_s30, [#allocation6], %s8439_s23, %s8439_s23, %s8440_s24  }
  0x2b   : > { %p7116_p12 = pnand %p7115_p11, %p7109_p8 }
  0x2d   : > { %7119 = shalt.err (!%p7116_p12)
}
  0x2e   : > { %s8455_s5 = sld [smem:[#allocation23_spill]]  ;;  %s7131_s30 = scalar_lea.vmem %s7461_s20, 16384 }
  0x2f   : > { %p7132_p13 = scmp.ne.s32.totalorder %s7461_s20, %s7131_s30  ;;  %p7139_p5 = scmp.lt.s32.totalorder %s7461_s20, %s7461_s20 }
  0x30   : > { %p7140_p8 = scmp.lt.s32.totalorder %s7131_s30, %s7131_s30 }
  0x31   : > { %p7134_p0 = pnand %p7132_p13, %p7465_p7 }
  0x32   : > { %p7141_p9 = por %p7140_p8, %p7139_p5 }
  0x33   : > { %p7135_p2 = pneg %p7134_p0 }
  0x34   : > { %6394 = dma.hbm_to_vmem [thread:$0]  (!%p7455_p6), %s8455_s5, 6144, %s7459_s17, [#allocation9], %s8439_s23, %s8439_s23, %s8440_s24  }
  0x35   : > { %p7142_p10 = pnand %p7141_p9, %p7135_p2 }
  0x37   : > { %7145 = shalt.err (!%p7142_p10)
}
  0x38   : > { %s7335_s16 = smov 512   ;;  %s7336_s19 = smov 32  }
  0x39   : > { %s8456_s9 = sld [smem:[#allocation25_spill]]  ;;  %s7337_s17 = smov [#allocation7]  }
  0x3a   : > { %s372_s23 = sshll.u32 %s7337_s17, 4  ;;  %s373_s23 = int_to_ptr.vmem [resolvable:$true] %s372_s23 }
  0x3b   : > { %s7157_s24 = scalar_lea.vmem %s373_s23, 18432  ;;  %p7165_p0 = scmp.lt.s32.totalorder %s373_s23, %s373_s23 }
  0x3c   : > { %p7158_p11 = scmp.ne.s32.totalorder %s373_s23, %s7157_s24  ;;  %p7166_p2 = scmp.lt.s32.totalorder %s7157_s24, %s7157_s24 }
  0x3e   : > { %p7160_p12 = pnand %p7158_p11, %p7465_p7  ;;  %p7167_p5 = por %p7166_p2, %p7165_p0 }
  0x3f   : > { %6400 = dma.hbm_to_vmem [thread:$0]  (!%p7455_p6), %s8456_s9, 16384, %s7461_s20, [#allocation12], %s7335_s16, %s7335_s16, %s7336_s19  }
  0x40   : > { %p7161_p13 = pneg %p7160_p12 }
  0x42   : > { %p7168_p8 = pnand %p7167_p5, %p7161_p13 }
  0x44   : > { %7171 = shalt.err (!%p7168_p8)
}
  0x45   : > { %s7338_s30 = smov 576   ;;  %s7339_s1 = smov 36  }
  0x46   : > { %s8457_s4 = sld [smem:[#allocation22_spill]]  ;;  %s7340_s16 = smov [#allocation10]  }
  0x47   : > { %s405_s19 = sshll.u32 %s7340_s16, 4  ;;  %s7341_s29 = smov [#allocation13]   ;;  %s406_s19 = int_to_ptr.vmem [resolvable:$true] %s405_s19 }
  0x48   : > { %s431_s17 = sshll.u32 %s7341_s29, 4  ;;  %s7183_s5 = scalar_lea.vmem %s406_s19, 32  ;;  %s432_s17 = int_to_ptr.vmem [resolvable:$true] %s431_s17 }
  0x49   : > { %p7184_p9 = scmp.ne.s32.totalorder %s406_s19, %s7183_s5  ;;  %p7191_p12 = scmp.lt.s32.totalorder %s406_s19, %s406_s19 }
  0x4a   : > { %p7192_p13 = scmp.lt.s32.totalorder %s7183_s5, %s7183_s5 }
  0x4b   : > { %p7186_p10 = pnand %p7184_p9, %p7465_p7 }
  0x4c   : > { %6391 = dma.hbm_to_vmem [thread:$0]  (!%p7455_p6), %s8457_s4, 18432, %s373_s23, [#allocation6], %s7338_s30, %s7338_s30, %s7339_s1  }
  0x4d   : > { %p7187_p11 = pneg %p7186_p10  ;;  %p7193_p0 = por %p7192_p13, %p7191_p12 }
  0x4f   : > { %p7194_p2 = pnand %p7193_p0, %p7187_p11 }
  0x51   : > { %7197 = shalt.err (!%p7194_p2)
}
  0x52   : > { %s8458_s8 = sld [smem:[#allocation24_spill]]  ;;  %s7209_s23 = scalar_lea.vmem %s432_s17, 16384 }
  0x53   : > { %p7210_p5 = scmp.ne.s32.totalorder %s432_s17, %s7209_s23  ;;  %p7217_p1 = scmp.lt.s32.totalorder %s432_s17, %s432_s17 }
  0x54   : > { %p7218_p9 = scmp.lt.s32.totalorder %s7209_s23, %s7209_s23 }
  0x55   : > { %p7212_p8 = pnand %p7210_p5, %p7465_p7 }
  0x56   : > { %p7219_p10 = por %p7218_p9, %p7217_p1 }
  0x57   : > { %p7213_p4 = pneg %p7212_p8 }
  0x58   : > { %6397 = dma.hbm_to_vmem [thread:$0]  (!%p7455_p6), %s8458_s8, 32, %s406_s19, [#allocation9]  }
  0x59   : > { %p7220_p3 = pnand %p7219_p10, %p7213_p4 }
  0x5b   : > { %7223 = shalt.err (!%p7220_p3)
}
  0x5c   : > { %s8459_s5 = smov 8   ;;  %s8460_s30 = smov 128  }
  0x5d   : > { %s8461_s11 = sld [smem:[#allocation26_spill]]  ;;  %s5673_s18 = sadd.s32 4294967294, %s7328_s28  }
  0x5e   : > { %s7532_s21 = sadd.s32 1, %s7328_s28   ;;  %s39_s19 = sadd.s32 1, %s7324_s27 }
  0x5f   : > { %s36_s16 = ssub.s32 %s7328_s28, %s7532_s21  ;;  %p46_p3 = scmp.ne.s32.totalorder %s7324_s27, %s7320_s26 }
  0x60   : > { %p37_p1 = scmp.eq.s32.totalorder %s36_s16, 0  ;;  %p47_p4 = scmp.eq.s32.totalorder %s7328_s28, 0 }
  0x61   : > { %p52_p7 = scmp.ne.s32.totalorder %s7320_s26, %s7316_s25  ;;  %p8464_p12 = scmp.eq.s32.totalorder %s7441_s14, 0 }
  0x62   : > { %s7543_s29 = scalar_select %p37_p1, %s7324_s27, %s39_s19  }
  0x63   : > { %6403 = dma.hbm_to_vmem [thread:$0]  (!%p7455_p6), %s8461_s11, 16384, %s432_s17, [#allocation12], %s8460_s30, %s8460_s30, %s8459_s5  }
  0x64   : > { %8462 = sst [smem:[#allocation20_spill]] %s7543_s29  ;;  %p7545_p11 = por %p47_p4, %p46_p3 }
  0x65   : > { %p7551_p6 = por %p8464_p12, %p52_p7  ;;  %p328_p13 = scmp.eq.s32.totalorder %s7441_s14, 1 }
  0x66   : > { %p334_p0 = scmp.eq.s32.totalorder %s5673_s18, 1  ;;  %p6418_p2 = scmp.lt.s32.totalorder %s7328_s28, 2 }
  0x67   : > { %s8465_s17 = scalar_select %p7551_p6, 1, 0 }
  0x68   : > { %s448_s1 = sand.u32 1, %s7324_s27   ;;  %p7558_p5 = por %p328_p13, %p46_p3 }
  0x69   : > { %p7562_p8 = por %p334_p0, %p52_p7  ;;  %s5682_s30 = sshll.u32 %s448_s1, 6 }
  0x6a   : > { %s8466_s23 = scalar_select %p7558_p5, 1, 0 }
  0x6b   : > { %s8467_s5 = scalar_select %p7562_p8, 1, 0 }
  0x6c   : > { %s6171_s22 = sshll.u32 %s7328_s28, 10  ;;  %s452_s18 = scalar_lea.vmem [#allocation2], %s5682_s30 }
  0x6d   : > { %s7570_s19 = scalar_lea.hbm %s8425_s0, %s6171_s22  ;;  %s459_s4 = sshll.u32 %s452_s18, 4  ;;  %s7572_s4 = int_to_ptr.vmem [resolvable:$true] %s459_s4 }
  0x6e   : > { %p7576_p9 = pnand %p6418_p2, %p7545_p11  ;;  %s7580_s9 = scalar_lea.sflag [#allocation3], %s448_s1 }
  0x6f   : > { %s7224_s11 = scalar_lea.hbm %s7570_s19, 1024  ;;  %s7229_s30 = scalar_lea.hbm %s8425_s0, 2048 }
  0x70   : > { %p7225_p10 = scmp.ne.s32.totalorder %s7570_s19, %s7224_s11  ;;  %p7226_p1 = pneg %p7576_p9 }
  0x71   : > { %p7230_p7 = scmp.lt.s32.totalorder %s7570_s19, %s8425_s0  ;;  %p7231_p11 = scmp.lt.s32.totalorder %s7229_s30, %s7224_s11 }
  0x72   : > { %p7227_p3 = pnand %p7226_p1, %p7225_p10 }
  0x73   : > { %p7232_p12 = por %p7231_p11, %p7230_p7 }
  0x74   : > { %p7228_p4 = pneg %p7227_p3 }
  0x76   : > { %p7233_p13 = pnand %p7232_p12, %p7228_p4 }
  0x78   : > { %7236 = shalt.err (!%p7233_p13)
}
  0x79   : > { %s7237_s24 = scalar_lea.vmem %s7572_s4, 1024  ;;  %s7342_s1 = smov [#allocation2]  }
  0x7a   : > { %p7238_p0 = scmp.ne.s32.totalorder %s7572_s4, %s7237_s24  ;;  %s7242_s29 = sshll.u32 %s7342_s1, 4  ;;  %s7243_s29 = int_to_ptr.vmem [resolvable:$false] %s7242_s29 }
  0x7b   : > { %s7244_s22 = scalar_lea.vmem %s7243_s29, 2048  ;;  %p7245_p3 = scmp.lt.s32.totalorder %s7572_s4, %s7243_s29 }
  0x7c   : > { %p7240_p2 = pnand %p7238_p0, %p7226_p1  ;;  %p7246_p8 = scmp.lt.s32.totalorder %s7244_s22, %s7237_s24 }
  0x7e   : > { %p7241_p10 = pneg %p7240_p2  ;;  %p7247_p5 = por %p7246_p8, %p7245_p3 }
  0x80   : > { %p7248_p6 = pnand %p7247_p5, %p7241_p10 }
  0x82   : > { %7251 = shalt.err (!%p7248_p6)
}
  0x83   : > { %s7343_s11 = smov 256   ;;  %s7344_s20 = smov 16  }
  0x84   : > { %6407 = dma.hbm_to_vmem [thread:$0]  (!%p7576_p9), %s7570_s19, 1024, %s7572_s4, %s7580_s9, %s7343_s11, %s7343_s11, %s7344_s20  }
  0x85   : > { %p8469_p1 = scmp.ne.s32.totalorder %s8451_s15, 0 }
  0x86   : > { %s7604_s30 = sand.u32 (!%p8469_p1), 1, %s7320_s26   ;;  %p8470_p6 = scmp.ne.s32.totalorder (!%p8469_p1), %s8465_s17, 0 }
  0x87   : > { %471 = sbr.rel (%p8469_p1) target bundleno = 3959 (0xf77), region = 72  ;;  %s5686_s29 = sshll.u32 (!%p8469_p1), %s7604_s30, 6 }
  0x88   : > { %s474_s16 = scalar_lea.sflag (!%p8469_p1), [#allocation3], %s7604_s30  ;;  %s7610_s18 = scalar_lea.vmem (!%p8469_p1), [#allocation2], %s5686_s29 }
  0x8c   : > { %7295 = dma.done.wait (%p8470_p6), %s474_s16, 1024  }
  0x8d   : > { %7297 = vsyncadd (%p8470_p6), %s474_s16, 4294966272  ;;  %p8471_p5 = scmp.eq.s32.totalorder %s7441_s14, 0 }
  0x8f   : > { %7299 = dma.done.wait (%p8471_p5), [#allocation6], 18944   ;;  %p8472_p8 = pmov %p8471_p5 }
  0x90   : > { %p8473_p9 = pmov %p8471_p5 }
  0x91   : > { %7301 = vsyncadd (%p8472_p8), [#allocation6], 4294948352 }
  0x92   : > { %7303 = dma.done.wait (%p8473_p9), [#allocation9], 6176   ;;  %p8474_p4 = pmov %p8471_p5 }
  0x94   : > { %7305 = vsyncadd (%p8474_p4), [#allocation9], 4294961120  ;;  %p8475_p7 = pmov %p8474_p4 }
  0x95   : > { %p8476_p11 = pmov %p8474_p4 }
  0x96   : > { %7307 = dma.done.wait (%p8475_p7), [#allocation12], 32768  }
  0x97   : > { %7309 = vsyncadd (%p8476_p11), [#allocation12], 4294934528  ;;  %v7629_v0 = vld [vmem:[%s7610_s18] sm:$0xff]  ;;  %v7632_v1 = vld [vmem:[%s7610_s18 + $0x8] sm:$0xff]  ;;  %vm1841_vm0 = vcmask 523264   ;;  %s7345_s17 = smov 64  }
  0x98   : > { %v7635_v2 = vld [vmem:[%s7610_s18 + $0x20] sm:$0xff]  ;;  %v555_v3 = vadd.f32 %v7632_v1, %v7629_v0  ;;  %v7640_v4 = vld [vmem:[%s7610_s18 + $0x28] sm:$0xff]  ;;  %v7643_v5 = vld [vmem:[%s7610_s18 + $0x10] sm:$0xff]  ;;  %vm1903_vm1 = vcmask 261120   ;;  %s8358_s4 = scalar_lea.vmem [#allocation14], %s5686_s29  ;;  %s6172_s8 = sshll.u32 %s7441_s14, 10 }
  0x99   : > { %v7646_v6 = vld [vmem:[%s7610_s18 + $0x18] sm:$0xff]  ;;  %v561_v7 = vadd.f32 %v7640_v4, %v7635_v2  ;;  %v7651_v8 = vld [vmem:[%s7610_s18 + $0x30] sm:$0xff]  ;;  %v6478_v13 = vld [vmem:[#allocation7 + $0x204] ss:$36 sps:$4 sm:$0xff]   ;;  %s5543_s29 = sshll.u32 %s8358_s4, 4  ;;  %s5530_s14 = scalar_lea.sflag [#allocation4], %s7604_s30  ;;  %s8372_s29 = int_to_ptr.vmem [resolvable:$true] %s5543_s29 }
  0x9a   : > { %v7654_v9 = vld [vmem:[%s7610_s18 + $0x38] sm:$0xff]  ;;  %556 = vadd.xlane.f32.xlu0 %v555_v3  ;;  %v558_v10 = vadd.f32 %v7646_v6, %v7643_v5  ;;  %v6481_v15 = vld [vmem:[#allocation7 + $0x200] ss:$36 sps:$4 sm:$0xff]   ;;  %1611 = vmatprep.subr.bf16.mxu1 %v6478_v13  ;;  %v6486_v18 = vld [vmem:[#allocation7 + $0x1b0] ss:$36 sps:$4 sm:$0xff]   ;;  %s7252_s19 = scalar_lea.vmem %s8372_s29, 1024 }
  0x9b   : > { %562 = vadd.xlane.f32.xlu1 %v561_v7  ;;  %v564_v11 = vadd.f32 %v7654_v9, %v7651_v8  ;;  %v6476_v12 = vld [vmem:[#allocation7 + $0x1fc] ss:$36 sps:$4 sm:$0xff]   ;;  %v6482_v16 = vld [vmem:[#allocation7 + $0x1b4] ss:$36 sps:$4 sm:$0xff]   ;;  %1612 = vmatpush1.bf16.msra.mxu1 %v6481_v15  ;;  %v6488_v20 = vld [vmem:[#allocation7 + $0x16c] ss:$36 sps:$4 sm:$0xff]   ;;  %p7253_p12 = scmp.ne.s32.totalorder %s8372_s29, %s7252_s19 }
  0x9c   : > { %v6480_v14 = vld [vmem:[#allocation7 + $0x1f8] ss:$36 sps:$4 sm:$0xff]   ;;  %1558 = vmatprep.subr.bf16.mxu0 %v6476_v12  ;;  %v6492_v22 = vld [vmem:[#allocation7 + $0x168] ss:$36 sps:$4 sm:$0xff]   ;;  %v6493_v23 = vld [vmem:[#allocation7 + $0x170] ss:$36 sps:$4 sm:$0xff]  }
  0x9d   : > { %v6484_v17 = vld [vmem:[#allocation7 + $0x1bc] ss:$36 sps:$4 sm:$0xff]   ;;  %1559 = vmatpush1.bf16.msra.mxu0 %v6480_v14  ;;  %v6490_v21 = vld [vmem:[#allocation7 + $0x174] ss:$36 sps:$4 sm:$0xff]   ;;  %v6494_v24 = vld [vmem:[#allocation7 + $0x124] ss:$36 sps:$4 sm:$0xff]  }
  0x9e   : > { %559 = vadd.xlane.f32.xlu0 %v558_v10  ;;  %v6487_v19 = vld [vmem:[#allocation7 + $0x1b8] ss:$36 sps:$4 sm:$0xff]   ;;  %1560 = vmatprep.subr.bf16.mxu0 %v6482_v16  ;;  %v6496_v25 = vld [vmem:[#allocation7 + $0x12c] ss:$36 sps:$4 sm:$0xff]   ;;  %v6498_v26 = vld [vmem:[#allocation7 + $0x120] ss:$36 sps:$4 sm:$0xff]  }
  0x9f   : > { %565 = vadd.xlane.f32.xlu1 %v564_v11  ;;  %1613 = vmatprep.subr.bf16.mxu1 %v6484_v17  ;;  %v6499_v27 = vld [vmem:[#allocation7 + $0x128] ss:$36 sps:$4 sm:$0xff]   ;;  %v6500_v28 = vld [vmem:[#allocation7 + $0xdc] ss:$36 sps:$4 sm:$0xff]   ;;  %v6506_v32 = vld [vmem:[#allocation7 + $0x94] ss:$36 sps:$4 sm:$0xff]  }
  0xa0   : > { %1614 = vmatpush1.bf16.msra.mxu1 %v6487_v19  ;;  %v6502_v29 = vld [vmem:[#allocation7 + $0xe4] ss:$36 sps:$4 sm:$0xff]   ;;  %v6504_v30 = vld [vmem:[#allocation7 + $0xd8] ss:$36 sps:$4 sm:$0xff]   ;;  %v6510_v34 = vld [vmem:[#allocation7 + $0x90] ss:$36 sps:$4 sm:$0xff]  }
  0xa1   : > { %1561 = vmatpush1.bf16.msra.mxu0 %v6486_v18  ;;  %1615 = vmatprep.subr.bf16.mxu1 %v6490_v21  ;;  %v6505_v31 = vld [vmem:[#allocation7 + $0xe0] ss:$36 sps:$4 sm:$0xff]   ;;  %v6511_v35 = vld [vmem:[#allocation7 + $0x98] ss:$36 sps:$4 sm:$0xff]   ;;  %v6512_v36 = vld [vmem:[#allocation7 + $0x4c] ss:$36 sps:$4 sm:$0xff]  }
  0xa2   : > { %1562 = vmatprep.subr.bf16.mxu0 %v6488_v20  ;;  %v6508_v33 = vld [vmem:[#allocation7 + $0x9c] ss:$36 sps:$4 sm:$0xff]   ;;  %v6514_v37 = vld [vmem:[#allocation7 + $0x54] ss:$36 sps:$4 sm:$0xff]   ;;  %v6516_v38 = vld [vmem:[#allocation7 + $0x48] ss:$36 sps:$4 sm:$0xff]  }
  0xa3   : > { %v6517_v39 = vld [vmem:[#allocation7 + $0x50] ss:$36 sps:$4 sm:$0xff]   ;;  %v6518_v40 = vld [vmem:[#allocation7 + $0x4] ss:$36 sps:$4 sm:$0xff]   ;;  %v6524_v44 = vld [vmem:[#allocation7 + $0x43c] ss:$36 sps:$4 sm:$0xff]  }
  0xa4   : > { %1616 = vmatpush1.bf16.msra.mxu1 %v6493_v23  ;;  %v6520_v41 = vld [vmem:[#allocation7 + $0xc] ss:$36 sps:$4 sm:$0xff]   ;;  %v6522_v42 = vld [vmem:[#allocation7] ss:$36 sps:$4 sm:$0xff]   ;;  %v6528_v46 = vld [vmem:[#allocation7 + $0x438] ss:$36 sps:$4 sm:$0xff]  }
  0xa5   : > { %1563 = vmatpush1.bf16.msra.mxu0 %v6492_v22  ;;  %1617 = vmatprep.subr.bf16.mxu1 %v6496_v25  ;;  %v6523_v43 = vld [vmem:[#allocation7 + $0x8] ss:$36 sps:$4 sm:$0xff]   ;;  %v6529_v47 = vld [vmem:[#allocation7 + $0x440] ss:$36 sps:$4 sm:$0xff]   ;;  %v6534_v14 = vld [vmem:[#allocation7 + $0x3f0] ss:$36 sps:$4 sm:$0xff]  }
  0xa6   : > { %1564 = vmatprep.subr.bf16.mxu0 %v6494_v24  ;;  %v6526_v45 = vld [vmem:[#allocation7 + $0x444] ss:$36 sps:$4 sm:$0xff]   ;;  %v6532_v13 = vld [vmem:[#allocation7 + $0x3fc] ss:$36 sps:$4 sm:$0xff]   ;;  %v6536_v16 = vld [vmem:[#allocation7 + $0x3ac] ss:$36 sps:$4 sm:$0xff]  }
  0xa7   : > { %v6535_v15 = vld [vmem:[#allocation7 + $0x3f8] ss:$36 sps:$4 sm:$0xff]   ;;  %v6540_v18 = vld [vmem:[#allocation7 + $0x3a8] ss:$36 sps:$4 sm:$0xff]   ;;  %v6541_v19 = vld [vmem:[#allocation7 + $0x3b0] ss:$36 sps:$4 sm:$0xff]  }
  0xa8   : > { %1618 = vmatpush1.bf16.msra.mxu1 %v6499_v27  ;;  %v6538_v17 = vld [vmem:[#allocation7 + $0x3b4] ss:$36 sps:$4 sm:$0xff]   ;;  %v6542_v20 = vld [vmem:[#allocation7 + $0x364] ss:$36 sps:$4 sm:$0xff]   ;;  %v6544_v21 = vld [vmem:[#allocation7 + $0x36c] ss:$36 sps:$4 sm:$0xff]  }
  0xa9   : > { %1565 = vmatpush1.bf16.msra.mxu0 %v6498_v26  ;;  %1619 = vmatprep.subr.bf16.mxu1 %v6502_v29  ;;  %v6546_v22 = vld [vmem:[#allocation7 + $0x360] ss:$36 sps:$4 sm:$0xff]   ;;  %v6547_v23 = vld [vmem:[#allocation7 + $0x368] ss:$36 sps:$4 sm:$0xff]   ;;  %v6552_v26 = vld [vmem:[#allocation7 + $0x318] ss:$36 sps:$4 sm:$0xff]  }
  0xaa   : > { %1566 = vmatprep.subr.bf16.mxu0 %v6500_v28  ;;  %v6548_v24 = vld [vmem:[#allocation7 + $0x31c] ss:$36 sps:$4 sm:$0xff]   ;;  %v6550_v25 = vld [vmem:[#allocation7 + $0x324] ss:$36 sps:$4 sm:$0xff]   ;;  %v6554_v28 = vld [vmem:[#allocation7 + $0x2d4] ss:$36 sps:$4 sm:$0xff]  }
  0xab   : > { %v6553_v27 = vld [vmem:[#allocation7 + $0x320] ss:$36 sps:$4 sm:$0xff]   ;;  %p8477_p13 = scmp.ne.s32.totalorder %s8466_s23, 0  ;;  %s7347_s24 = smov [#allocation14]  }
  0xac   : > { %1620 = vmatpush1.bf16.msra.mxu1 %v6505_v31  ;;  %v6556_v29 = vld [vmem:[#allocation7 + $0x2dc] ss:$36 sps:$4 sm:$0xff]   ;;  %s7256_s1 = sshll.u32 %s7347_s24, 4  ;;  %s7257_s1 = int_to_ptr.vmem [resolvable:$false] %s7256_s1 }
  0xad   : > { %1567 = vmatpush1.bf16.msra.mxu0 %v6504_v30  ;;  %1621 = vmatprep.subr.bf16.mxu1 %v6508_v33  ;;  %v6558_v30 = vld [vmem:[#allocation7 + $0x2d0] ss:$36 sps:$4 sm:$0xff]   ;;  %v6559_v31 = vld [vmem:[#allocation7 + $0x2d8] ss:$36 sps:$4 sm:$0xff]   ;;  %p7254_p0 = pnand %p7253_p12, %p8477_p13  ;;  %s7258_s22 = scalar_lea.vmem %s7257_s1, 2048 }
  0xae   : > { %1568 = vmatprep.subr.bf16.mxu0 %v6506_v32  ;;  %v6560_v32 = vld [vmem:[#allocation7 + $0x28c] ss:$36 sps:$4 sm:$0xff]   ;;  %v6562_v33 = vld [vmem:[#allocation7 + $0x294] ss:$36 sps:$4 sm:$0xff]   ;;  %p7259_p10 = scmp.lt.s32.totalorder %s8372_s29, %s7257_s1  ;;  %p7260_p3 = scmp.lt.s32.totalorder %s7258_s22, %s7252_s19 }
  0xaf   : > { %p7255_p2 = pneg %p7254_p0 }
  0xb0   : > { %1622 = vmatpush1.bf16.msra.mxu1 %v6511_v35  ;;  %v6565_v35 = vld [vmem:[#allocation7 + $0x290] ss:$36 sps:$4 sm:$0xff]   ;;  %p7261_p1 = por %p7260_p3, %p7259_p10 }
  0xb1   : > { %1569 = vmatpush1.bf16.msra.mxu0 %v6510_v34  ;;  %1623 = vmatprep.subr.bf16.mxu1 %v6514_v37  ;;  %v6564_v34 = vld [vmem:[#allocation7 + $0x288] ss:$36 sps:$4 sm:$0xff]  }
  0xb2   : > { %1570 = vmatprep.subr.bf16.mxu0 %v6512_v36  ;;  %v6566_v36 = vld [vmem:[#allocation7 + $0x244] ss:$36 sps:$4 sm:$0xff]   ;;  %v6568_v37 = vld [vmem:[#allocation7 + $0x24c] ss:$36 sps:$4 sm:$0xff]   ;;  %p7262_p6 = pnand %p7261_p1, %p7255_p2 }
  0xb4   : > { %1624 = vmatpush1.bf16.msra.mxu1 %v6517_v39  ;;  %v6571_v39 = vld [vmem:[#allocation7 + $0x248] ss:$36 sps:$4 sm:$0xff]  }
  0xb5   : > { %1571 = vmatpush1.bf16.msra.mxu0 %v6516_v38  ;;  %1625 = vmatprep.subr.bf16.mxu1 %v6520_v41  ;;  %v6570_v38 = vld [vmem:[#allocation7 + $0x240] ss:$36 sps:$4 sm:$0xff]   ;;  %v6577_v41 = vld [vmem:[#allocation7 + $0x214] ss:$36 sps:$4 sm:$0xff]  }
  0xb6   : > { %1572 = vmatprep.subr.bf16.mxu0 %v6518_v40  ;;  %v6574_v40 = vld [vmem:[#allocation7 + $0x20c] ss:$36 sps:$4 sm:$0xff]  }
  0xb8   : > { %1626 = vmatpush1.bf16.msra.mxu1 %v6523_v43 }
  0xb9   : > { %1573 = vmatpush1.bf16.msra.mxu0 %v6522_v42  ;;  %1627 = vmatprep.subr.bf16.mxu1 %v6526_v45 }
  0xba   : > { %1574 = vmatprep.subr.bf16.mxu0 %v6524_v44 }
  0xbc   : > { %1628 = vmatpush2.bf16.msra.mxu1 %v6529_v47 }
  0xbd   : > { %1575 = vmatpush2.bf16.msra.mxu0 %v6528_v46  ;;  %1629 = vmatprep.subr.bf16.mxu1 %v6532_v13 }
  0xc0   : > { %1630 = vmatpush2.bf16.msra.mxu1 %v6535_v15 }
  0xc1   : > { %1631 = vmatprep.subr.bf16.mxu1 %v6538_v17 }
  0xc4   : > { %1632 = vmatpush2.bf16.msra.mxu1 %v6541_v19 }
  0xc5   : > { %1633 = vmatprep.subr.bf16.mxu1 %v6544_v21 }
  0xc8   : > { %1634 = vmatpush2.bf16.msra.mxu1 %v6547_v23 }
  0xc9   : > { %1635 = vmatprep.subr.bf16.mxu1 %v6550_v25 }
  0xcc   : > { %1636 = vmatpush2.bf16.msra.mxu1 %v6553_v27 }
  0xcd   : > { %1637 = vmatprep.subr.bf16.mxu1 %v6556_v29  ;;  %v6580_v29 = vld [vmem:[#allocation7 + $0x1c4] ss:$36 sps:$4 sm:$0xff]  }
  0xd0   : > { %1638 = vmatpush2.bf16.msra.mxu1 %v6559_v31 }
  0xd1   : > { %1639 = vmatprep.subr.bf16.mxu1 %v6562_v33  ;;  %v6578_v33 = vld [vmem:[#allocation7 + $0x1c0] ss:$36 sps:$4 sm:$0xff]  }
  0xd4   : > { %1640 = vmatpush2.bf16.msra.mxu1 %v6565_v35  ;;  %v6586_v35 = vld [vmem:[#allocation7 + $0x17c] ss:$36 sps:$4 sm:$0xff]  }
  0xd5   : > { %1641 = vmatprep.subr.bf16.mxu1 %v6568_v37 }
  0xd8   : > { %1642 = vmatpush2.bf16.msra.mxu1 %v6571_v39  ;;  %v6584_v39 = vld [vmem:[#allocation7 + $0x178] ss:$36 sps:$4 sm:$0xff]  }
  0xd9   : > { %1717 = vmatprep.subr.bf16.mxu1 %v6577_v41 }
 0x123   : > { %v557_v48 = vpop.xlane.xlu0 %556 }
 0x124   : > { %v568_v49 = vmul.f32 0.00390625, %v557_v48  ;;  %v563_v50 = vpop.xlane.xlu1 %562 }
 0x125   : > { %v570_v51 = vmul.f32 0.00390625, %v563_v50 }
 0x126   : > { %v7661_v52 = vsub.f32 %v7629_v0, %v568_v49  ;;  %v7664_v53 = vsub.f32 %v7632_v1, %v568_v49  ;;  %v621_v49 = vlaneseq }
 0x127   : > { %v7667_v54 = vsub.f32 %v7635_v2, %v570_v51  ;;  %v7670_v55 = vsub.f32 %v7640_v4, %v570_v51  ;;  %v560_v56 = vpop.xlane.xlu0 %559 }
 0x128   : > { %v569_v57 = vmul.f32 0.00390625, %v560_v56  ;;  %v566_v58 = vpop.xlane.xlu1 %565  ;;  %v580_v59 = vmul.f32 %v7661_v52, %v7661_v52  ;;  %v581_v60 = vmul.f32 %v7664_v53, %v7664_v53 }
 0x129   : > { %v571_v61 = vmul.f32 0.00390625, %v566_v58  ;;  %v584_v62 = vmul.f32 %v7667_v54, %v7667_v54  ;;  %v585_v63 = vmul.f32 %v7670_v55, %v7670_v55  ;;  %v7700_v58 = vshrl.u32 %v621_v49, 7  ;;  %v6599_v49 = vld [vmem:[#allocation7 + $0xf0] ss:$36 sps:$4 sm:$0xff]  }
 0x12a   : > { %v7681_v0 = vsub.f32 %v7643_v5, %v569_v57  ;;  %v7684_v1 = vsub.f32 %v7646_v6, %v569_v57  ;;  %v588_v2 = vadd.f32 %v581_v60, %v580_v59 }
 0x12b   : > { %v7687_v3 = vsub.f32 %v7651_v8, %v571_v61  ;;  %v7690_v4 = vsub.f32 %v7654_v9, %v571_v61  ;;  %v594_v7 = vadd.f32 %v585_v63, %v584_v62  ;;  %v6530_v9 = vld [vmem:[#allocation7 + $0x3f4] ss:$36 sps:$4 sm:$0xff]   ;;  %v7703_v60 = vsub.s32 1, %v7700_v58  ;;  %v553_v62 = vld [vmem:[%s8427_s2] sm:$0x3] }
 0x12c   : > { %589 = vadd.xlane.f32.xlu0 %v588_v2  ;;  %v582_v10 = vmul.f32 %v7681_v0, %v7681_v0  ;;  %v583_v11 = vmul.f32 %v7684_v1, %v7684_v1  ;;  %1576 = vmatprep.subr.bf16.mxu0 %v6530_v9  ;;  %v7706_v61 = vsub.s32 0, %v7700_v58 }
 0x12d   : > { %v586_v5 = vmul.f32 %v7687_v3, %v7687_v3  ;;  %v587_v6 = vmul.f32 %v7690_v4, %v7690_v4  ;;  %1577 = vmatpush2.bf16.msra.mxu0 %v6534_v14  ;;  %v628_v2 = vrot.slane %v553_v62, %v7703_v60 }
 0x12e   : > { %v591_v12 = vadd.f32 %v583_v11, %v582_v10  ;;  %1578 = vmatprep.subr.bf16.mxu0 %v6536_v16 }
 0x12f   : > { %v597_v8 = vadd.f32 %v587_v6, %v586_v5  ;;  %v554_v5 = vld [vmem:[%s8428_s3] sm:$0x3] }
 0x130   : > { %595 = vadd.xlane.f32.xlu0 %v594_v7  ;;  %592 = vadd.xlane.f32.xlu1 %v591_v12  ;;  %v624_v7 = vrot.slane %v553_v62, %v7706_v61  ;;  %v643_v13 = vrot.slane %v554_v5, %v7706_v61  ;;  %v6613_v62 = vld [vmem:[#allocation7 + $0x64] ss:$36 sps:$4 sm:$0xff]  }
 0x131   : > { %1579 = vmatpush2.bf16.msra.mxu0 %v6540_v18 }
 0x132   : > { %1580 = vmatprep.subr.bf16.mxu0 %v6542_v20 }
 0x134   : > { %598 = vadd.xlane.f32.xlu1 %v597_v8  ;;  %v647_v8 = vrot.slane %v554_v5, %v7703_v60  ;;  %v6617_v5 = vld [vmem:[#allocation7 + $0x18] ss:$36 sps:$4 sm:$0xff]  }
 0x135   : > { %1581 = vmatpush2.bf16.msra.mxu0 %v6546_v22 }
 0x136   : > { %1582 = vmatprep.subr.bf16.mxu0 %v6548_v24 }
 0x139   : > { %1583 = vmatpush2.bf16.msra.mxu0 %v6552_v26 }
 0x13a   : > { %1584 = vmatprep.subr.bf16.mxu0 %v6554_v28 }
 0x13d   : > { %1585 = vmatpush2.bf16.msra.mxu0 %v6558_v30  ;;  %v6583_v30 = vld [vmem:[#allocation7 + $0x1cc] ss:$36 sps:$4 sm:$0xff]  }
 0x13e   : > { %1586 = vmatprep.subr.bf16.mxu0 %v6560_v32 }
 0x141   : > { %1587 = vmatpush2.bf16.msra.mxu0 %v6564_v34  ;;  %v6581_v34 = vld [vmem:[#allocation7 + $0x1c8] ss:$36 sps:$4 sm:$0xff]  }
 0x142   : > { %1588 = vmatprep.subr.bf16.mxu0 %v6566_v36  ;;  %v6589_v36 = vld [vmem:[#allocation7 + $0x184] ss:$36 sps:$4 sm:$0xff]  }
 0x145   : > { %1589 = vmatpush2.bf16.msra.mxu0 %v6570_v38 }
 0x146   : > { %1664 = vmatprep.subr.bf16.mxu0 %v6574_v40  ;;  %v6587_v40 = vld [vmem:[#allocation7 + $0x180] ss:$36 sps:$4 sm:$0xff]  }
 0x1b5   : > { %v590_v42 = vpop.xlane.xlu0 %589 }
 0x1b6   : > { %v600_v43 = vmul.f32 0.00390625, %v590_v42  ;;  %v6592_v42 = vld [vmem:[#allocation7 + $0x134] ss:$36 sps:$4 sm:$0xff]  }
 0x1b8   : > { %v604_v44 = vadd.f32 1e-05, %v600_v43  ;;  %v6595_v43 = vld [vmem:[#allocation7 + $0x13c] ss:$36 sps:$4 sm:$0xff]  }
 0x1b9   : > { %v593_v45 = vpop.xlane.xlu1 %592  ;;  %v596_v46 = vpop.xlane.xlu0 %595 }
 0x1ba   : > { %6948 = vrsqrt.f32 %v604_v44  ;;  %v601_v47 = vmul.f32 0.00390625, %v593_v45  ;;  %v602_v48 = vmul.f32 0.00390625, %v596_v46  ;;  %v6590_v44 = vld [vmem:[#allocation7 + $0x130] ss:$36 sps:$4 sm:$0xff]   ;;  %v6593_v45 = vld [vmem:[#allocation7 + $0x138] ss:$36 sps:$4 sm:$0xff]  }
 0x1bb   : > { %v6598_v46 = vld [vmem:[#allocation7 + $0xec] ss:$36 sps:$4 sm:$0xff]  }
 0x1bc   : > { %v605_v50 = vadd.f32 1e-05, %v601_v47  ;;  %v606_v51 = vadd.f32 1e-05, %v602_v48  ;;  %v6601_v47 = vld [vmem:[#allocation7 + $0xf4] ss:$36 sps:$4 sm:$0xff]  }
 0x1bd   : > { %v599_v56 = vpop.xlane.xlu1 %598  ;;  %v6596_v48 = vld [vmem:[#allocation7 + $0xe8] ss:$36 sps:$4 sm:$0xff]  }
 0x1be   : > { %6950 = vrsqrt.f32 %v605_v50  ;;  %v603_v57 = vmul.f32 0.00390625, %v599_v56  ;;  %v6604_v50 = vld [vmem:[#allocation7 + $0xa4] ss:$36 sps:$4 sm:$0xff]  }
 0x1bf   : > { %6952 = vrsqrt.f32 %v606_v51  ;;  %v6607_v51 = vld [vmem:[#allocation7 + $0xac] ss:$36 sps:$4 sm:$0xff]   ;;  %v6602_v56 = vld [vmem:[#allocation7 + $0xa0] ss:$36 sps:$4 sm:$0xff]  }
 0x1c0   : > { %v607_v59 = vadd.f32 1e-05, %v603_v57  ;;  %v6605_v57 = vld [vmem:[#allocation7 + $0xa8] ss:$36 sps:$4 sm:$0xff]  }
 0x1c2   : > { %6954 = vrsqrt.f32 %v607_v59  ;;  %v6610_v59 = vld [vmem:[#allocation7 + $0x5c] ss:$36 sps:$4 sm:$0xff]  }
 0x1c7   : > { %v6949_v63 = vpop.eup %6948 }
 0x1c8   : > { %v612_v10 = vmul.f32 %v6949_v63, %v7661_v52  ;;  %v613_v11 = vmul.f32 %v6949_v63, %v7664_v53  ;;  %v6608_v63 = vld [vmem:[#allocation7 + $0x58] ss:$36 sps:$4 sm:$0xff]  }
 0x1ca   : > { %v632_v12 = vmul.f32 %v628_v2, %v613_v11  ;;  %v631_v9 = vmul.f32 %v624_v7, %v612_v10  ;;  %v6619_v10 = vld [vmem:[#allocation7 + $0x1c] ss:$36 sps:$4 sm:$0xff]   ;;  %v6614_v11 = vld [vmem:[#allocation7 + $0x10] ss:$36 sps:$4 sm:$0xff]  }
 0x1cb   : > { %v6951_v6 = vpop.eup %6950 }
 0x1cc   : > { %v6953_v14 = vpop.eup %6952  ;;  %v614_v15 = vmul.f32 %v6951_v6, %v7681_v0  ;;  %v615_v16 = vmul.f32 %v6951_v6, %v7684_v1  ;;  %v651_v19 = vadd.f32 %v647_v8, %v632_v12  ;;  %v650_v20 = vadd.f32 %v643_v13, %v631_v9  ;;  %v6572_v0 = vld [vmem:[#allocation7 + $0x208] ss:$36 sps:$4 sm:$0xff]   ;;  %v6575_v1 = vld [vmem:[#allocation7 + $0x210] ss:$36 sps:$4 sm:$0xff]  }
 0x1cd   : > { %v617_v52 = vmul.f32 %v6953_v14, %v7670_v55  ;;  %v616_v26 = vmul.f32 %v6953_v14, %v7667_v54  ;;  %v6622_v6 = vld [vmem:[#allocation7 + $0x44c] ss:$36 sps:$4 sm:$0xff]   ;;  %v6625_v12 = vld [vmem:[#allocation7 + $0x454] ss:$36 sps:$4 sm:$0xff]  }
 0x1ce   : > { %v634_v17 = vmul.f32 %v628_v2, %v615_v16  ;;  %v633_v53 = vmul.f32 %v624_v7, %v614_v15  ;;  %v6623_v9 = vld [vmem:[#allocation7 + $0x450] ss:$36 sps:$4 sm:$0xff]   ;;  %v6626_v15 = vld [vmem:[#allocation7 + $0x400] ss:$36 sps:$4 sm:$0xff]   ;;  %v6629_v16 = vld [vmem:[#allocation7 + $0x408] ss:$36 sps:$4 sm:$0xff]  }
 0x1cf   : > { %v6955_v18 = vpop.eup %6954  ;;  %v636_v21 = vmul.f32 %v628_v2, %v617_v52  ;;  %v635_v54 = vmul.f32 %v624_v7, %v616_v26  ;;  %v6631_v14 = vld [vmem:[#allocation7 + $0x40c] ss:$36 sps:$4 sm:$0xff]   ;;  %v6634_v52 = vld [vmem:[#allocation7 + $0x3bc] ss:$36 sps:$4 sm:$0xff]  }
 0x1d0   : > { %v618_v22 = vmul.f32 %v6955_v18, %v7687_v3  ;;  %v619_v23 = vmul.f32 %v6955_v18, %v7690_v4  ;;  %v653_v24 = vadd.f32 %v647_v8, %v634_v17  ;;  %v652_v25 = vadd.f32 %v643_v13, %v633_v53  ;;  %v6637_v17 = vld [vmem:[#allocation7 + $0x3c4] ss:$36 sps:$4 sm:$0xff]   ;;  %v6632_v53 = vld [vmem:[#allocation7 + $0x3b8] ss:$36 sps:$4 sm:$0xff]   ;;  %v6647_v26 = vld [vmem:[#allocation7 + $0x330] ss:$36 sps:$4 sm:$0xff]  }
 0x1d1   : > { %v655_v3 = vadd.f32 %v647_v8, %v636_v21  ;;  %v654_v38 = vadd.f32 %v643_v13, %v635_v54  ;;  %v6635_v18 = vld [vmem:[#allocation7 + $0x3c0] ss:$36 sps:$4 sm:$0xff]   ;;  %v6638_v21 = vld [vmem:[#allocation7 + $0x370] ss:$36 sps:$4 sm:$0xff]  }
 0x1d2   : > { %v7726_v27 = vpack.c.bf16 %v653_v24, %v651_v19  ;;  %v7728_v28 = vpack.c.bf16 %v652_v25, %v650_v20  ;;  %v638_v55 = vmul.f32 %v628_v2, %v619_v23  ;;  %v637_v31 = vmul.f32 %v624_v7, %v618_v22  ;;  %v6611_v2 = vld [vmem:[#allocation7 + $0x60] ss:$36 sps:$4 sm:$0xff]   ;;  %v6616_v7 = vld [vmem:[#allocation7 + $0x14] ss:$36 sps:$4 sm:$0xff]   ;;  %v6646_v23 = vld [vmem:[#allocation7 + $0x32c] ss:$36 sps:$4 sm:$0xff]  }
 0x1d3   : > { %v6640_v19 = vld [vmem:[#allocation7 + $0x374] ss:$36 sps:$4 sm:$0xff]   ;;  %v6643_v20 = vld [vmem:[#allocation7 + $0x37c] ss:$36 sps:$4 sm:$0xff]   ;;  %v6644_v25 = vld [vmem:[#allocation7 + $0x328] ss:$36 sps:$4 sm:$0xff]  }
 0x1d4   : > { %1590 = vmatprep.mubr.bf16.mxu0 %v7726_v27  ;;  %1643 = vmatprep.mubr.bf16.mxu1 %v7726_v27  ;;  %v657_v4 = vadd.f32 %v647_v8, %v638_v55  ;;  %v656_v37 = vadd.f32 %v643_v13, %v637_v31  ;;  %v6620_v8 = vld [vmem:[#allocation7 + $0x448] ss:$36 sps:$4 sm:$0xff]   ;;  %v6641_v22 = vld [vmem:[#allocation7 + $0x378] ss:$36 sps:$4 sm:$0xff]   ;;  %v6650_v55 = vld [vmem:[#allocation7 + $0x2e0] ss:$36 sps:$4 sm:$0xff]  }
 0x1d5   : > { %1591 = vmatmul.mubr.bf16.vlgmr.msra.gmra.mxu0 %v7728_v28  ;;  %1644 = vmatmul.mubr.bf16.vlgmr.msra.gmra.mxu1 %v7728_v28  ;;  %v6628_v13 = vld [vmem:[#allocation7 + $0x404] ss:$36 sps:$4 sm:$0xff]   ;;  %v6649_v24 = vld [vmem:[#allocation7 + $0x334] ss:$36 sps:$4 sm:$0xff]  }
 0x1d6   : > { %1665 = vmatpush1.bf16.msra.mxu0 %v6572_v0  ;;  %1718 = vmatpush1.bf16.msra.mxu1 %v6575_v1  ;;  %v7734_v32 = vpack.c.bf16 %v657_v4, %v655_v3  ;;  %v7738_v41 = vpack.c.bf16 %v656_v37, %v654_v38  ;;  %v6652_v0 = vld [vmem:[#allocation7 + $0x2e4] ss:$36 sps:$4 sm:$0xff]   ;;  %v6655_v1 = vld [vmem:[#allocation7 + $0x2ec] ss:$36 sps:$4 sm:$0xff]   ;;  %v6656_v3 = vld [vmem:[#allocation7 + $0x298] ss:$36 sps:$4 sm:$0xff]  }
 0x1d7   : > { %1666 = vmatprep.subr.bf16.mxu0 %v6580_v29  ;;  %1719 = vmatprep.subr.bf16.mxu1 %v6583_v30  ;;  %v6653_v29 = vld [vmem:[#allocation7 + $0x2e8] ss:$36 sps:$4 sm:$0xff]   ;;  %v6658_v30 = vld [vmem:[#allocation7 + $0x29c] ss:$36 sps:$4 sm:$0xff]   ;;  %v6664_v54 = vld [vmem:[#allocation7 + $0x254] ss:$36 sps:$4 sm:$0xff]  }
 0x1d8   : > { %1600 = vmatprep.mubr.bf16.mxu0 %v7734_v32  ;;  %1653 = vmatprep.mubr.bf16.mxu1 %v7734_v32  ;;  %v6661_v31 = vld [vmem:[#allocation7 + $0x2a4] ss:$36 sps:$4 sm:$0xff]   ;;  %v6669_v37 = vld [vmem:[#allocation7 + $0x218] ss:$36 sps:$4 sm:$0xff]   ;;  %v6670_v38 = vld [vmem:[#allocation7 + $0x410] ss:$36 sps:$4 sm:$0xff]  }
 0x1d9   : > { %v6659_v4 = vld [vmem:[#allocation7 + $0x2a0] ss:$36 sps:$4 sm:$0xff]  }
 0x1da   : > { %1667 = vmatpush1.bf16.msra.mxu0 %v6578_v33  ;;  %1720 = vmatpush1.bf16.msra.mxu1 %v6581_v34  ;;  %v6667_v33 = vld [vmem:[#allocation7 + $0x25c] ss:$36 sps:$4 sm:$0xff]   ;;  %v6662_v34 = vld [vmem:[#allocation7 + $0x250] ss:$36 sps:$4 sm:$0xff]  }
 0x1db   : > { %1668 = vmatprep.subr.bf16.mxu0 %v6586_v35  ;;  %1721 = vmatprep.subr.bf16.mxu1 %v6589_v36  ;;  %v6665_v35 = vld [vmem:[#allocation7 + $0x258] ss:$36 sps:$4 sm:$0xff]  }
 0x1dc   : > { %v6668_v36 = vld [vmem:[#allocation7 + $0x458] ss:$36 sps:$4 sm:$0xff]  }
 0x1dd   : > { %1601 = vmatmul.mubr.bf16.gmra.mxu0 %v7738_v41  ;;  %1654 = vmatmul.mubr.bf16.gmra.mxu1 %v7738_v41 }
 0x1de   : > { %1669 = vmatpush1.bf16.msra.mxu0 %v6584_v39  ;;  %1722 = vmatpush1.bf16.msra.mxu1 %v6587_v40  ;;  %v6671_v39 = vld [vmem:[#allocation7 + $0x1d0] ss:$36 sps:$4 sm:$0xff]   ;;  %v6672_v40 = vld [vmem:[#allocation7 + $0x3c8] ss:$36 sps:$4 sm:$0xff]  }
 0x1df   : > { %1696 = vmatprep.mubr.bf16.mxu0 %v7726_v27  ;;  %1749 = vmatprep.mubr.bf16.mxu1 %v7726_v27 }
 0x1e0   : > { %1670 = vmatprep.subr.bf16.mxu0 %v6592_v42  ;;  %1723 = vmatprep.subr.bf16.mxu1 %v6595_v43  ;;  %v6673_v42 = vld [vmem:[#allocation7 + $0x188] ss:$36 sps:$4 sm:$0xff]   ;;  %v6674_v43 = vld [vmem:[#allocation7 + $0x380] ss:$36 sps:$4 sm:$0xff]  }
 0x1e2   : > { %1671 = vmatpush1.bf16.msra.mxu0 %v6590_v44  ;;  %1724 = vmatpush1.bf16.msra.mxu1 %v6593_v45  ;;  %v6675_v44 = vld [vmem:[#allocation7 + $0x140] ss:$36 sps:$4 sm:$0xff]   ;;  %v6676_v45 = vld [vmem:[#allocation7 + $0x338] ss:$36 sps:$4 sm:$0xff]  }
 0x1e3   : > { %1672 = vmatprep.subr.bf16.mxu0 %v6598_v46  ;;  %1725 = vmatprep.subr.bf16.mxu1 %v6601_v47  ;;  %v6677_v46 = vld [vmem:[#allocation7 + $0xf8] ss:$36 sps:$4 sm:$0xff]   ;;  %v6678_v47 = vld [vmem:[#allocation7 + $0x2f0] ss:$36 sps:$4 sm:$0xff]  }
 0x1e6   : > { %1673 = vmatpush1.bf16.msra.mxu0 %v6596_v48  ;;  %1726 = vmatpush1.bf16.msra.mxu1 %v6599_v49  ;;  %v6679_v48 = vld [vmem:[#allocation7 + $0xb0] ss:$36 sps:$4 sm:$0xff]   ;;  %v6680_v49 = vld [vmem:[#allocation7 + $0x2a8] ss:$36 sps:$4 sm:$0xff]  }
 0x1e7   : > { %1674 = vmatprep.subr.bf16.mxu0 %v6604_v50  ;;  %1727 = vmatprep.subr.bf16.mxu1 %v6607_v51  ;;  %v6681_v50 = vld [vmem:[#allocation7 + $0x68] ss:$36 sps:$4 sm:$0xff]   ;;  %v6682_v51 = vld [vmem:[#allocation7 + $0x260] ss:$36 sps:$4 sm:$0xff]  }
 0x1ea   : > { %1675 = vmatpush1.bf16.msra.mxu0 %v6602_v56  ;;  %1728 = vmatpush1.bf16.msra.mxu1 %v6605_v57  ;;  %v6683_v56 = vld [vmem:[#allocation7 + $0x20] ss:$36 sps:$4 sm:$0xff]  }
 0x1eb   : > { %1676 = vmatprep.subr.bf16.mxu0 %v6610_v59  ;;  %1729 = vmatprep.subr.bf16.mxu1 %v6613_v62 }
 0x1ee   : > { %1677 = vmatpush1.bf16.msra.mxu0 %v6608_v63  ;;  %1730 = vmatpush1.bf16.msra.mxu1 %v6611_v2 }
 0x1ef   : > { %1678 = vmatprep.subr.bf16.mxu0 %v6616_v7  ;;  %1731 = vmatprep.subr.bf16.mxu1 %v6619_v10 }
 0x1f2   : > { %1679 = vmatpush1.bf16.msra.mxu0 %v6614_v11  ;;  %1732 = vmatpush1.bf16.msra.mxu1 %v6617_v5 }
 0x1f3   : > { %1680 = vmatprep.subr.bf16.mxu0 %v6622_v6  ;;  %1733 = vmatprep.subr.bf16.mxu1 %v6625_v12 }
 0x1f6   : > { %1681 = vmatpush2.bf16.msra.mxu0 %v6620_v8  ;;  %1734 = vmatpush2.bf16.msra.mxu1 %v6623_v9 }
 0x1f7   : > { %1682 = vmatprep.subr.bf16.mxu0 %v6628_v13  ;;  %1735 = vmatprep.subr.bf16.mxu1 %v6631_v14 }
 0x1fa   : > { %1683 = vmatpush2.bf16.msra.mxu0 %v6626_v15  ;;  %1736 = vmatpush2.bf16.msra.mxu1 %v6629_v16 }
 0x1fb   : > { %1684 = vmatprep.subr.bf16.mxu0 %v6634_v52  ;;  %1737 = vmatprep.subr.bf16.mxu1 %v6637_v17 }
 0x1fe   : > { %1685 = vmatpush2.bf16.msra.mxu0 %v6632_v53  ;;  %1738 = vmatpush2.bf16.msra.mxu1 %v6635_v18 }
 0x1ff   : > { %1686 = vmatprep.subr.bf16.mxu0 %v6640_v19  ;;  %1739 = vmatprep.subr.bf16.mxu1 %v6643_v20 }
 0x202   : > { %1687 = vmatpush2.bf16.msra.mxu0 %v6638_v21  ;;  %1740 = vmatpush2.bf16.msra.mxu1 %v6641_v22 }
 0x203   : > { %1688 = vmatprep.subr.bf16.mxu0 %v6646_v23  ;;  %1741 = vmatprep.subr.bf16.mxu1 %v6649_v24 }
 0x206   : > { %1689 = vmatpush2.bf16.msra.mxu0 %v6644_v25  ;;  %1742 = vmatpush2.bf16.msra.mxu1 %v6647_v26 }
 0x207   : > { %1690 = vmatprep.subr.bf16.mxu0 %v6652_v0  ;;  %1743 = vmatprep.subr.bf16.mxu1 %v6655_v1 }
 0x20a   : > { %1691 = vmatpush2.bf16.msra.mxu0 %v6650_v55  ;;  %1744 = vmatpush2.bf16.msra.mxu1 %v6653_v29 }
 0x20b   : > { %1692 = vmatprep.subr.bf16.mxu0 %v6658_v30  ;;  %1745 = vmatprep.subr.bf16.mxu1 %v6661_v31 }
 0x20e   : > { %1693 = vmatpush2.bf16.msra.mxu0 %v6656_v3  ;;  %1746 = vmatpush2.bf16.msra.mxu1 %v6659_v4 }
 0x20f   : > { %1694 = vmatprep.subr.bf16.mxu0 %v6664_v54  ;;  %1747 = vmatprep.subr.bf16.mxu1 %v6667_v33 }
 0x212   : > { %1695 = vmatpush2.bf16.msra.mxu0 %v6662_v34  ;;  %1748 = vmatpush2.bf16.msra.mxu1 %v6665_v35 }
 0x213   : > { %6173 = vmatprep.subr.bf16.mxu0 %v6668_v36 }
 0x215   : > { %1697 = vmatmul.mubr.bf16.vlgmr.msra.gmra.mxu0 %v7728_v28  ;;  %1750 = vmatmul.mubr.bf16.vlgmr.msra.gmra.mxu1 %v7728_v28 }
 0x216   : > { %1706 = vmatprep.mubr.bf16.mxu0 %v7734_v32  ;;  %1759 = vmatprep.mubr.bf16.mxu1 %v7734_v32 }
 0x217   : > { %6174 = vmatpush3.bf16.msra.mxu0 %v6669_v37 }
 0x218   : > { %6175 = vmatprep.subr.bf16.mxu0 %v6670_v38 }
 0x21b   : > { %6176 = vmatpush3.bf16.msra.mxu0 %v6671_v39 }
 0x21c   : > { %6177 = vmatprep.subr.bf16.mxu0 %v6672_v40 }
 0x21d   : > { %1707 = vmatmul.mubr.bf16.gmra.mxu0 %v7738_v41  ;;  %1760 = vmatmul.mubr.bf16.gmra.mxu1 %v7738_v41 }
 0x21e   : > { %1802 = vmatprep.mubr.bf16.mxu0 %v7726_v27 }
 0x21f   : > { %6178 = vmatpush3.bf16.msra.mxu0 %v6673_v42 }
 0x220   : > { %6179 = vmatprep.subr.bf16.mxu0 %v6674_v43 }
 0x223   : > { %6180 = vmatpush3.bf16.msra.mxu0 %v6675_v44 }
 0x224   : > { %6181 = vmatprep.subr.bf16.mxu0 %v6676_v45 }
 0x227   : > { %6182 = vmatpush3.bf16.msra.mxu0 %v6677_v46 }
 0x228   : > { %6183 = vmatprep.subr.bf16.mxu0 %v6678_v47 }
 0x22b   : > { %6184 = vmatpush3.bf16.msra.mxu0 %v6679_v48 }
 0x22c   : > { %6185 = vmatprep.subr.bf16.mxu0 %v6680_v49 }
 0x22f   : > { %6186 = vmatpush3.bf16.msra.mxu0 %v6681_v50 }
 0x230   : > { %6187 = vmatprep.subr.bf16.mxu0 %v6682_v51 }
 0x233   : > { %6188 = vmatpush3.bf16.msra.mxu0 %v6683_v56 }
 0x236   : > { %1803 = vmatmul.mubr.bf16.vlgmr.msra.gmra.mxu0 %v7728_v28 }
 0x237   : > { %1810 = vmatprep.mubr.bf16.mxu0 %v7734_v32 }
 0x23e   : > { %1811 = vmatmul.mubr.bf16.gmra.mxu0 %v7738_v41 }
 0x295   : > { %v1592_v27 = vpop.f32.mrf.mxu0  ;;  %v1645_v57 = vpop.f32.mrf.mxu1 }
 0x297   : > { %v1594_v59 = vpop.f32.mrf.mxu0  ;;  %v1647_v62 = vpop.f32.mrf.mxu1 }
 0x299   : > { %v1596_v63 = vpop.f32.mrf.mxu0  ;;  %v1649_v2 = vpop.f32.mrf.mxu1 }
 0x29a   : > { %v7754_v7 = vpack.c.bf16 %v1596_v63, %v1592_v27  ;;  %v7756_v10 = vpack.c.bf16 %v1649_v2, %v1645_v57  ;;  %v7809_v63 = vld [vmem:[#allocation5] sm:$0xff] }
 0x29b   : > { %v1598_v11 = vpop.f32.mrf.mxu0  ;;  %v1651_v5 = vpop.f32.mrf.mxu1 }
 0x29c   : > { %v7758_v6 = vpack.c.bf16 %v1598_v11, %v1594_v59  ;;  %v1822_v28 = vpack.c.bf16 %v1651_v5, %v1647_v62  ;;  %6253 = vmatprep.mubr.msk.bf16.mxu1 %vm1841_vm0, %v7754_v7  ;;  %v7807_v59 = vld [vmem:[#allocation5 + $0x10] sm:$0xff]  ;;  %v7812_v5 = vld [vmem:[#allocation5 + $0x18] sm:$0xff] }
 0x29d   : > { %v1602_v32 = vpop.f32.mrf.mxu0  ;;  %v1655_v41 = vpop.f32.mrf.mxu1 }
 0x29e   : > { %2015 = vrot.lane.b32.xlu1 %v1822_v28, %s7345_s17  ;;  %v1849_v18 = vsel %vm1841_vm0, %v1822_v28, 0 }
 0x29f   : > { %v1604_v12 = vpop.f32.mrf.mxu0  ;;  %v1657_v8 = vpop.f32.mrf.mxu1 }
 0x2a1   : > { %v1606_v9 = vpop.f32.mrf.mxu0  ;;  %v1659_v13 = vpop.f32.mrf.mxu1 }
 0x2a2   : > { %v7763_v14 = vpack.c.bf16 %v1659_v13, %v1655_v41  ;;  %v7775_v19 = vpack.c.bf16 %v1606_v9, %v1602_v32 }
 0x2a3   : > { %v1608_v15 = vpop.f32.mrf.mxu0  ;;  %v1661_v16 = vpop.f32.mrf.mxu1 }
 0x2a4   : > { %v7765_v52 = vpack.c.bf16 %v1608_v15, %v1604_v12  ;;  %v7767_v17 = vpack.c.bf16 %v1661_v16, %v1657_v8  ;;  %v7816_v12 = vld [vmem:[#allocation5 + $0x8] sm:$0xff] }
 0x2a6   : > { %6345 = vmatprep.subr.msk.bf16.mxu1 %vm1841_vm0, %v7767_v17  ;;  %v1852_v53 = vsel %vm1841_vm0, %v7767_v17, 0 }
 0x2a7   : > { %6250 = vmatpush3.bf16.xpose.msra.mxu1 %v1852_v53 }
 0x2a8   : > { %6346 = vmatprep.subr.msk.bf16.mxu1 %vm1841_vm0, %v1822_v28 }
 0x2af   : > { %6252 = vmatpush3.bf16.xpose.msra.mxu1 %v1849_v18 }
 0x2b6   : > { %6254 = vmatmul.mubr.msk.bf16.vlgmr.msra.gmra.mxu1 %vm1841_vm0, %v7775_v19 }
 0x2d5   : > { %v1698_v20 = vpop.f32.mrf.mxu0  ;;  %v1751_v21 = vpop.f32.mrf.mxu1 }
 0x2d7   : > { %v1700_v22 = vpop.f32.mrf.mxu0  ;;  %v1753_v23 = vpop.f32.mrf.mxu1 }
 0x2d9   : > { %v1702_v24 = vpop.f32.mrf.mxu0  ;;  %v1755_v25 = vpop.f32.mrf.mxu1 }
 0x2da   : > { %v7779_v26 = vpack.c.bf16 %v1702_v24, %v1698_v20  ;;  %v7789_v36 = vpack.c.bf16 %v1755_v25, %v1751_v21 }
 0x2db   : > { %v1704_v0 = vpop.f32.mrf.mxu0  ;;  %v1757_v1 = vpop.f32.mrf.mxu1 }
 0x2dc   : > { %v7781_v55 = vpack.c.bf16 %v1704_v0, %v1700_v22  ;;  %v7783_v29 = vpack.c.bf16 %v1757_v1, %v1753_v23 }
 0x2dd   : > { %v1708_v30 = vpop.f32.mrf.mxu0  ;;  %v1761_v31 = vpop.f32.mrf.mxu1 }
 0x2df   : > { %v1710_v3 = vpop.f32.mrf.mxu0  ;;  %v7785_v4 = vpop.f32.mrf.mxu1 }
 0x2e1   : > { %v1712_v54 = vpop.f32.mrf.mxu0  ;;  %v1765_v33 = vpop.f32.mrf.mxu1 }
 0x2e2   : > { %v7787_v34 = vpack.c.bf16 %v1765_v33, %v1761_v31  ;;  %v7796_v38 = vpack.c.bf16 %v1712_v54, %v1708_v30 }
 0x2e3   : > { %v1714_v35 = vpop.f32.mrf.mxu0  ;;  %v7805_v57 = vpop.f32.mrf.mxu1 }
 0x2e4   : > { %v7791_v37 = vpack.c.bf16 %v1714_v35, %v1710_v3  ;;  %6257 = vmatprep.subr.bf16.mxu1 %v7787_v34 }
 0x2e5   : > { %6258 = vmatpush3.bf16.msra.mxu1 %v7787_v34 }
 0x2e6   : > { %6259 = vmatprep.subr.bf16.mxu1 %v7789_v36 }
 0x2e9   : > { %6260 = vmatpush3.bf16.msra.mxu1 %v7789_v36 }
 0x2ea   : > { %6349 = vmatprep.subr.msk.bf16.mxu1 %vm1841_vm0, %v7796_v38 }
 0x2f6   : > { %v6189_v39 = vpop.f32.mrf.mxu0 }
 0x2f8   : > { %v6190_v40 = vpop.f32.mrf.mxu0 }
 0x2f9   : > { %v6191_v42 = vadd.f32 %v6190_v40, %v6189_v39 }
 0x2fa   : > { %v6192_v43 = vpop.f32.mrf.mxu0 }
 0x2fc   : > { %v6193_v44 = vpop.f32.mrf.mxu0 }
 0x2fd   : > { %v6194_v45 = vadd.f32 %v6193_v44, %v6192_v43 }
 0x2fe   : > { %v6195_v46 = vpop.f32.mrf.mxu0 }
 0x2ff   : > { %v7801_v47 = vpack.c.bf16 %v6194_v45, %v6191_v42 }
 0x300   : > { %v6196_v48 = vpop.f32.mrf.mxu0 }
 0x301   : > { %v6197_v49 = vadd.f32 %v6196_v48, %v6195_v46  ;;  %v2201_v46 = vsel %vm1841_vm0, %v7796_v38, 0  ;;  %v2198_v48 = vsel %vm1841_vm0, %v7779_v26, 0 }
 0x302   : > { %v6198_v50 = vpop.f32.mrf.mxu0 }
 0x304   : > { %v6199_v51 = vpop.f32.mrf.mxu0 }
 0x305   : > { %v6200_v56 = vadd.f32 %v6199_v51, %v6198_v50 }
 0x307   : > { %v7803_v27 = vpack.c.bf16 %v6200_v56, %v6197_v49 }
 0x310   : > { %v2016_v18 = vpop.permute.xlu1 %2015 }
 0x311   : > { %v2026_v33 = vsel %vm1841_vm0, %v2016_v18, 0 }
 0x376   : > { %v6255_v62 = vpop.f32.mrf.mxu1 }
 0x377   : > { %v1897_v2 = vadd.f32 %v6255_v62, %v7807_v59 }
 0x378   : > { %v1888_v11 = vpop.f32.mrf.mxu1 }
 0x379   : > { %v1889_v28 = vadd.f32 %v1888_v11, %v7809_v63  ;;  %v1910_v32 = vsel %vm1903_vm1, %v1897_v2, -inf }
 0x37a   : > { %1911 = vmax.xlane.f32.xlu0 %v1910_v32  ;;  %v6256_v41 = vpop.f32.mrf.mxu1 }
 0x37b   : > { %v1900_v8 = vadd.f32 %v6256_v41, %v7812_v5  ;;  %v1904_v16 = vsel %vm1903_vm1, %v1889_v28, -inf }
 0x37c   : > { %v1891_v9 = vpop.f32.mrf.mxu1 }
 0x37d   : > { %v1892_v13 = vadd.f32 %v1891_v9, %v7816_v12  ;;  %v1913_v15 = vsel %vm1903_vm1, %v1900_v8, -inf }
 0x37e   : > { %1914 = vmax.xlane.f32.xlu1 %v1913_v15  ;;  %1905 = vmax.xlane.f32.xlu0 %v1904_v16 }
 0x37f   : > { %v1907_v53 = vsel %vm1903_vm1, %v1892_v13, -inf }
 0x382   : > { %1908 = vmax.xlane.f32.xlu1 %v1907_v53 }
 0x393   : > { %2009 = vrot.lane.b32.xlu1 %v7754_v7, %s7345_s17 }
 0x394   : > { %2017 = vrot.lane.b32.xlu0 %v7767_v17, %s7345_s17 }
 0x397   : > { %2011 = vrot.lane.b32.xlu1 %v7775_v19, %s7345_s17 }
 0x403   : > { %v1912_v20 = vpop.xlane.xlu0 %1911 }
 0x404   : > { %v1918_v25 = vsub.f32 %v1897_v2, %v1912_v20 }
 0x406   : > { %v1924_v17 = vmul.f32 1.442695, %v1918_v25 }
 0x407   : > { %v1915_v21 = vpop.xlane.xlu1 %1914  ;;  %v1906_v22 = vpop.xlane.xlu0 %1905 }
 0x408   : > { %v1919_v23 = vsub.f32 %v1900_v8, %v1915_v21  ;;  %v1916_v24 = vsub.f32 %v1889_v28, %v1906_v22 }
 0x40a   : > { %v1926_v0 = vmul.f32 1.442695, %v1919_v23  ;;  %v1920_v1 = vmul.f32 1.442695, %v1916_v24 }
 0x40b   : > { %v1909_v30 = vpop.xlane.xlu1 %1908  ;;  %v2018_v31 = vpop.permute.xlu0 %2017 }
 0x40c   : > { %v1917_v3 = vsub.f32 %v1892_v13, %v1909_v30  ;;  %v2029_v7 = vsel %vm1841_vm0, %v2018_v31, 0  ;;  %6347 = vmatprep.subr.msk.bf16.mxu0 %vm1841_vm0, %v2018_v31  ;;  %6956 = vpow2.f32 %v1926_v0 }
 0x40d   : > { %6266 = vmatpush3.bf16.xpose.msra.mxu0 %v2029_v7  ;;  %6958 = vpow2.f32 %v1920_v1 }
 0x40e   : > { %v1922_v19 = vmul.f32 1.442695, %v1917_v3  ;;  %6348 = vmatprep.subr.msk.bf16.mxu0 %vm1841_vm0, %v2016_v18 }
 0x40f   : > { %v2010_v54 = vpop.permute.xlu1 %2009 }
 0x410   : > { %6960 = vpow2.f32 %v1922_v19  ;;  %6269 = vmatprep.mubr.msk.bf16.mxu0 %vm1841_vm0, %v2010_v54 }
 0x411   : > { %6962 = vpow2.f32 %v1924_v17 }
 0x413   : > { %v2012_v39 = vpop.permute.xlu1 %2011 }
 0x415   : > { %6268 = vmatpush3.bf16.xpose.msra.mxu0 %v2026_v33 }
 0x419   : > { %v7834_v35 = vpop.eup %6956 }
 0x41a   : > { %v7836_v40 = vpop.eup %6958 }
 0x41c   : > { %6270 = vmatmul.mubr.msk.bf16.vlgmr.msra.gmra.mxu0 %vm1841_vm0, %v2012_v39 }
 0x41d   : > { %v7839_v42 = vpop.eup %6960 }
 0x41e   : > { %v7841_v43 = vpop.eup %6962  ;;  %v1940_v44 = vpack.c.bf16 %v7839_v42, %v7836_v40 }
 0x41f   : > { %v1941_v45 = vpack.c.bf16 %v7834_v35, %v7841_v43 }
 0x420   : > { %6261 = vmatprep.mubr.msk.bf16.mxu1 %vm1903_vm1, %v1940_v44 }
 0x421   : > { %6262 = vmatmul.mubr.msk.bf16.vlgmr.msra.gmra.mxu1 %vm1903_vm1, %v1941_v45 }
 0x422   : > { %6282 = vmatpush3.bf16.xpose.msra.mxu1 %v2201_v46  ;;  %6285 = vmatprep.mubr.msk.bf16.mxu1 %vm1841_vm0, %v7758_v6 }
 0x423   : > { %6350 = vmatprep.subr.msk.bf16.mxu1 %vm1841_vm0, %v7779_v26 }
 0x42a   : > { %6284 = vmatpush3.bf16.xpose.msra.mxu1 %v2198_v48 }
 0x431   : > { %6286 = vmatmul.mubr.msk.bf16.vlgmr.msra.gmra.mxu1 %vm1841_vm0, %v7765_v52 }
 0x4dc   : > { %v6271_v49 = vpop.f32.mrf.mxu0 }
 0x4dd   : > { %v2074_v50 = vadd.f32 %v6271_v49, %v7807_v59 }
 0x4de   : > { %v2065_v51 = vpop.f32.mrf.mxu0 }
 0x4df   : > { %v2066_v56 = vadd.f32 %v2065_v51, %v7809_v63  ;;  %v2086_v62 = vsel %vm1903_vm1, %v2074_v50, -inf }
 0x4e0   : > { %2087 = vmax.xlane.f32.xlu0 %v2086_v62  ;;  %v6272_v2 = vpop.f32.mrf.mxu0  ;;  %v7909_v62 = vpack.c.bf16 %v7805_v57, %v7785_v4 }
 0x4e1   : > { %v2077_v28 = vadd.f32 %v6272_v2, %v7812_v5  ;;  %v7863_v32 = vpop.f32.mrf.mxu1  ;;  %v2080_v8 = vsel %vm1903_vm1, %v2066_v56, -inf }
 0x4e2   : > { %v2068_v11 = vpop.f32.mrf.mxu0 }
 0x4e3   : > { %v2069_v41 = vadd.f32 %v2068_v11, %v7816_v12  ;;  %v7868_v13 = vpop.f32.mrf.mxu1  ;;  %v2089_v15 = vsel %vm1903_vm1, %v2077_v28, -inf }
 0x4e4   : > { %2081 = vmax.xlane.f32.xlu0 %v2080_v8 }
 0x4e5   : > { %v2083_v9 = vsel %vm1903_vm1, %v2069_v41, -inf  ;;  %v7871_v16 = vpop.f32.mrf.mxu1 }
 0x4e6   : > { %2084 = vmax.xlane.f32.xlu1 %v2083_v9 }
 0x4e7   : > { %v7873_v53 = vpop.f32.mrf.mxu1 }
 0x4e8   : > { %2090 = vmax.xlane.f32.xlu0 %v2089_v15 }
 0x4f1   : > { %v6287_v18 = vpop.f32.mrf.mxu1 }
 0x4f2   : > { %v7876_v20 = vadd.f32 %v6287_v18, %v7807_v59 }
 0x4f3   : > { %v2237_v21 = vpop.f32.mrf.mxu1 }
 0x4f4   : > { %v2238_v22 = vadd.f32 %v2237_v21, %v7809_v63  ;;  %v2258_v23 = vsel %vm1903_vm1, %v7876_v20, -inf }
 0x4f5   : > { %2259 = vmax.xlane.f32.xlu0 %v2258_v23  ;;  %v6288_v25 = vpop.f32.mrf.mxu1 }
 0x4f6   : > { %v2252_v24 = vsel %vm1903_vm1, %v2238_v22, -inf  ;;  %v2249_v0 = vadd.f32 %v6288_v25, %v7812_v5 }
 0x4f7   : > { %2120 = vrot.lane.b32.xlu1 %v7789_v36, %s7345_s17  ;;  %v2240_v1 = vpop.f32.mrf.mxu1 }
 0x4f8   : > { %v2241_v30 = vadd.f32 %v2240_v1, %v7816_v12  ;;  %v2261_v31 = vsel %vm1903_vm1, %v2249_v0, -inf }
 0x4f9   : > { %2253 = vmax.xlane.f32.xlu0 %v2252_v24 }
 0x4fa   : > { %v2255_v36 = vsel %vm1903_vm1, %v2241_v30, -inf }
 0x50f   : > { %2122 = vrot.lane.b32.xlu0 %v7787_v34, %s7345_s17 }
 0x513   : > { %2357 = vrot.lane.b32.xlu0 %v7758_v6, %s7345_s17 }
 0x51b   : > { %2262 = vmax.xlane.f32.xlu1 %v2261_v31 }
 0x51f   : > { %2256 = vmax.xlane.f32.xlu1 %v2255_v36 }
 0x530   : > { %2365 = vrot.lane.b32.xlu1 %v7796_v38, %s7345_s17 }
 0x534   : > { %2363 = vrot.lane.b32.xlu1 %v7779_v26, %s7345_s17 }
 0x538   : > { %2359 = vrot.lane.b32.xlu1 %v7765_v52, %s7345_s17 }
 0x569   : > { %v2088_v6 = vpop.xlane.xlu0 %2087 }
 0x56a   : > { %v2094_v44 = vsub.f32 %v2074_v50, %v2088_v6 }
 0x56c   : > { %v2100_v38 = vmul.f32 1.442695, %v2094_v44 }
 0x56d   : > { %v2082_v34 = vpop.xlane.xlu0 %2081 }
 0x56e   : > { %v2092_v3 = vsub.f32 %v2066_v56, %v2082_v34 }
 0x56f   : > { %v2085_v7 = vpop.xlane.xlu1 %2084 }
 0x570   : > { %v2096_v17 = vmul.f32 1.442695, %v2092_v3  ;;  %v2093_v19 = vsub.f32 %v2069_v41, %v2085_v7 }
 0x571   : > { %v2091_v33 = vpop.xlane.xlu0 %2090 }
 0x572   : > { %v2098_v54 = vmul.f32 1.442695, %v2093_v19  ;;  %6964 = vpow2.f32 %v2096_v17  ;;  %v2095_v39 = vsub.f32 %v2077_v28, %v2091_v33 }
 0x573   : > { %v2121_v56 = vpop.permute.xlu1 %2120 }
 0x574   : > { %6966 = vpow2.f32 %v2098_v54  ;;  %v2102_v45 = vmul.f32 1.442695, %v2095_v39 }
 0x576   : > { %6968 = vpow2.f32 %v2102_v45 }
 0x577   : > { %6970 = vpow2.f32 %v2100_v38 }
 0x57e   : > { %v2260_v46 = vpop.xlane.xlu0 %2259 }
 0x57f   : > { %v7898_v26 = vpop.eup %6964  ;;  %v2266_v57 = vsub.f32 %v7876_v20, %v2260_v46 }
 0x581   : > { %v7900_v52 = vpop.eup %6966  ;;  %v2272_v21 = vmul.f32 1.442695, %v2266_v57 }
 0x582   : > { %v2254_v48 = vpop.xlane.xlu0 %2253  ;;  %v2116_v49 = vpack.c.bf16 %v7900_v52, %v7898_v26 }
 0x583   : > { %v7905_v50 = vpop.eup %6968  ;;  %v2264_v28 = vsub.f32 %v2238_v22, %v2254_v48 }
 0x584   : > { %6277 = vmatprep.mubr.msk.bf16.mxu0 %vm1903_vm1, %v2116_v49  ;;  %v7911_v2 = vpop.eup %6970 }
 0x585   : > { %v2117_v11 = vpack.c.bf16 %v7905_v50, %v7911_v2  ;;  %v2268_v8 = vmul.f32 1.442695, %v2264_v28 }
 0x586   : > { %v2123_v51 = vpop.permute.xlu0 %2122 }
 0x587   : > { %6273 = vmatprep.subr.bf16.mxu0 %v2123_v51  ;;  %6972 = vpow2.f32 %v2268_v8 }
 0x588   : > { %6274 = vmatpush3.bf16.msra.mxu0 %v2123_v51 }
 0x589   : > { %6275 = vmatprep.subr.bf16.mxu0 %v2121_v56 }
 0x58a   : > { %v2358_v31 = vpop.permute.xlu0 %2357 }
 0x58c   : > { %6276 = vmatpush3.bf16.msra.mxu0 %v2121_v56 }
 0x58d   : > { %6289 = vmatprep.subr.bf16.mxu0 %v7909_v62 }
 0x58f   : > { %6278 = vmatmul.mubr.msk.bf16.vlgmr.msra.gmra.mxu0 %vm1903_vm1, %v2117_v11 }
 0x590   : > { %6290 = vmatpush3.bf16.msra.mxu0 %v7909_v62 }
 0x591   : > { %6291 = vmatprep.subr.bf16.mxu0 %v7783_v29 }
 0x594   : > { %6292 = vmatpush3.bf16.msra.mxu0 %v7783_v29  ;;  %v7922_v25 = vpop.eup %6972 }
 0x5a4   : > { %v2263_v41 = vpop.xlane.xlu1 %2262 }
 0x5a5   : > { %v2267_v4 = vsub.f32 %v2249_v0, %v2263_v41 }
 0x5a7   : > { %v2274_v9 = vmul.f32 1.442695, %v2267_v4 }
 0x5a8   : > { %v2257_v15 = vpop.xlane.xlu1 %2256 }
 0x5a9   : > { %v2265_v18 = vsub.f32 %v2241_v30, %v2257_v15  ;;  %6974 = vpow2.f32 %v2274_v9 }
 0x5ab   : > { %v2270_v23 = vmul.f32 1.442695, %v2265_v18 }
 0x5ac   : > { %v2366_v24 = vpop.permute.xlu1 %2365 }
 0x5ad   : > { %6976 = vpow2.f32 %v2270_v23  ;;  %6351 = vmatprep.subr.msk.bf16.mxu0 %vm1841_vm0, %v2366_v24  ;;  %v2377_v36 = vsel %vm1841_vm0, %v2366_v24, 0 }
 0x5ae   : > { %6978 = vpow2.f32 %v2272_v21 }
 0x5b0   : > { %v2364_v6 = vpop.permute.xlu1 %2363 }
 0x5b1   : > { %v2374_v34 = vsel %vm1841_vm0, %v2364_v6, 0 }
 0x5b4   : > { %v2360_v3 = vpop.permute.xlu1 %2359 }
 0x5b6   : > { %v7924_v22 = vpop.eup %6974 }
 0x5ba   : > { %v7926_v0 = vpop.eup %6976 }
 0x5bb   : > { %v7928_v20 = vpop.eup %6978  ;;  %v2288_v1 = vpack.c.bf16 %v7926_v0, %v7922_v25 }
 0x5bc   : > { %v2289_v30 = vpack.c.bf16 %v7924_v22, %v7928_v20 }
 0x5bd   : > { %6293 = vmatprep.mubr.msk.bf16.mxu0 %vm1903_vm1, %v2288_v1 }
 0x5be   : > { %6294 = vmatmul.mubr.msk.bf16.vlgmr.msra.gmra.mxu0 %vm1903_vm1, %v2289_v30 }
 0x5bf   : > { %6298 = vmatpush3.bf16.xpose.msra.mxu0 %v2377_v36  ;;  %6301 = vmatprep.mubr.msk.bf16.mxu0 %vm1841_vm0, %v2358_v31 }
 0x5c0   : > { %6352 = vmatprep.subr.msk.bf16.mxu0 %vm1841_vm0, %v2364_v6 }
 0x5c7   : > { %6300 = vmatpush3.bf16.xpose.msra.mxu0 %v2374_v34 }
 0x5c8   : > { %6321 = vmatprep.subr.bf16.mxu0 %v7803_v27 }
 0x5ce   : > { %6302 = vmatmul.mubr.msk.bf16.vlgmr.msra.gmra.mxu0 %vm1841_vm0, %v2360_v3 }
 0x5cf   : > { %6322 = vmatpush3.bf16.msra.mxu0 %v7803_v27 }
 0x5d0   : > { %6323 = vmatprep.subr.bf16.mxu0 %v7801_v47 }
 0x5d3   : > { %6324 = vmatpush3.bf16.msra.mxu0 %v7801_v47 }
 0x64f   : > { %v7945_v7 = vpop.f32.mrf.mxu0 }
 0x651   : > { %v7947_v17 = vpop.f32.mrf.mxu0 }
 0x653   : > { %v7949_v19 = vpop.f32.mrf.mxu0 }
 0x655   : > { %v7951_v54 = vpop.f32.mrf.mxu0 }
 0x67e   : > { %v7953_v33 = vpop.f32.mrf.mxu0 }
 0x680   : > { %v7955_v39 = vpop.f32.mrf.mxu0 }
 0x682   : > { %v7957_v44 = vpop.f32.mrf.mxu0 }
 0x684   : > { %v7959_v45 = vpop.f32.mrf.mxu0 }
 0x68e   : > { %v6303_v38 = vpop.f32.mrf.mxu0 }
 0x68f   : > { %v2422_v46 = vadd.f32 %v6303_v38, %v7807_v59 }
 0x690   : > { %v2413_v48 = vpop.f32.mrf.mxu0 }
 0x691   : > { %v2414_v49 = vadd.f32 %v2413_v48, %v7809_v63  ;;  %v2434_v51 = vsel %vm1903_vm1, %v2422_v46, -inf }
 0x692   : > { %2435 = vmax.xlane.f32.xlu0 %v2434_v51  ;;  %v6304_v56 = vpop.f32.mrf.mxu0 }
 0x693   : > { %v2425_v28 = vadd.f32 %v6304_v56, %v7812_v5  ;;  %v2428_v4 = vsel %vm1903_vm1, %v2414_v49, -inf  ;;  %v2549_v56 = vsel %vm1841_vm0, %v7791_v37, 0 }
 0x694   : > { %v2416_v11 = vpop.f32.mrf.mxu0 }
 0x695   : > { %v2417_v41 = vadd.f32 %v2416_v11, %v7816_v12  ;;  %v2437_v8 = vsel %vm1903_vm1, %v2425_v28, -inf  ;;  %v2546_v11 = vsel %vm1841_vm0, %v7781_v55, 0 }
 0x696   : > { %2429 = vmax.xlane.f32.xlu0 %v2428_v4 }
 0x697   : > { %v2431_v57 = vsel %vm1903_vm1, %v2417_v41, -inf }
 0x698   : > { %2432 = vmax.xlane.f32.xlu1 %v2431_v57 }
 0x69a   : > { %2438 = vmax.xlane.f32.xlu0 %v2437_v8 }
 0x6a9   : > { %2468 = vrot.lane.b32.xlu1 %v7783_v29, %s7345_s17 }
 0x6b0   : > { %2470 = vrot.lane.b32.xlu0 %v7909_v62, %s7345_s17 }
 0x71b   : > { %v2436_v9 = vpop.xlane.xlu0 %2435 }
 0x71c   : > { %v2442_v15 = vsub.f32 %v2422_v46, %v2436_v9 }
 0x71e   : > { %v2448_v30 = vmul.f32 1.442695, %v2442_v15 }
 0x71f   : > { %v2430_v18 = vpop.xlane.xlu0 %2429 }
 0x720   : > { %v2440_v21 = vsub.f32 %v2414_v49, %v2430_v18 }
 0x721   : > { %v2433_v23 = vpop.xlane.xlu1 %2432 }
 0x722   : > { %v2444_v24 = vmul.f32 1.442695, %v2440_v21  ;;  %v2441_v1 = vsub.f32 %v2417_v41, %v2433_v23 }
 0x723   : > { %v2439_v31 = vpop.xlane.xlu0 %2438 }
 0x724   : > { %v2446_v36 = vmul.f32 1.442695, %v2441_v1  ;;  %v2443_v6 = vsub.f32 %v2425_v28, %v2439_v31  ;;  %6980 = vpow2.f32 %v2444_v24 }
 0x725   : > { %v2469_v29 = vpop.permute.xlu1 %2468 }
 0x726   : > { %6982 = vpow2.f32 %v2446_v36  ;;  %v2450_v34 = vmul.f32 1.442695, %v2443_v6 }
 0x727   : > { %6984 = vpow2.f32 %v2448_v30  ;;  %v2471_v3 = vpop.permute.xlu0 %2470 }
 0x728   : > { %6986 = vpow2.f32 %v2450_v34  ;;  %6305 = vmatprep.subr.bf16.mxu1 %v2471_v3 }
 0x729   : > { %6306 = vmatpush3.bf16.msra.mxu1 %v2471_v3 }
 0x72a   : > { %6307 = vmatprep.subr.bf16.mxu1 %v2469_v29 }
 0x72d   : > { %6308 = vmatpush3.bf16.msra.mxu1 %v2469_v29 }
 0x72e   : > { %6353 = vmatprep.subr.msk.bf16.mxu1 %vm1841_vm0, %v7791_v37 }
 0x731   : > { %v7975_v62 = vpop.eup %6980 }
 0x733   : > { %v7977_v38 = vpop.eup %6982 }
 0x734   : > { %v7979_v46 = vpop.eup %6984  ;;  %v2464_v48 = vpack.c.bf16 %v7977_v38, %v7975_v62 }
 0x735   : > { %v7983_v49 = vpop.eup %6986 }
 0x736   : > { %6309 = vmatprep.mubr.msk.bf16.mxu1 %vm1903_vm1, %v2464_v48  ;;  %v2465_v51 = vpack.c.bf16 %v7983_v49, %v7979_v46 }
 0x738   : > { %6310 = vmatmul.mubr.msk.bf16.vlgmr.msra.gmra.mxu1 %vm1903_vm1, %v2465_v51 }
 0x739   : > { %6314 = vmatpush3.bf16.xpose.msra.mxu1 %v2549_v56  ;;  %6317 = vmatprep.mubr.msk.bf16.mxu1 %vm1841_vm0, %v7756_v10 }
 0x73a   : > { %6354 = vmatprep.subr.msk.bf16.mxu1 %vm1841_vm0, %v7781_v55 }
 0x741   : > { %6316 = vmatpush3.bf16.xpose.msra.mxu1 %v2546_v11 }
 0x748   : > { %6318 = vmatmul.mubr.msk.bf16.vlgmr.msra.gmra.mxu1 %vm1841_vm0, %v7763_v14 }
 0x7f8   : > { %v7999_v28 = vpop.f32.mrf.mxu1 }
 0x7fa   : > { %v8001_v41 = vpop.f32.mrf.mxu1 }
 0x7fc   : > { %v8003_v4 = vpop.f32.mrf.mxu1 }
 0x7fe   : > { %v8005_v57 = vpop.f32.mrf.mxu1 }
 0x808   : > { %v6319_v8 = vpop.f32.mrf.mxu1 }
 0x809   : > { %v2594_v30 = vadd.f32 %v6319_v8, %v7807_v59 }
 0x80a   : > { %v2585_v9 = vpop.f32.mrf.mxu1 }
 0x80b   : > { %v2586_v15 = vadd.f32 %v2585_v9, %v7809_v63  ;;  %v2606_v6 = vsel %vm1903_vm1, %v2594_v30, -inf }
 0x80c   : > { %v6320_v18 = vpop.f32.mrf.mxu1 }
 0x80d   : > { %v2597_v21 = vadd.f32 %v6320_v18, %v7812_v5  ;;  %v2600_v23 = vsel %vm1903_vm1, %v2586_v15, -inf }
 0x80e   : > { %v2588_v24 = vpop.f32.mrf.mxu1  ;;  %2601 = vmax.xlane.f32.xlu1 %v2600_v23 }
 0x80f   : > { %v2589_v1 = vadd.f32 %v2588_v24, %v7816_v12  ;;  %v2609_v36 = vsel %vm1903_vm1, %v2597_v21, -inf }
 0x811   : > { %v2603_v31 = vsel %vm1903_vm1, %v2589_v1, -inf }
 0x812   : > { %2604 = vmax.xlane.f32.xlu0 %v2603_v31  ;;  %2610 = vmax.xlane.f32.xlu1 %v2609_v36 }
 0x816   : > { %2607 = vmax.xlane.f32.xlu0 %v2606_v6 }
 0x823   : > { %2711 = vrot.lane.b32.xlu1 %v7781_v55, %s7345_s17 }
 0x827   : > { %2705 = vrot.lane.b32.xlu1 %v7756_v10, %s7345_s17 }
 0x82b   : > { %2707 = vrot.lane.b32.xlu1 %v7763_v14, %s7345_s17 }
 0x82c   : > { %2713 = vrot.lane.b32.xlu0 %v7791_v37, %s7345_s17 }
 0x897   : > { %v2602_v34 = vpop.xlane.xlu1 %2601 }
 0x898   : > { %v2612_v3 = vsub.f32 %v2586_v15, %v2602_v34 }
 0x89a   : > { %v2616_v29 = vmul.f32 1.442695, %v2612_v3 }
 0x89b   : > { %v2605_v48 = vpop.xlane.xlu0 %2604  ;;  %v2611_v51 = vpop.xlane.xlu1 %2610 }
 0x89c   : > { %v2613_v56 = vsub.f32 %v2589_v1, %v2605_v48  ;;  %v2615_v11 = vsub.f32 %v2597_v21, %v2611_v51  ;;  %6988 = vpow2.f32 %v2616_v29 }
 0x89e   : > { %v2618_v8 = vmul.f32 1.442695, %v2613_v56  ;;  %v2622_v9 = vmul.f32 1.442695, %v2615_v11 }
 0x89f   : > { %v2608_v55 = vpop.xlane.xlu0 %2607  ;;  %v2712_v15 = vpop.permute.xlu1 %2711 }
 0x8a0   : > { %6990 = vpow2.f32 %v2618_v8  ;;  %v2614_v18 = vsub.f32 %v2594_v30, %v2608_v55  ;;  %v2722_v6 = vsel %vm1841_vm0, %v2712_v15, 0 }
 0x8a1   : > { %6992 = vpow2.f32 %v2622_v9 }
 0x8a2   : > { %v2620_v10 = vmul.f32 1.442695, %v2614_v18 }
 0x8a3   : > { %v2714_v23 = vpop.permute.xlu0 %2713  ;;  %v2706_v36 = vpop.permute.xlu1 %2705 }
 0x8a4   : > { %6994 = vpow2.f32 %v2620_v10  ;;  %6355 = vmatprep.subr.msk.bf16.mxu0 %vm1841_vm0, %v2714_v23  ;;  %v2725_v31 = vsel %vm1841_vm0, %v2714_v23, 0 }
 0x8a7   : > { %v2708_v34 = vpop.permute.xlu1 %2707 }
 0x8a9   : > { %v8024_v14 = vpop.eup %6988 }
 0x8ad   : > { %v6991_v37 = vpop.eup %6990 }
 0x8ae   : > { %v2636_v24 = vpack.c.bf16 %v6991_v37, %v8024_v14  ;;  %v8027_v1 = vpop.eup %6992 }
 0x8b0   : > { %6325 = vmatprep.mubr.msk.bf16.mxu0 %vm1903_vm1, %v2636_v24 }
 0x8b1   : > { %v8030_v21 = vpop.eup %6994 }
 0x8b2   : > { %v2637_v30 = vpack.c.bf16 %v8027_v1, %v8030_v21 }
 0x8b4   : > { %6326 = vmatmul.mubr.msk.bf16.vlgmr.msra.gmra.mxu0 %vm1903_vm1, %v2637_v30 }
 0x8b5   : > { %6330 = vmatpush3.bf16.xpose.msra.mxu0 %v2725_v31  ;;  %6333 = vmatprep.mubr.msk.bf16.mxu0 %vm1841_vm0, %v2706_v36  ;;  %v2104_v31 = vsel %vm1903_vm1, %v7898_v26, 0.0 }
 0x8b6   : > { %6356 = vmatprep.subr.msk.bf16.mxu0 %vm1841_vm0, %v2712_v15 }
 0x8bd   : > { %6332 = vmatpush3.bf16.xpose.msra.mxu0 %v2722_v6 }
 0x8c4   : > { %6334 = vmatmul.mubr.msk.bf16.vlgmr.msra.gmra.mxu0 %vm1841_vm0, %v2708_v34 }
 0x974   : > { %v8040_v3 = vpop.f32.mrf.mxu0 }
 0x976   : > { %v8042_v29 = vpop.f32.mrf.mxu0 }
 0x978   : > { %v8044_v48 = vpop.f32.mrf.mxu0 }
 0x97a   : > { %v8046_v51 = vpop.f32.mrf.mxu0 }
 0x984   : > { %v6335_v56 = vpop.f32.mrf.mxu0 }
 0x985   : > { %v2770_v11 = vadd.f32 %v6335_v56, %v7807_v59 }
 0x986   : > { %v2761_v8 = vpop.f32.mrf.mxu0 }
 0x987   : > { %v2762_v9 = vadd.f32 %v2761_v8, %v7809_v63  ;;  %v2782_v55 = vsel %vm1903_vm1, %v2770_v11, -inf  ;;  %v2452_v63 = vsel %vm1903_vm1, %v7975_v62, 0.0  ;;  %v2279_v62 = vsel %vm1903_vm1, %v7926_v0, 0.0 }
 0x988   : > { %2783 = vmax.xlane.f32.xlu0 %v2782_v55  ;;  %v6336_v18 = vpop.f32.mrf.mxu0 }
 0x989   : > { %v2773_v23 = vadd.f32 %v6336_v18, %v7812_v5  ;;  %v2776_v24 = vsel %vm1903_vm1, %v2762_v9, -inf  ;;  %v2455_v5 = vsel %vm1903_vm1, %v7977_v38, 0.0  ;;  %v2627_v38 = vsel %vm1903_vm1, %v6991_v37, 0.0 }
 0x98a   : > { %v2764_v10 = vpop.f32.mrf.mxu0 }
 0x98b   : > { %v2765_v15 = vadd.f32 %v2764_v10, %v7816_v12  ;;  %v2785_v59 = vsel %vm1903_vm1, %v2773_v23, -inf  ;;  %v2107_v12 = vsel %vm1903_vm1, %v7900_v52, 0.0  ;;  %v1931_v52 = vsel %vm1903_vm1, %v7839_v42, 0.0 }
 0x98c   : > { %2777 = vmax.xlane.f32.xlu0 %v2776_v24 }
 0x98d   : > { %v2779_v30 = vsel %vm1903_vm1, %v2765_v15, -inf }
 0x98e   : > { %2780 = vmax.xlane.f32.xlu1 %v2779_v30 }
 0x990   : > { %2786 = vmax.xlane.f32.xlu0 %v2785_v59 }
 0x99f   : > { %2816 = vrot.lane.b32.xlu1 %v7801_v47, %s7345_s17  ;;  %v2461_v47 = vsel %vm1903_vm1, %v7983_v49, 0.0 }
 0x9a6   : > { %2818 = vrot.lane.b32.xlu0 %v7803_v27, %s7345_s17  ;;  %v2113_v27 = vsel %vm1903_vm1, %v7905_v50, 0.0 }
 0x9c3   : > { %2453 = vadd.xlane.f32.xlu1 %v2452_v63  ;;  %v6684_v63 = vld [vmem:[#allocation8 + $0x70] ss:$8 sps:$4 sm:$0xff]  }
 0x9c5   : > { %2456 = vadd.xlane.f32.xlu0 %v2455_v5  ;;  %v2458_v5 = vsel %vm1903_vm1, %v7979_v46, 0.0  ;;  %v6690_v46 = vld [vmem:[#allocation8 + $0x50] ss:$8 sps:$4 sm:$0xff]  }
 0x9c7   : > { %2108 = vadd.xlane.f32.xlu1 %v2107_v12 }
 0x9c9   : > { %2105 = vadd.xlane.f32.xlu0 %v2104_v31 }
 0x9cb   : > { %2462 = vadd.xlane.f32.xlu1 %v2461_v47  ;;  %v6689_v47 = vld [vmem:[#allocation8 + $0x64] ss:$8 sps:$4 sm:$0xff]  }
 0x9cf   : > { %2114 = vadd.xlane.f32.xlu1 %v2113_v27  ;;  %v6687_v27 = vld [vmem:[#allocation8 + $0x60] ss:$8 sps:$4 sm:$0xff]  }
 0x9d3   : > { %2280 = vadd.xlane.f32.xlu1 %v2279_v62  ;;  %v2110_v62 = vsel %vm1903_vm1, %v7911_v2, 0.0  ;;  %v6698_v2 = vld [vmem:[#allocation8 + $0x34] ss:$8 sps:$4 sm:$0xff]  }
 0x9d7   : > { %1932 = vadd.xlane.f32.xlu1 %v1931_v52 }
 0x9db   : > { %2628 = vadd.xlane.f32.xlu1 %v2627_v38  ;;  %v6692_v38 = vld [vmem:[#allocation8 + $0x54] ss:$8 sps:$4 sm:$0xff]  }
 0xa11   : > { %v2784_v26 = vpop.xlane.xlu0 %2783 }
 0xa12   : > { %v2790_v36 = vsub.f32 %v2770_v11, %v2784_v26  ;;  %v6686_v11 = vld [vmem:[#allocation8 + $0x74] ss:$8 sps:$4 sm:$0xff]   ;;  %v2276_v26 = vsel %vm1903_vm1, %v7922_v25, 0.0  ;;  %v6699_v25 = vld [vmem:[#allocation8 + $0x20] ss:$8 sps:$4 sm:$0xff]  }
 0xa14   : > { %v2796_v50 = vmul.f32 1.442695, %v2790_v36  ;;  %v6695_v36 = vld [vmem:[#allocation8 + $0x44] ss:$8 sps:$4 sm:$0xff]  }
 0xa15   : > { %v2778_v6 = vpop.xlane.xlu0 %2777 }
 0xa16   : > { %v2788_v49 = vsub.f32 %v2762_v9, %v2778_v6  ;;  %v6693_v6 = vld [vmem:[#allocation8 + $0x40] ss:$8 sps:$4 sm:$0xff]  }
 0xa17   : > { %v2781_v34 = vpop.xlane.xlu1 %2780 }
 0xa18   : > { %v2792_v56 = vmul.f32 1.442695, %v2788_v49  ;;  %v2789_v8 = vsub.f32 %v2765_v15, %v2781_v34  ;;  %v6696_v34 = vld [vmem:[#allocation8 + $0x30] ss:$8 sps:$4 sm:$0xff]  }
 0xa19   : > { %v2787_v55 = vpop.xlane.xlu0 %2786 }
 0xa1a   : > { %6996 = vpow2.f32 %v2792_v56  ;;  %v2794_v18 = vmul.f32 1.442695, %v2789_v8  ;;  %v2791_v0 = vsub.f32 %v2773_v23, %v2787_v55  ;;  %v1928_v56 = vsel %vm1903_vm1, %v7836_v40, 0.0  ;;  %v6701_v8 = vld [vmem:[#allocation8 + $0x24] ss:$8 sps:$4 sm:$0xff]  }
 0xa1b   : > { %v2817_v37 = vpop.permute.xlu1 %2816  ;;  %v6704_v55 = vld [vmem:[#allocation8 + $0x14] ss:$8 sps:$4 sm:$0xff]   ;;  %v6708_v40 = vld [vmem:[#allocation8 + $0xf0] ss:$8 sps:$4 sm:$0xff]  }
 0xa1c   : > { %6998 = vpow2.f32 %v2794_v18  ;;  %v2798_v10 = vmul.f32 1.442695, %v2791_v0  ;;  %v6702_v18 = vld [vmem:[#allocation8 + $0x10] ss:$8 sps:$4 sm:$0xff]   ;;  %v6707_v0 = vld [vmem:[#allocation8 + $0x4] ss:$8 sps:$4 sm:$0xff]  }
 0xa1d   : > { %7000 = vpow2.f32 %v2796_v50  ;;  %v2819_v42 = vpop.permute.xlu0 %2818  ;;  %v2624_v50 = vsel %vm1903_vm1, %v8024_v14, 0.0  ;;  %v6711_v14 = vld [vmem:[#allocation8 + $0xe0] ss:$8 sps:$4 sm:$0xff]  }
 0xa1e   : > { %7002 = vpow2.f32 %v2798_v10  ;;  %6337 = vmatprep.subr.bf16.mxu1 %v2819_v42  ;;  %v6705_v10 = vld [vmem:[#allocation8] ss:$8 sps:$4 sm:$0xff]  }
 0xa1f   : > { %6338 = vmatpush3.bf16.msra.mxu1 %v2819_v42  ;;  %v6710_v42 = vld [vmem:[#allocation8 + $0xf4] ss:$8 sps:$4 sm:$0xff]  }
 0xa20   : > { %6339 = vmatprep.subr.bf16.mxu1 %v2817_v37 }
 0xa23   : > { %6340 = vmatpush3.bf16.msra.mxu1 %v2817_v37 }
 0xa24   : > { %3229 = vmatprep.subr.bf16.mxu1 %v6686_v11  ;;  %v6713_v11 = vld [vmem:[#allocation8 + $0xe4] ss:$8 sps:$4 sm:$0xff]  }
 0xa27   : > { %v6997_v9 = vpop.eup %6996 }
 0xa28   : > { %v2800_v15 = vsel %vm1903_vm1, %v6997_v9, 0.0 }
 0xa29   : > { %v6999_v24 = vpop.eup %6998  ;;  %2801 = vadd.xlane.f32.xlu0 %v2800_v15 }
 0xa2a   : > { %v7001_v30 = vpop.eup %7000  ;;  %v2812_v59 = vpack.c.bf16 %v6999_v24, %v6997_v9  ;;  %v2803_v52 = vsel %vm1903_vm1, %v6999_v24, 0.0  ;;  %v6716_v24 = vld [vmem:[#allocation8 + $0xd4] ss:$8 sps:$4 sm:$0xff]  }
 0xa2b   : > { %v7003_v23 = vpop.eup %7002  ;;  %v2806_v49 = vsel %vm1903_vm1, %v7001_v30, 0.0 }
 0xa2c   : > { %6341 = vmatprep.mubr.msk.bf16.mxu1 %vm1903_vm1, %v2812_v59  ;;  %v2809_v12 = vsel %vm1903_vm1, %v7003_v23, 0.0  ;;  %v2813_v31 = vpack.c.bf16 %v7003_v23, %v7001_v30  ;;  %v6714_v59 = vld [vmem:[#allocation8 + $0xd0] ss:$8 sps:$4 sm:$0xff]   ;;  %v6719_v23 = vld [vmem:[#allocation8 + $0xc4] ss:$8 sps:$4 sm:$0xff]  }
 0xa2d   : > { %2459 = vadd.xlane.f32.xlu0 %v2458_v5  ;;  %2810 = vadd.xlane.f32.xlu1 %v2809_v12  ;;  %v6722_v5 = vld [vmem:[#allocation8 + $0xb4] ss:$8 sps:$4 sm:$0xff]  }
 0xa2e   : > { %6342 = vmatmul.mubr.msk.bf16.vlgmr.msra.gmra.mxu1 %vm1903_vm1, %v2813_v31  ;;  %v6720_v31 = vld [vmem:[#allocation8 + $0xb0] ss:$8 sps:$4 sm:$0xff]  }
 0xa2f   : > { %3230 = vmatpush1.bf16.msra.mxu1 %v6684_v63  ;;  %v6717_v63 = vld [vmem:[#allocation8 + $0xc0] ss:$8 sps:$4 sm:$0xff]  }
 0xa30   : > { %3231 = vmatprep.subr.bf16.mxu1 %v6689_v47 }
 0xa31   : > { %2111 = vadd.xlane.f32.xlu0 %v2110_v62  ;;  %2804 = vadd.xlane.f32.xlu1 %v2803_v52 }
 0xa33   : > { %3232 = vmatpush1.bf16.msra.mxu1 %v6687_v27  ;;  %v6725_v27 = vld [vmem:[#allocation8 + $0xa4] ss:$8 sps:$4 sm:$0xff]  }
 0xa34   : > { %3233 = vmatprep.subr.bf16.mxu1 %v6692_v38 }
 0xa35   : > { %2277 = vadd.xlane.f32.xlu0 %v2276_v26  ;;  %v6723_v26 = vld [vmem:[#allocation8 + $0xa0] ss:$8 sps:$4 sm:$0xff]  }
 0xa37   : > { %3234 = vmatpush1.bf16.msra.mxu1 %v6690_v46 }
 0xa38   : > { %3235 = vmatprep.subr.bf16.mxu1 %v6695_v36 }
 0xa39   : > { %2807 = vadd.xlane.f32.xlu0 %v2806_v49 }
 0xa3b   : > { %3236 = vmatpush1.bf16.msra.mxu1 %v6693_v6  ;;  %v6728_v6 = vld [vmem:[#allocation8 + $0x94] ss:$8 sps:$4 sm:$0xff]  }
 0xa3c   : > { %3237 = vmatprep.subr.bf16.mxu1 %v6698_v2 }
 0xa3d   : > { %1929 = vadd.xlane.f32.xlu0 %v1928_v56  ;;  %v6726_v56 = vld [vmem:[#allocation8 + $0x90] ss:$8 sps:$4 sm:$0xff]  }
 0xa3f   : > { %3238 = vmatpush1.bf16.msra.mxu1 %v6696_v34 }
 0xa40   : > { %3239 = vmatprep.subr.bf16.mxu1 %v6701_v8  ;;  %v2285_v8 = vsel %vm1903_vm1, %v7924_v22, 0.0 }
 0xa41   : > { %2625 = vadd.xlane.f32.xlu0 %v2624_v50  ;;  %v2633_v50 = vsel %vm1903_vm1, %v8027_v1, 0.0 }
 0xa43   : > { %3240 = vmatpush1.bf16.msra.mxu1 %v6699_v25  ;;  %v2282_v25 = vsel %vm1903_vm1, %v7928_v20, 0.0  ;;  %v6732_v20 = vld [vmem:[#allocation8 + $0x170] ss:$8 sps:$4 sm:$0xff]  }
 0xa44   : > { %3241 = vmatprep.subr.bf16.mxu1 %v6704_v55 }
 0xa47   : > { %3242 = vmatpush1.bf16.msra.mxu1 %v6702_v18 }
 0xa48   : > { %3243 = vmatprep.subr.bf16.mxu1 %v6707_v0 }
 0xa4b   : > { %3244 = vmatpush1.bf16.msra.mxu1 %v6705_v10 }
 0xa4c   : > { %v2454_v37 = vpop.xlane.xlu1 %2453  ;;  %3245 = vmatprep.subr.bf16.mxu1 %v6710_v42  ;;  %v6734_v42 = vld [vmem:[#allocation8 + $0x174] ss:$8 sps:$4 sm:$0xff]  }
 0xa4d   : > { %7004 = vrcp.f32 %v2454_v37  ;;  %3282 = vmatprep.subr.bf16.mxu0 %v6734_v42 }
 0xa4e   : > { %v2457_v9 = vpop.xlane.xlu0 %2456  ;;  %3283 = vmatpush1.bf16.msra.mxu0 %v6732_v20 }
 0xa4f   : > { %7006 = vrcp.f32 %v2457_v9  ;;  %3246 = vmatpush2.bf16.msra.mxu1 %v6708_v40  ;;  %v6737_v40 = vld [vmem:[#allocation8 + $0x164] ss:$8 sps:$4 sm:$0xff]   ;;  %v6735_v9 = vld [vmem:[#allocation8 + $0x160] ss:$8 sps:$4 sm:$0xff]  }
 0xa50   : > { %v2109_v15 = vpop.xlane.xlu1 %2108  ;;  %3247 = vmatprep.subr.bf16.mxu1 %v6713_v11  ;;  %3284 = vmatprep.subr.bf16.mxu0 %v6737_v40 }
 0xa51   : > { %7008 = vrcp.f32 %v2109_v15 }
 0xa52   : > { %v2106_v30 = vpop.xlane.xlu0 %2105  ;;  %3285 = vmatpush1.bf16.msra.mxu0 %v6735_v9 }
 0xa53   : > { %7010 = vrcp.f32 %v2106_v30  ;;  %3248 = vmatpush2.bf16.msra.mxu1 %v6711_v14  ;;  %v6740_v14 = vld [vmem:[#allocation8 + $0x154] ss:$8 sps:$4 sm:$0xff]  }
 0xa54   : > { %3249 = vmatprep.subr.bf16.mxu1 %v6716_v24  ;;  %v2463_v55 = vpop.xlane.xlu1 %2462  ;;  %3286 = vmatprep.subr.bf16.mxu0 %v6740_v14 }
 0xa55   : > { %7012 = vrcp.f32 %v2463_v55  ;;  %v6750_v55 = vld [vmem:[#allocation8 + $0x110] ss:$8 sps:$4 sm:$0xff]  }
 0xa57   : > { %3250 = vmatpush2.bf16.msra.mxu1 %v6714_v59 }
 0xa58   : > { %3251 = vmatprep.subr.bf16.mxu1 %v6719_v23  ;;  %v2115_v22 = vpop.xlane.xlu1 %2114 }
 0xa5a   : > { %v7005_v12 = vpop.eup %7004 }
 0xa5b   : > { %3252 = vmatpush2.bf16.msra.mxu1 %v6717_v63  ;;  %v2530_v62 = vmul.f32 %v7005_v12, %v8001_v41  ;;  %v6731_v41 = vld [vmem:[#allocation8 + $0x84] ss:$8 sps:$4 sm:$0xff]   ;;  %v6738_v63 = vld [vmem:[#allocation8 + $0x150] ss:$8 sps:$4 sm:$0xff]  }
 0xa5c   : > { %v7007_v47 = vpop.eup %7006  ;;  %3253 = vmatprep.subr.bf16.mxu1 %v6722_v5  ;;  %v2281_v10 = vpop.xlane.xlu1 %2280  ;;  %v6743_v12 = vld [vmem:[#allocation8 + $0x144] ss:$8 sps:$4 sm:$0xff]   ;;  %3287 = vmatpush1.bf16.msra.mxu0 %v6738_v63 }
 0xa5d   : > { %v2532_v52 = vmul.f32 %v7007_v47, %v8005_v57  ;;  %v6729_v57 = vld [vmem:[#allocation8 + $0x80] ss:$8 sps:$4 sm:$0xff]   ;;  %3288 = vmatprep.subr.bf16.mxu0 %v6743_v12 }
 0xa5e   : > { %v7009_v38 = vpop.eup %7008 }
 0xa5f   : > { %v2537_v46 = vpack.c.bf16 %v2532_v52, %v2530_v62  ;;  %3254 = vmatpush2.bf16.msra.mxu1 %v6720_v31  ;;  %v2184_v2 = vmul.f32 %v7009_v38, %v7951_v54  ;;  %v1937_v54 = vsel %vm1903_vm1, %v7834_v35, 0.0  ;;  %v6741_v62 = vld [vmem:[#allocation8 + $0x140] ss:$8 sps:$4 sm:$0xff]   ;;  %v6746_v38 = vld [vmem:[#allocation8 + $0x134] ss:$8 sps:$4 sm:$0xff]  }
 0xa60   : > { %v7011_v36 = vpop.eup %7010  ;;  %3255 = vmatprep.subr.bf16.mxu1 %v6725_v27  ;;  %v1933_v37 = vpop.xlane.xlu1 %1932  ;;  %3289 = vmatpush1.bf16.msra.mxu0 %v6741_v62 }
 0xa61   : > { %2895 = vrot.lane.b32.xlu0 %v2537_v46, %s7345_s17  ;;  %v2182_v49 = vmul.f32 %v7011_v36, %v7947_v17  ;;  %v1934_v17 = vsel %vm1903_vm1, %v7841_v43, 0.0  ;;  %3290 = vmatprep.subr.bf16.mxu0 %v6746_v38 }
 0xa62   : > { %v7013_v11 = vpop.eup %7012 }
 0xa63   : > { %v2189_v34 = vpack.c.bf16 %v2184_v2, %v2182_v49  ;;  %3256 = vmatpush2.bf16.msra.mxu1 %v6723_v26  ;;  %v8117_v59 = vmul.f32 %v7013_v11, %v8003_v4  ;;  %v6744_v49 = vld [vmem:[#allocation8 + $0x130] ss:$8 sps:$4 sm:$0xff]  }
 0xa64   : > { %3257 = vmatprep.subr.bf16.mxu1 %v6728_v6  ;;  %v8121_v47 = vpop.xlane.xlu1 %2628  ;;  %3291 = vmatpush1.bf16.msra.mxu0 %v6744_v49 }
 0xa65   : > { %2889 = vrot.lane.b32.xlu1 %v2189_v34, %s7345_s17 }
 0xa67   : > { %3258 = vmatpush2.bf16.msra.mxu1 %v6726_v56 }
 0xa68   : > { %3259 = vmatprep.subr.bf16.mxu1 %v6731_v41 }
 0xa6b   : > { %3260 = vmatpush2.bf16.msra.mxu1 %v6729_v57  ;;  %v6747_v57 = vld [vmem:[#allocation8 + $0x120] ss:$8 sps:$4 sm:$0xff]  }
 0xa80   : > { %2286 = vadd.xlane.f32.xlu0 %v2285_v8 }
 0xa84   : > { %1935 = vadd.xlane.f32.xlu0 %v1934_v17 }
 0xa88   : > { %1938 = vadd.xlane.f32.xlu0 %v1937_v54  ;;  %v6752_v54 = vld [vmem:[#allocation8 + $0x114] ss:$8 sps:$4 sm:$0xff]  }
 0xa89   : > { %2283 = vadd.xlane.f32.xlu1 %v2282_v25 }
 0xa8c   : > { %2634 = vadd.xlane.f32.xlu0 %v2633_v50 }
 0xab2   : > { %v8109_v18 = vpop.xlane.xlu0 %2801 }
 0xab6   : > { %v2460_v0 = vpop.xlane.xlu0 %2459  ;;  %v2811_v26 = vpop.xlane.xlu1 %2810 }
 0xab7   : > { %7014 = vrcp.f32 %v2460_v0 }
 0xab8   : > { %7016 = vrcp.f32 %v2115_v22  ;;  %v6755_v22 = vld [vmem:[#allocation8 + $0x104] ss:$8 sps:$4 sm:$0xff]  }
 0xaba   : > { %v2112_v43 = vpop.xlane.xlu0 %2111  ;;  %v2805_v56 = vpop.xlane.xlu1 %2804 }
 0xabb   : > { %7018 = vrcp.f32 %v2112_v43  ;;  %v6753_v43 = vld [vmem:[#allocation8 + $0x100] ss:$8 sps:$4 sm:$0xff]  }
 0xabe   : > { %v2278_v35 = vpop.xlane.xlu0 %2277 }
 0xabf   : > { %7020 = vrcp.f32 %v2278_v35 }
 0xac0   : > { %7022 = vrcp.f32 %v2281_v10 }
 0xac1   : > { %7024 = vrcp.f32 %v1933_v37 }
 0xac2   : > { %v8111_v1 = vpop.xlane.xlu0 %2807 }
 0xac4   : > { %v7015_v15 = vpop.eup %7014 }
 0xac5   : > { %v8114_v30 = vmul.f32 %v7015_v15, %v7999_v28  ;;  %v7017_v23 = vpop.eup %7016 }
 0xac6   : > { %v1930_v24 = vpop.xlane.xlu0 %1929  ;;  %v2188_v28 = vmul.f32 %v7017_v23, %v7949_v19 }
 0xac7   : > { %7026 = vrcp.f32 %v1930_v24  ;;  %v2538_v5 = vpack.c.bf16 %v8117_v59, %v8114_v30 }
 0xac8   : > { %v7019_v31 = vpop.eup %7018  ;;  %7028 = vrcp.f32 %v2811_v26 }
 0xac9   : > { %v2186_v27 = vmul.f32 %v7019_v31, %v7945_v7  ;;  %v6749_v7 = vld [vmem:[#allocation8 + $0x124] ss:$8 sps:$4 sm:$0xff]   ;;  %7030 = vrcp.f32 %v8111_v1 }
 0xaca   : > { %v2626_v6 = vpop.xlane.xlu0 %2625  ;;  %3292 = vmatprep.subr.bf16.mxu0 %v6749_v7  ;;  %7032 = vrcp.f32 %v8109_v18  ;;  %v2630_v18 = vsel %vm1903_vm1, %v8030_v21, 0.0 }
 0xacb   : > { %v2190_v52 = vpack.c.bf16 %v2188_v28, %v2186_v27  ;;  %3293 = vmatpush1.bf16.msra.mxu0 %v6747_v57  ;;  %7034 = vrcp.f32 %v2805_v56 }
 0xacc   : > { %v7021_v4 = vpop.eup %7020  ;;  %3294 = vmatprep.subr.bf16.mxu0 %v6752_v54  ;;  %7036 = vrcp.f32 %v2626_v6 }
 0xacd   : > { %v7023_v46 = vpop.eup %7022  ;;  %2891 = vrot.lane.b32.xlu0 %v2190_v52, %s7345_s17  ;;  %v2346_v36 = vmul.f32 %v7021_v4, %v7955_v39  ;;  %7038 = vrcp.f32 %v8121_v47 }
 0xace   : > { %v2348_v2 = vmul.f32 %v7023_v46, %v7959_v45  ;;  %v7025_v19 = vpop.eup %7024 }
 0xacf   : > { %v2000_v39 = vmul.f32 %v7025_v19, %v7873_v53  ;;  %3295 = vmatpush1.bf16.msra.mxu0 %v6750_v55 }
 0xad0   : > { %v2353_v34 = vpack.c.bf16 %v2348_v2, %v2346_v36  ;;  %3296 = vmatprep.subr.bf16.mxu0 %v6755_v22 }
 0xad3   : > { %v2896_v41 = vpop.permute.xlu0 %2895  ;;  %3297 = vmatpush1.bf16.msra.mxu0 %v6753_v43 }
 0xad4   : > { %v7027_v8 = vpop.eup %7026  ;;  %v2915_v17 = vsel %vm1841_vm0, %v2353_v34, %v2896_v41 }
 0xad5   : > { %3261 = vmatprep.mubr.bf16.mxu1 %v2915_v17  ;;  %v1998_v25 = vmul.f32 %v7027_v8, %v7868_v13  ;;  %v7346_v13 = vmov 0   ;;  %v7029_v35 = vpop.eup %7028 }
 0xad6   : > { %3314 = vmatprep.mubr.bf16.mxu0 %v7346_v13  ;;  %v7031_v20 = vpop.eup %7030 }
 0xad7   : > { %v2890_v50 = vpop.permute.xlu1 %2889  ;;  %v2005_v45 = vpack.c.bf16 %v2000_v39, %v1998_v25  ;;  %v7033_v40 = vpop.eup %7032  ;;  %v2977_v39 = vld [vmem:[%s8431_s6] sm:$0x3] }
 0xad8   : > { %v7035_v9 = vpop.eup %7034 }
 0xad9   : > { %v2907_v0 = vsel %vm1841_vm0, %v2005_v45, %v2890_v50  ;;  %v7037_v1 = vpop.eup %7036  ;;  %v2982_v50 = vrot.slane %v2977_v39, %v7706_v61  ;;  %v2986_v45 = vrot.slane %v2977_v39, %v7703_v60  ;;  %v3503_v39 = vld [vmem:[#allocation11 + $0x1a0] sm:$0xff] }
 0xada   : > { %3262 = vmatmul.mubr.bf16.vlgmr.msra.gmra.mxu1 %v2907_v0  ;;  %v7039_v12 = vpop.eup %7038  ;;  %v2694_v31 = vmul.f32 %v7037_v1, %v8042_v29 }
 0xadb   : > { %v2696_v28 = vmul.f32 %v7039_v12, %v8046_v51 }
 0xadd   : > { %v2701_v62 = vpack.c.bf16 %v2696_v28, %v2694_v31 }
 0xaee   : > { %v6343_v53 = vpop.f32.mrf.mxu1 }
 0xaef   : > { %v2882_v37 = vmul.f32 %v7031_v20, %v6343_v53 }
 0xaf0   : > { %v2862_v10 = vpop.f32.mrf.mxu1 }
 0xaf1   : > { %v2878_v15 = vmul.f32 %v7033_v40, %v2862_v10 }
 0xaf2   : > { %v6344_v42 = vpop.f32.mrf.mxu1 }
 0xaf3   : > { %v2884_v11 = vmul.f32 %v7029_v35, %v6344_v42  ;;  %v7060_v42 = vld [vmem:[%s7610_s18] sm:$0xff] }
 0xaf4   : > { %v2865_v14 = vpop.f32.mrf.mxu1 }
 0xaf5   : > { %v2886_v24 = vpack.c.bf16 %v2884_v11, %v2882_v37  ;;  %v2880_v23 = vmul.f32 %v7035_v9, %v2865_v14  ;;  %v7061_v37 = vld [vmem:[%s7610_s18 + $0x8] sm:$0xff] }
 0xaf7   : > { %v2885_v63 = vpack.c.bf16 %v2880_v23, %v2878_v15  ;;  %v7062_v23 = vld [vmem:[%s7610_s18 + $0x10] sm:$0xff] }
 0xaf9   : > { %2901 = vrot.lane.b32.xlu1 %v2885_v63, %s7345_s17 }
 0xb09   : > { %v2287_v30 = vpop.xlane.xlu0 %2286 }
 0xb0d   : > { %v1936_v59 = vpop.xlane.xlu0 %1935 }
 0xb12   : > { %v2284_v27 = vpop.xlane.xlu1 %2283 }
 0xb13   : > { %7040 = vrcp.f32 %v2284_v27 }
 0xb1d   : > { %2631 = vadd.xlane.f32.xlu1 %v2630_v18  ;;  %v7063_v18 = vld [vmem:[%s7610_s18 + $0x18] sm:$0xff] }
 0xb20   : > { %v7041_v47 = vpop.eup %7040 }
 0xb21   : > { %v2350_v51 = vmul.f32 %v7041_v47, %v7953_v33 }
 0xb2e   : > { %2897 = vrot.lane.b32.xlu1 %v2538_v5, %s7345_s17  ;;  %v1939_v5 = vpop.xlane.xlu0 %1938 }
 0xb2f   : > { %7042 = vrcp.f32 %v1939_v5 }
 0xb30   : > { %7044 = vrcp.f32 %v2287_v30 }
 0xb31   : > { %7046 = vrcp.f32 %v1936_v59 }
 0xb32   : > { %2903 = vrot.lane.b32.xlu1 %v2886_v24, %s7345_s17  ;;  %v2635_v52 = vpop.xlane.xlu0 %2634  ;;  %s8379_s17 = scalar_lea.hbm %s8438_s13, %s6172_s8 }
 0xb33   : > { %7048 = vrcp.f32 %v2635_v52 }
 0xb3c   : > { %v7043_v38 = vpop.eup %7042 }
 0xb3d   : > { %v7045_v29 = vpop.eup %7044  ;;  %v2004_v36 = vmul.f32 %v7043_v38, %v7871_v16 }
 0xb3e   : > { %v7047_v46 = vpop.eup %7046  ;;  %v2352_v6 = vmul.f32 %v7045_v29, %v7957_v44 }
 0xb3f   : > { %v2002_v49 = vmul.f32 %v7047_v46, %v7863_v32  ;;  %v2892_v2 = vpop.permute.xlu0 %2891  ;;  %v7064_v46 = vld [vmem:[%s7610_s18 + $0x20] sm:$0xff] }
 0xb40   : > { %v2354_v7 = vpack.c.bf16 %v2352_v6, %v2350_v51  ;;  %v7049_v57 = vpop.eup %7048 }
 0xb41   : > { %v2006_v34 = vpack.c.bf16 %v2004_v36, %v2002_v49  ;;  %v2700_v16 = vmul.f32 %v7049_v57, %v8044_v48 }
 0xb43   : > { %v2911_v41 = vsel %vm1841_vm0, %v2006_v34, %v2892_v2 }
 0xb6b   : > { %v2902_v21 = vpop.permute.xlu1 %2901 }
 0xb6c   : > { %v2923_v4 = vsel %vm1841_vm0, %v2701_v62, %v2902_v21 }
 0xb6d   : > { %3315 = vmatmul.mubr.bf16.vlgmr.msra.gmra.mxu0 %v2923_v4 }
 0xb6e   : > { %3324 = vmatprep.mubr.bf16.mxu0 %v7346_v13 }
 0xb9a   : > { %v3263_v54 = vpop.f32.mrf.mxu1 }
 0xb9b   : > { %v3264_v55 = vadd.f32 %v3263_v54, %v2982_v50  ;;  %v3499_v54 = vld [vmem:[#allocation11 + $0x180] sm:$0xff] }
 0xb9c   : > { %v3265_v25 = vpop.f32.mrf.mxu1 }
 0xb9d   : > { %v3266_v22 = vadd.f32 %v3265_v25, %v2986_v45 }
 0xba6   : > { %v2632_v26 = vpop.xlane.xlu1 %2631 }
 0xba7   : > { %7050 = vrcp.f32 %v2632_v26  ;;  %v7065_v26 = vld [vmem:[%s7610_s18 + $0x28] sm:$0xff] }
 0xbaa   : > { %v2898_v19 = vpop.permute.xlu1 %2897 }
 0xbab   : > { %v2919_v56 = vsel %vm1841_vm0, %v2354_v7, %v2898_v19  ;;  %v7066_v19 = vld [vmem:[%s7610_s18 + $0x30] sm:$0xff] }
 0xbac   : > { %3271 = vmatprep.mubr.bf16.mxu1 %v2919_v56  ;;  %v7067_v56 = vld [vmem:[%s7610_s18 + $0x38] sm:$0xff] }
 0xbad   : > { %3272 = vmatmul.mubr.bf16.gmra.mxu1 %v2911_v41 }
 0xbae   : > { %v2904_v44 = vpop.permute.xlu1 %2903 }
 0xbb4   : > { %v7051_v33 = vpop.eup %7050 }
 0xbb5   : > { %v2698_v8 = vmul.f32 %v7051_v33, %v8040_v3  ;;  %v3267_v3 = vpop.f32.mrf.mxu1  ;;  %v3507_v33 = vld [vmem:[#allocation11 + $0x1c0] sm:$0xff] }
 0xbb6   : > { %v3268_v53 = vadd.f32 %v3267_v3, %v2982_v50  ;;  %v3500_v3 = vld [vmem:[#allocation11 + $0x188] sm:$0xff] }
 0xbb7   : > { %v2702_v17 = vpack.c.bf16 %v2700_v16, %v2698_v8  ;;  %v3269_v43 = vpop.f32.mrf.mxu1  ;;  %v3511_v8 = vld [vmem:[#allocation11 + $0x1e0] sm:$0xff]  ;;  %v3508_v16 = vld [vmem:[#allocation11 + $0x1c8] sm:$0xff] }
 0xbb8   : > { %v3270_v20 = vadd.f32 %v3269_v43, %v2986_v45  ;;  %v3492_v43 = vld [vmem:[#allocation11 + $0x148] sm:$0xff] }
 0xbb9   : > { %v2927_v32 = vsel %vm1841_vm0, %v2702_v17, %v2904_v44  ;;  %v5966_v17 = vcombine.low %v3507_v33, %v3511_v8  ;;  %v5967_v44 = vcombine.high %v3507_v33, %v3511_v8  ;;  %v3451_v8 = vld [vmem:[#allocation11] sm:$0xff] }
 0xbba   : > { %3325 = vmatmul.mubr.bf16.gmra.mxu0 %v2927_v32  ;;  %v3512_v32 = vld [vmem:[#allocation11 + $0x1e8] sm:$0xff] }
 0xbbb   : > { %v5968_v25 = vcombine.low %v3508_v16, %v3512_v32  ;;  %4261 = vmatprep.subr.bf16.mxu0 %v5967_v44  ;;  %v3456_v44 = vld [vmem:[#allocation11 + $0x28] sm:$0xff] }
 0xbbc   : > { %4262 = vmatpush1.bf16.msra.mxu0 %v5966_v17  ;;  %v3452_v17 = vld [vmem:[#allocation11 + $0x8] sm:$0xff] }
 0xc2d   : > { %v3316_v48 = vpop.f32.mrf.mxu0 }
 0xc2e   : > { %v3317_v0 = vadd.f32 %v3316_v48, %v3264_v55  ;;  %v3504_v55 = vld [vmem:[#allocation11 + $0x1a8] sm:$0xff]  ;;  %v3491_v48 = vld [vmem:[#allocation11 + $0x140] sm:$0xff] }
 0xc2f   : > { %v3318_v13 = vpop.f32.mrf.mxu0 }
 0xc30   : > { %v3319_v10 = vadd.f32 %v3318_v13, %v3266_v22  ;;  %v8161_v40 = vadd.f32 %v7060_v42, %v3317_v0  ;;  %v5961_v22 = vcombine.high %v3500_v3, %v3504_v55  ;;  %v3495_v0 = vld [vmem:[#allocation11 + $0x160] sm:$0xff]  ;;  %v3496_v13 = vld [vmem:[#allocation11 + $0x168] sm:$0xff] }
 0xc31   : > { %v3320_v35 = vpop.f32.mrf.mxu0  ;;  %v3483_v42 = vld [vmem:[#allocation11 + $0x100] sm:$0xff] }
 0xc32   : > { %v8164_v11 = vadd.f32 %v7061_v37, %v3319_v10  ;;  %v3321_v9 = vadd.f32 %v3320_v35, %v3268_v53  ;;  %v5958_v53 = vcombine.low %v3499_v54, %v3503_v39  ;;  %v5960_v10 = vcombine.low %v3500_v3, %v3504_v55  ;;  %v3487_v37 = vld [vmem:[#allocation11 + $0x120] sm:$0xff]  ;;  %v3572_v3 = vld [vmem:[#allocation11 + $0x3c8] sm:$0xff] }
 0xc33   : > { %v3322_v14 = vpop.f32.mrf.mxu0  ;;  %v5951_v35 = vcombine.high %v3491_v48, %v3495_v0  ;;  %v3576_v55 = vld [vmem:[#allocation11 + $0x3e8] sm:$0xff] }
 0xc34   : > { %v3323_v15 = vadd.f32 %v3322_v14, %v3270_v20  ;;  %v3345_v24 = vadd.f32 %v8164_v11, %v8161_v40  ;;  %v8169_v63 = vadd.f32 %v7062_v23, %v3321_v9  ;;  %v5953_v20 = vcombine.high %v3492_v43, %v3496_v13  ;;  %v3484_v9 = vld [vmem:[#allocation11 + $0x108] sm:$0xff] }
 0xc35   : > { %v3488_v14 = vld [vmem:[#allocation11 + $0x128] sm:$0xff]  ;;  %v5943_v23 = vcombine.high %v3483_v42, %v3487_v37 }
 0xc36   : > { %v8172_v1 = vadd.f32 %v7063_v18, %v3323_v15  ;;  %3346 = vadd.xlane.f32.xlu1 %v3345_v24  ;;  %v5950_v15 = vcombine.low %v3491_v48, %v3495_v0  ;;  %v5952_v24 = vcombine.low %v3492_v43, %v3496_v13  ;;  %v5945_v18 = vcombine.high %v3484_v9, %v3488_v14 }
 0xc37   : > { %v6033_v43 = vcombine.high %v3572_v3, %v3576_v55 }
 0xc38   : > { %v3348_v12 = vadd.f32 %v8172_v1, %v8169_v63 }
 0xc3a   : > { %3349 = vadd.xlane.f32.xlu0 %v3348_v12  ;;  %v3475_v12 = vld [vmem:[#allocation11 + $0xc0] sm:$0xff] }
 0xc6d   : > { %v3273_v31 = vpop.f32.mrf.mxu1 }
 0xc6e   : > { %v3274_v62 = vadd.f32 %v3273_v31, %v2982_v50  ;;  %v3479_v31 = vld [vmem:[#allocation11 + $0xe0] sm:$0xff] }
 0xc6f   : > { %v3275_v27 = vpop.f32.mrf.mxu1 }
 0xc70   : > { %v3276_v4 = vadd.f32 %v3275_v27, %v2986_v45  ;;  %v3476_v27 = vld [vmem:[#allocation11 + $0xc8] sm:$0xff] }
 0xc71   : > { %v3277_v28 = vpop.f32.mrf.mxu1 }
 0xc72   : > { %v3278_v47 = vadd.f32 %v3277_v28, %v2982_v50  ;;  %v5969_v50 = vcombine.high %v3508_v16, %v3512_v32  ;;  %v3480_v28 = vld [vmem:[#allocation11 + $0xe8] sm:$0xff]  ;;  %v3455_v16 = vld [vmem:[#allocation11 + $0x20] sm:$0xff] }
 0xc73   : > { %v3279_v59 = vpop.f32.mrf.mxu1  ;;  %v5910_v48 = vcombine.low %v3451_v8, %v3455_v16 }
 0xc74   : > { %v3280_v29 = vadd.f32 %v3279_v59, %v2986_v45  ;;  %v5959_v45 = vcombine.high %v3499_v54, %v3503_v39  ;;  %4314 = vmatprep.subr.bf16.mxu1 %v5969_v50  ;;  %v3467_v59 = vld [vmem:[#allocation11 + $0x80] sm:$0xff]  ;;  %v5911_v39 = vcombine.high %v3451_v8, %v3455_v16 }
 0xc75   : > { %4315 = vmatpush1.bf16.msra.mxu1 %v5968_v25  ;;  %v5913_v25 = vcombine.high %v3452_v17, %v3456_v44  ;;  %v3571_v50 = vld [vmem:[#allocation11 + $0x3c0] sm:$0xff] }
 0xc76   : > { %4263 = vmatprep.subr.bf16.mxu0 %v5959_v45  ;;  %4316 = vmatprep.subr.bf16.mxu1 %v5961_v22  ;;  %v3575_v45 = vld [vmem:[#allocation11 + $0x3e0] sm:$0xff]  ;;  %v5912_v22 = vcombine.low %v3452_v17, %v3456_v44 }
 0xc77   : > { %4264 = vmatpush1.bf16.msra.mxu0 %v5958_v53  ;;  %v6031_v0 = vcombine.high %v3571_v50, %v3575_v45  ;;  %v6030_v13 = vcombine.low %v3571_v50, %v3575_v45  ;;  %v6032_v53 = vcombine.low %v3572_v3, %v3576_v55  ;;  %v3539_v44 = vld [vmem:[#allocation11 + $0x2c0] sm:$0xff] }
 0xc78   : > { %4265 = vmatprep.subr.bf16.mxu0 %v5951_v35  ;;  %v3531_v55 = vld [vmem:[#allocation11 + $0x280] sm:$0xff] }
 0xc79   : > { %4317 = vmatpush1.bf16.msra.mxu1 %v5960_v10 }
 0xc7a   : > { %v3326_v21 = vpop.f32.mrf.mxu0  ;;  %4318 = vmatprep.subr.bf16.mxu1 %v5953_v20 }
 0xc7b   : > { %v3327_v30 = vadd.f32 %v3326_v21, %v3274_v62  ;;  %4266 = vmatpush1.bf16.msra.mxu0 %v5950_v15  ;;  %v5942_v62 = vcombine.low %v3483_v42, %v3487_v37  ;;  %v5944_v21 = vcombine.low %v3484_v9, %v3488_v14 }
 0xc7c   : > { %v3328_v5 = vpop.f32.mrf.mxu0  ;;  %4267 = vmatprep.subr.bf16.mxu0 %v5943_v23 }
 0xc7d   : > { %v3329_v52 = vadd.f32 %v3328_v5, %v3276_v4  ;;  %v8177_v51 = vadd.f32 %v7064_v46, %v3327_v30  ;;  %4319 = vmatpush1.bf16.msra.mxu1 %v5952_v24  ;;  %v5935_v4 = vcombine.high %v3475_v12, %v3479_v31  ;;  %v5937_v30 = vcombine.high %v3476_v27, %v3480_v28  ;;  %v3471_v5 = vld [vmem:[#allocation11 + $0xa0] sm:$0xff] }
 0xc7e   : > { %v3330_v38 = vpop.f32.mrf.mxu0  ;;  %4320 = vmatprep.subr.bf16.mxu1 %v5945_v18  ;;  %v5927_v46 = vcombine.high %v3467_v59, %v3471_v5 }
 0xc7f   : > { %v8180_v36 = vadd.f32 %v7065_v26, %v3329_v52  ;;  %v3331_v6 = vadd.f32 %v3330_v38, %v3278_v47  ;;  %v3468_v47 = vld [vmem:[#allocation11 + $0x88] sm:$0xff]  ;;  %4268 = vmatpush1.bf16.msra.mxu0 %v5942_v62  ;;  %v5934_v38 = vcombine.low %v3475_v12, %v3479_v31  ;;  %v3567_v62 = vld [vmem:[#allocation11 + $0x3a0] sm:$0xff] }
 0xc80   : > { %v3332_v49 = vpop.f32.mrf.mxu0  ;;  %v3472_v52 = vld [vmem:[#allocation11 + $0xa8] sm:$0xff]  ;;  %4269 = vmatprep.subr.bf16.mxu0 %v5935_v4 }
 0xc81   : > { %v3333_v2 = vadd.f32 %v3332_v49, %v3280_v29  ;;  %v3351_v7 = vadd.f32 %v8180_v36, %v8177_v51  ;;  %v8185_v34 = vadd.f32 %v7066_v19, %v3331_v6  ;;  %4321 = vmatpush1.bf16.msra.mxu1 %v5944_v21  ;;  %v5936_v29 = vcombine.low %v3476_v27, %v3480_v28  ;;  %v3459_v6 = vld [vmem:[#allocation11 + $0x40] sm:$0xff]  ;;  %v3564_v21 = vld [vmem:[#allocation11 + $0x388] sm:$0xff] }
 0xc82   : > { %4322 = vmatprep.subr.bf16.mxu1 %v5937_v30  ;;  %v5929_v26 = vcombine.high %v3468_v47, %v3472_v52  ;;  %v3463_v49 = vld [vmem:[#allocation11 + $0x60] sm:$0xff]  ;;  %v5926_v19 = vcombine.low %v3467_v59, %v3471_v5  ;;  %v3568_v30 = vld [vmem:[#allocation11 + $0x3a8] sm:$0xff] }
 0xc83   : > { %v8188_v41 = vadd.f32 %v7067_v56, %v3333_v2  ;;  %3352 = vadd.xlane.f32.xlu0 %v3351_v7  ;;  %v3460_v2 = vld [vmem:[#allocation11 + $0x48] sm:$0xff]  ;;  %4270 = vmatpush1.bf16.msra.mxu0 %v5934_v38  ;;  %v5928_v56 = vcombine.low %v3468_v47, %v3472_v52  ;;  %v5918_v32 = vcombine.low %v3459_v6, %v3463_v49  ;;  %v3563_v28 = vld [vmem:[#allocation11 + $0x380] sm:$0xff] }
 0xc84   : > { %v3464_v7 = vld [vmem:[#allocation11 + $0x68] sm:$0xff]  ;;  %4271 = vmatprep.subr.bf16.mxu0 %v5927_v46  ;;  %v6023_v4 = vcombine.high %v3563_v28, %v3567_v62  ;;  %v6022_v59 = vcombine.low %v3563_v28, %v3567_v62  ;;  %v6024_v5 = vcombine.low %v3564_v21, %v3568_v30  ;;  %v6025_v47 = vcombine.high %v3564_v21, %v3568_v30  ;;  %v3555_v52 = vld [vmem:[#allocation11 + $0x340] sm:$0xff] }
 0xc85   : > { %v3354_v57 = vadd.f32 %v8188_v41, %v8185_v34  ;;  %4323 = vmatpush1.bf16.msra.mxu1 %v5936_v29  ;;  %v5921_v33 = vcombine.high %v3460_v2, %v3464_v7  ;;  %v5920_v54 = vcombine.low %v3460_v2, %v3464_v7  ;;  %v3559_v38 = vld [vmem:[#allocation11 + $0x360] sm:$0xff]  ;;  %v3556_v29 = vld [vmem:[#allocation11 + $0x348] sm:$0xff] }
 0xc86   : > { %4324 = vmatprep.subr.bf16.mxu1 %v5929_v26  ;;  %v6015_v46 = vcombine.high %v3555_v52, %v3559_v38  ;;  %v3560_v26 = vld [vmem:[#allocation11 + $0x368] sm:$0xff]  ;;  %v3547_v7 = vld [vmem:[#allocation11 + $0x300] sm:$0xff] }
 0xc87   : > { %3355 = vadd.xlane.f32.xlu1 %v3354_v57  ;;  %v5919_v57 = vcombine.high %v3459_v6, %v3463_v49  ;;  %4272 = vmatpush1.bf16.msra.mxu0 %v5926_v19  ;;  %v6014_v6 = vcombine.low %v3555_v52, %v3559_v38  ;;  %v6016_v49 = vcombine.low %v3556_v29, %v3560_v26  ;;  %v3551_v19 = vld [vmem:[#allocation11 + $0x320] sm:$0xff]  ;;  %v3516_v21 = vld [vmem:[#allocation11 + $0x208] sm:$0xff]  ;;  %v8214_v52 = vld [vmem:[#allocation11 + $0x1f0] sm:$0xff] }
 0xc88   : > { %v6017_v2 = vcombine.high %v3556_v29, %v3560_v26  ;;  %v6006_v8 = vcombine.low %v3547_v7, %v3551_v19  ;;  %v8216_v38 = vld [vmem:[#allocation11 + $0x1d8] sm:$0xff] }
 0xc89   : > { %4325 = vmatpush1.bf16.msra.mxu1 %v5928_v56  ;;  %4273 = vmatprep.subr.bf16.mxu0 %v5919_v57  ;;  %v3548_v56 = vld [vmem:[#allocation11 + $0x308] sm:$0xff]  ;;  %v6007_v57 = vcombine.high %v3547_v7, %v3551_v19  ;;  %v8222_v26 = vld [vmem:[#allocation11 + $0x1f8] sm:$0xff] }
 0xc8a   : > { %4326 = vmatprep.subr.bf16.mxu1 %v5921_v33  ;;  %v3552_v33 = vld [vmem:[#allocation11 + $0x328] sm:$0xff] }
 0xc8b   : > { %4274 = vmatpush1.bf16.msra.mxu0 %v5918_v32  ;;  %v6008_v16 = vcombine.low %v3548_v56, %v3552_v33  ;;  %v6009_v17 = vcombine.high %v3548_v56, %v3552_v33  ;;  %v3543_v32 = vld [vmem:[#allocation11 + $0x2e0] sm:$0xff] }
 0xc8c   : > { %4275 = vmatprep.subr.bf16.mxu0 %v5911_v39  ;;  %v5999_v39 = vcombine.high %v3539_v44, %v3543_v32  ;;  %v5998_v50 = vcombine.low %v3539_v44, %v3543_v32 }
 0xc8d   : > { %4327 = vmatpush1.bf16.msra.mxu1 %v5920_v54  ;;  %v3540_v54 = vld [vmem:[#allocation11 + $0x2c8] sm:$0xff] }
 0xc8e   : > { %4328 = vmatprep.subr.bf16.mxu1 %v5913_v25  ;;  %v3544_v25 = vld [vmem:[#allocation11 + $0x2e8] sm:$0xff] }
 0xc8f   : > { %4276 = vmatpush1.bf16.msra.mxu0 %v5910_v48  ;;  %v6000_v45 = vcombine.low %v3540_v54, %v3544_v25  ;;  %v6001_v3 = vcombine.high %v3540_v54, %v3544_v25  ;;  %v3535_v48 = vld [vmem:[#allocation11 + $0x2a0] sm:$0xff] }
 0xc90   : > { %4277 = vmatprep.subr.bf16.mxu0 %v6031_v0  ;;  %v5991_v0 = vcombine.high %v3531_v55, %v3535_v48 }
 0xc91   : > { %4329 = vmatpush1.bf16.msra.mxu1 %v5912_v22  ;;  %v3532_v22 = vld [vmem:[#allocation11 + $0x288] sm:$0xff] }
 0xc92   : > { %4330 = vmatprep.subr.bf16.mxu1 %v6033_v43  ;;  %v3536_v43 = vld [vmem:[#allocation11 + $0x2a8] sm:$0xff] }
 0xc93   : > { %4278 = vmatpush2.bf16.msra.mxu0 %v6030_v13  ;;  %v5990_v13 = vcombine.low %v3531_v55, %v3535_v48 }
 0xc94   : > { %4279 = vmatprep.subr.bf16.mxu0 %v6023_v4  ;;  %v3520_v4 = vld [vmem:[#allocation11 + $0x228] sm:$0xff] }
 0xc95   : > { %4331 = vmatpush2.bf16.msra.mxu1 %v6032_v53  ;;  %v5992_v53 = vcombine.low %v3532_v22, %v3536_v43  ;;  %v5977_v30 = vcombine.high %v3516_v21, %v3520_v4 }
 0xc96   : > { %4332 = vmatprep.subr.bf16.mxu1 %v6025_v47  ;;  %v8212_v47 = vld [vmem:[#allocation11 + $0x1d0] sm:$0xff] }
 0xc97   : > { %4280 = vmatpush2.bf16.msra.mxu0 %v6022_v59  ;;  %v5970_v29 = vcombine.low %v8212_v47, %v8214_v52 }
 0xc98   : > { %4281 = vmatprep.subr.bf16.mxu0 %v6015_v46  ;;  %v5971_v46 = vcombine.high %v8212_v47, %v8214_v52 }
 0xc99   : > { %4333 = vmatpush2.bf16.msra.mxu1 %v6024_v5  ;;  %v5976_v5 = vcombine.low %v3516_v21, %v3520_v4 }
 0xc9a   : > { %4334 = vmatprep.subr.bf16.mxu1 %v6017_v2 }
 0xc9b   : > { %4282 = vmatpush2.bf16.msra.mxu0 %v6014_v6  ;;  %v5972_v6 = vcombine.low %v8216_v38, %v8222_v26 }
 0xc9c   : > { %4283 = vmatprep.subr.bf16.mxu0 %v6007_v57 }
 0xc9d   : > { %4335 = vmatpush2.bf16.msra.mxu1 %v6016_v49  ;;  %v5973_v49 = vcombine.high %v8216_v38, %v8222_v26  ;;  %v3477_v38 = vld [vmem:[#allocation11 + $0xd0] sm:$0xff]  ;;  %v3478_v26 = vld [vmem:[#allocation11 + $0xd8] sm:$0xff] }
 0xc9e   : > { %4336 = vmatprep.subr.bf16.mxu1 %v6009_v17 }
 0xc9f   : > { %4284 = vmatpush2.bf16.msra.mxu0 %v6006_v8 }
 0xca0   : > { %4285 = vmatprep.subr.bf16.mxu0 %v5999_v39 }
 0xca1   : > { %4337 = vmatpush2.bf16.msra.mxu1 %v6008_v16 }
 0xca2   : > { %4338 = vmatprep.subr.bf16.mxu1 %v6001_v3 }
 0xca3   : > { %4286 = vmatpush2.bf16.msra.mxu0 %v5998_v50 }
 0xca4   : > { %4287 = vmatprep.subr.bf16.mxu0 %v5991_v0  ;;  %v3343_v0 = vld [vmem:[%s8432_s7] sm:$0x3] }
 0xca5   : > { %4339 = vmatpush2.bf16.msra.mxu1 %v6000_v45 }
 0xca7   : > { %4288 = vmatpush2.bf16.msra.mxu0 %v5990_v13 }
 0xcbf   : > { %v3347_v10 = vpop.xlane.xlu1 %3346 }
 0xcc0   : > { %v3357_v35 = vmul.f32 0.00390625, %v3347_v10  ;;  %v5993_v10 = vcombine.high %v3532_v22, %v3536_v43 }
 0xcc2   : > { %v8193_v20 = vsub.f32 %v8161_v40, %v3357_v35  ;;  %v8196_v42 = vsub.f32 %v8164_v11, %v3357_v35  ;;  %4340 = vmatprep.subr.bf16.mxu1 %v5993_v10  ;;  %v3523_v35 = vld [vmem:[#allocation11 + $0x240] sm:$0xff] }
 0xcc3   : > { %v3350_v37 = vpop.xlane.xlu0 %3349  ;;  %4341 = vmatpush2.bf16.msra.mxu1 %v5992_v53  ;;  %v3344_v53 = vld [vmem:[#allocation10] sm:$0x3] }
 0xcc4   : > { %v3358_v9 = vmul.f32 0.00390625, %v3350_v37  ;;  %v3369_v14 = vmul.f32 %v8193_v20, %v8193_v20  ;;  %v3370_v15 = vmul.f32 %v8196_v42, %v8196_v42  ;;  %v3527_v37 = vld [vmem:[#allocation11 + $0x260] sm:$0xff] }
 0xcc6   : > { %v8203_v24 = vsub.f32 %v8169_v63, %v3358_v9  ;;  %v8206_v23 = vsub.f32 %v8172_v1, %v3358_v9  ;;  %v3377_v18 = vadd.f32 %v3370_v15, %v3369_v14  ;;  %v3524_v9 = vld [vmem:[#allocation11 + $0x248] sm:$0xff]  ;;  %v5982_v14 = vcombine.low %v3523_v35, %v3527_v37 }
 0xcc7   : > { %v5983_v15 = vcombine.high %v3523_v35, %v3527_v37  ;;  %v8254_v35 = vrot.slane %v3343_v0, %v7706_v61  ;;  %v8257_v37 = vrot.slane %v3343_v0, %v7703_v60 }
 0xcc8   : > { %3378 = vadd.xlane.f32.xlu0 %v3377_v18  ;;  %v3371_v12 = vmul.f32 %v8203_v24, %v8203_v24  ;;  %v3372_v31 = vmul.f32 %v8206_v23, %v8206_v23  ;;  %v3528_v18 = vld [vmem:[#allocation11 + $0x268] sm:$0xff] }
 0xcc9   : > { %v5985_v28 = vcombine.high %v3524_v9, %v3528_v18  ;;  %4289 = vmatprep.subr.bf16.mxu0 %v5983_v15  ;;  %v8263_v15 = vrot.slane %v3344_v53, %v7703_v60 }
 0xcca   : > { %v3380_v27 = vadd.f32 %v3372_v31, %v3371_v12  ;;  %v3515_v12 = vld [vmem:[#allocation11 + $0x200] sm:$0xff]  ;;  %4290 = vmatpush2.bf16.msra.mxu0 %v5982_v14  ;;  %v8260_v14 = vrot.slane %v3344_v53, %v7706_v61  ;;  %v3469_v53 = vld [vmem:[#allocation11 + $0x90] sm:$0xff] }
 0xccb   : > { %v3519_v31 = vld [vmem:[#allocation11 + $0x220] sm:$0xff]  ;;  %4342 = vmatprep.subr.bf16.mxu1 %v5985_v28  ;;  %v3501_v28 = vld [vmem:[#allocation11 + $0x190] sm:$0xff] }
 0xccc   : > { %3381 = vadd.xlane.f32.xlu1 %v3380_v27  ;;  %v5984_v27 = vcombine.low %v3524_v9, %v3528_v18  ;;  %v5975_v62 = vcombine.high %v3515_v12, %v3519_v31  ;;  %v5974_v59 = vcombine.low %v3515_v12, %v3519_v31 }
 0xcce   : > { %4343 = vmatpush2.bf16.msra.mxu1 %v5984_v27  ;;  %4291 = vmatprep.subr.bf16.mxu0 %v5975_v62 }
 0xccf   : > { %4344 = vmatprep.subr.bf16.mxu1 %v5977_v30  ;;  %4292 = vmatpush2.bf16.msra.mxu0 %v5974_v59  ;;  %v3502_v59 = vld [vmem:[#allocation11 + $0x198] sm:$0xff] }
 0xcd0   : > { %4367 = vmatprep.subr.bf16.mxu0 %v5971_v46 }
 0xcd2   : > { %4345 = vmatpush2.bf16.msra.mxu1 %v5976_v5 }
 0xcd3   : > { %4420 = vmatprep.subr.bf16.mxu1 %v5973_v49 }
 0xd0c   : > { %v3353_v2 = vpop.xlane.xlu0 %3352 }
 0xd0d   : > { %v3359_v7 = vmul.f32 0.00390625, %v3353_v2 }
 0xd0f   : > { %v8229_v19 = vsub.f32 %v8177_v51, %v3359_v7  ;;  %v8232_v56 = vsub.f32 %v8180_v36, %v3359_v7  ;;  %v3493_v7 = vld [vmem:[#allocation11 + $0x150] sm:$0xff] }
 0xd10   : > { %v3356_v57 = vpop.xlane.xlu1 %3355 }
 0xd11   : > { %v3360_v33 = vmul.f32 0.00390625, %v3356_v57  ;;  %v3373_v8 = vmul.f32 %v8229_v19, %v8229_v19  ;;  %v3374_v16 = vmul.f32 %v8232_v56, %v8232_v56  ;;  %v3497_v57 = vld [vmem:[#allocation11 + $0x170] sm:$0xff] }
 0xd13   : > { %v8239_v17 = vsub.f32 %v8185_v34, %v3360_v33  ;;  %v8242_v44 = vsub.f32 %v8188_v41, %v3360_v33  ;;  %v3383_v32 = vadd.f32 %v3374_v16, %v3373_v8  ;;  %v3494_v33 = vld [vmem:[#allocation11 + $0x158] sm:$0xff] }
 0xd14   : > { %v3498_v8 = vld [vmem:[#allocation11 + $0x178] sm:$0xff] }
 0xd15   : > { %3384 = vadd.xlane.f32.xlu0 %v3383_v32  ;;  %v3375_v54 = vmul.f32 %v8239_v17, %v8239_v17  ;;  %v3376_v39 = vmul.f32 %v8242_v44, %v8242_v44 }
 0xd17   : > { %v3386_v25 = vadd.f32 %v3376_v39, %v3375_v54  ;;  %v5955_v54 = vcombine.high %v3493_v7, %v3497_v57  ;;  %v5957_v39 = vcombine.high %v3494_v33, %v3498_v8 }
 0xd19   : > { %3387 = vadd.xlane.f32.xlu1 %v3386_v25  ;;  %v3485_v25 = vld [vmem:[#allocation11 + $0x110] sm:$0xff] }
 0xd51   : > { %v3379_v50 = vpop.xlane.xlu0 %3378 }
 0xd52   : > { %v3389_v45 = vmul.f32 0.00390625, %v3379_v50  ;;  %v3489_v50 = vld [vmem:[#allocation11 + $0x130] sm:$0xff] }
 0xd53   : > { %v5947_v47 = vcombine.high %v3485_v25, %v3489_v50 }
 0xd54   : > { %v3393_v3 = vadd.f32 1e-05, %v3389_v45  ;;  %v3486_v45 = vld [vmem:[#allocation11 + $0x118] sm:$0xff] }
 0xd55   : > { %v3382_v55 = vpop.xlane.xlu1 %3381 }
 0xd56   : > { %7052 = vrsqrt.f32 %v3393_v3  ;;  %v3390_v48 = vmul.f32 0.00390625, %v3382_v55  ;;  %v3490_v3 = vld [vmem:[#allocation11 + $0x138] sm:$0xff]  ;;  %v5954_v55 = vcombine.low %v3493_v7, %v3497_v57 }
 0xd57   : > { %v5949_v52 = vcombine.high %v3486_v45, %v3490_v3  ;;  %v5948_v0 = vcombine.low %v3486_v45, %v3490_v3  ;;  %v3458_v7 = vld [vmem:[#allocation11 + $0x38] sm:$0xff] }
 0xd58   : > { %v3394_v22 = vadd.f32 1e-05, %v3390_v48  ;;  %v5956_v48 = vcombine.low %v3494_v33, %v3498_v8 }
 0xd5a   : > { %7054 = vrsqrt.f32 %v3394_v22  ;;  %v5946_v22 = vcombine.low %v3485_v25, %v3489_v50  ;;  %v3578_v25 = vld [vmem:[#allocation11 + $0x3f8] sm:$0xff] }
 0xd63   : > { %v7053_v43 = vpop.eup %7052 }
 0xd64   : > { %v3401_v13 = vmul.f32 %v7053_v43, %v8193_v20  ;;  %v3402_v10 = vmul.f32 %v7053_v43, %v8196_v42 }
 0xd66   : > { %v3421_v12 = vmul.f32 %v8257_v37, %v3402_v10  ;;  %v3420_v42 = vmul.f32 %v8254_v35, %v3401_v13  ;;  %v3473_v10 = vld [vmem:[#allocation11 + $0xb0] sm:$0xff] }
 0xd67   : > { %v7055_v9 = vpop.eup %7054 }
 0xd68   : > { %v3403_v18 = vmul.f32 %v7055_v9, %v8203_v24  ;;  %v3404_v20 = vmul.f32 %v7055_v9, %v8206_v23  ;;  %v3440_v62 = vadd.f32 %v8263_v15, %v3421_v12  ;;  %v3439_v4 = vadd.f32 %v8260_v14, %v3420_v42  ;;  %v3505_v24 = vld [vmem:[#allocation11 + $0x1b0] sm:$0xff]  ;;  %v3506_v23 = vld [vmem:[#allocation11 + $0x1b8] sm:$0xff] }
 0xd69   : > { %v5963_v49 = vcombine.high %v3501_v28, %v3505_v24  ;;  %v5965_v2 = vcombine.high %v3502_v59, %v3506_v23  ;;  %v5962_v16 = vcombine.low %v3501_v28, %v3505_v24  ;;  %v5964_v32 = vcombine.low %v3502_v59, %v3506_v23  ;;  %v3470_v9 = vld [vmem:[#allocation11 + $0x98] sm:$0xff]  ;;  %v3465_v28 = vld [vmem:[#allocation11 + $0x70] sm:$0xff] }
 0xd6a   : > { %v3423_v31 = vmul.f32 %v8257_v37, %v3404_v20  ;;  %v3422_v27 = vmul.f32 %v8254_v35, %v3403_v18  ;;  %v3474_v18 = vld [vmem:[#allocation11 + $0xb8] sm:$0xff]  ;;  %v5931_v42 = vcombine.high %v3469_v53, %v3473_v10  ;;  %v3453_v23 = vld [vmem:[#allocation11 + $0x10] sm:$0xff] }
 0xd6c   : > { %v3442_v21 = vadd.f32 %v8263_v15, %v3423_v31  ;;  %v3441_v30 = vadd.f32 %v8260_v14, %v3422_v27  ;;  %v5933_v31 = vcombine.high %v3470_v9, %v3474_v18  ;;  %v3461_v27 = vld [vmem:[#allocation11 + $0x50] sm:$0xff] }
 0xd6d   : > { %v5923_v24 = vcombine.high %v3461_v27, %v3465_v28  ;;  %v5922_v57 = vcombine.low %v3461_v27, %v3465_v28  ;;  %v3554_v27 = vld [vmem:[#allocation11 + $0x338] sm:$0xff] }
 0xd6e   : > { %v8275_v5 = vpack.c.bf16 %v3442_v21, %v3440_v62  ;;  %v8277_v46 = vpack.c.bf16 %v3441_v30, %v3439_v4  ;;  %v3462_v62 = vld [vmem:[#allocation11 + $0x58] sm:$0xff]  ;;  %v5930_v4 = vcombine.low %v3469_v53, %v3473_v10  ;;  %v5932_v30 = vcombine.low %v3470_v9, %v3474_v18 }
 0xd6f   : > { %v3466_v21 = vld [vmem:[#allocation11 + $0x78] sm:$0xff] }
 0xd70   : > { %4293 = vmatprep.mubr.bf16.mxu0 %v8275_v5  ;;  %4346 = vmatprep.mubr.bf16.mxu1 %v8275_v5  ;;  %v5925_v59 = vcombine.high %v3462_v62, %v3466_v21  ;;  %v5924_v33 = vcombine.low %v3462_v62, %v3466_v21  ;;  %v3562_v53 = vld [vmem:[#allocation11 + $0x378] sm:$0xff] }
 0xd71   : > { %4294 = vmatmul.mubr.bf16.vlgmr.msra.gmra.mxu0 %v8277_v46  ;;  %4347 = vmatmul.mubr.bf16.vlgmr.msra.gmra.mxu1 %v8277_v46 }
 0xd72   : > { %4368 = vmatpush1.bf16.msra.mxu0 %v5970_v29  ;;  %4421 = vmatpush1.bf16.msra.mxu1 %v5972_v6  ;;  %v3481_v29 = vld [vmem:[#allocation11 + $0xf0] sm:$0xff]  ;;  %v3482_v6 = vld [vmem:[#allocation11 + $0xf8] sm:$0xff] }
 0xd73   : > { %4369 = vmatprep.subr.bf16.mxu0 %v5963_v49  ;;  %4422 = vmatprep.subr.bf16.mxu1 %v5965_v2  ;;  %v5939_v43 = vcombine.high %v3477_v38, %v3481_v29  ;;  %v5941_v13 = vcombine.high %v3478_v26, %v3482_v6  ;;  %v5938_v20 = vcombine.low %v3477_v38, %v3481_v29  ;;  %v3457_v49 = vld [vmem:[#allocation11 + $0x30] sm:$0xff]  ;;  %v3454_v2 = vld [vmem:[#allocation11 + $0x18] sm:$0xff] }
 0xd74   : > { %v5940_v12 = vcombine.low %v3478_v26, %v3482_v6  ;;  %v5915_v8 = vcombine.high %v3453_v23, %v3457_v49  ;;  %v5914_v50 = vcombine.low %v3453_v23, %v3457_v49  ;;  %v5916_v45 = vcombine.low %v3454_v2, %v3458_v7  ;;  %v3570_v38 = vld [vmem:[#allocation11 + $0x3b8] sm:$0xff] }
 0xd75   : > { %v3546_v23 = vld [vmem:[#allocation11 + $0x2f8] sm:$0xff] }
 0xd76   : > { %4370 = vmatpush1.bf16.msra.mxu0 %v5962_v16  ;;  %4423 = vmatpush1.bf16.msra.mxu1 %v5964_v32  ;;  %v5917_v16 = vcombine.high %v3454_v2, %v3458_v7  ;;  %v3573_v32 = vld [vmem:[#allocation11 + $0x3d0] sm:$0xff] }
 0xd77   : > { %4371 = vmatprep.subr.bf16.mxu0 %v5955_v54  ;;  %4424 = vmatprep.subr.bf16.mxu1 %v5957_v39  ;;  %v3577_v54 = vld [vmem:[#allocation11 + $0x3f0] sm:$0xff]  ;;  %v3574_v39 = vld [vmem:[#allocation11 + $0x3d8] sm:$0xff] }
 0xd78   : > { %v6035_v3 = vcombine.high %v3573_v32, %v3577_v54  ;;  %v6034_v29 = vcombine.low %v3573_v32, %v3577_v54  ;;  %v6036_v26 = vcombine.low %v3574_v39, %v3578_v25  ;;  %v3538_v32 = vld [vmem:[#allocation11 + $0x2b8] sm:$0xff] }
 0xd7a   : > { %4372 = vmatpush1.bf16.msra.mxu0 %v5954_v55  ;;  %4425 = vmatpush1.bf16.msra.mxu1 %v5956_v48  ;;  %v6037_v55 = vcombine.high %v3574_v39, %v3578_v25  ;;  %v3565_v48 = vld [vmem:[#allocation11 + $0x390] sm:$0xff] }
 0xd7b   : > { %4373 = vmatprep.subr.bf16.mxu0 %v5947_v47  ;;  %4426 = vmatprep.subr.bf16.mxu1 %v5949_v52  ;;  %v3569_v47 = vld [vmem:[#allocation11 + $0x3b0] sm:$0xff]  ;;  %v3566_v52 = vld [vmem:[#allocation11 + $0x398] sm:$0xff] }
 0xd7c   : > { %v6027_v6 = vcombine.high %v3565_v48, %v3569_v47  ;;  %v6026_v10 = vcombine.low %v3565_v48, %v3569_v47  ;;  %v6028_v9 = vcombine.low %v3566_v52, %v3570_v38  ;;  %v3529_v48 = vld [vmem:[#allocation11 + $0x270] sm:$0xff]  ;;  %v3526_v47 = vld [vmem:[#allocation11 + $0x258] sm:$0xff] }
 0xd7e   : > { %4374 = vmatpush1.bf16.msra.mxu0 %v5946_v22  ;;  %4427 = vmatpush1.bf16.msra.mxu1 %v5948_v0  ;;  %v6029_v22 = vcombine.high %v3566_v52, %v3570_v38  ;;  %v3557_v0 = vld [vmem:[#allocation11 + $0x350] sm:$0xff]  ;;  %v3530_v52 = vld [vmem:[#allocation11 + $0x278] sm:$0xff] }
 0xd7f   : > { %4375 = vmatprep.subr.bf16.mxu0 %v5939_v43  ;;  %4428 = vmatprep.subr.bf16.mxu1 %v5941_v13  ;;  %v3561_v43 = vld [vmem:[#allocation11 + $0x370] sm:$0xff]  ;;  %v3558_v13 = vld [vmem:[#allocation11 + $0x358] sm:$0xff] }
 0xd80   : > { %v6019_v18 = vcombine.high %v3557_v0, %v3561_v43  ;;  %v6018_v28 = vcombine.low %v3557_v0, %v3561_v43  ;;  %v6020_v62 = vcombine.low %v3558_v13, %v3562_v53  ;;  %v5989_v43 = vcombine.high %v3526_v47, %v3530_v52 }
 0xd82   : > { %4376 = vmatpush1.bf16.msra.mxu0 %v5938_v20  ;;  %4429 = vmatpush1.bf16.msra.mxu1 %v5940_v12  ;;  %v6021_v20 = vcombine.high %v3558_v13, %v3562_v53  ;;  %v3549_v12 = vld [vmem:[#allocation11 + $0x310] sm:$0xff] }
 0xd83   : > { %4377 = vmatprep.subr.bf16.mxu0 %v5931_v42  ;;  %4430 = vmatprep.subr.bf16.mxu1 %v5933_v31  ;;  %v3553_v42 = vld [vmem:[#allocation11 + $0x330] sm:$0xff]  ;;  %v3550_v31 = vld [vmem:[#allocation11 + $0x318] sm:$0xff] }
 0xd84   : > { %v6011_v21 = vcombine.high %v3549_v12, %v3553_v42  ;;  %v6010_v49 = vcombine.low %v3549_v12, %v3553_v42  ;;  %v6012_v2 = vcombine.low %v3550_v31, %v3554_v27  ;;  %v3517_v13 = vld [vmem:[#allocation11 + $0x210] sm:$0xff]  ;;  %v5988_v12 = vcombine.low %v3526_v47, %v3530_v52 }
 0xd85   : > { %v3521_v53 = vld [vmem:[#allocation11 + $0x230] sm:$0xff] }
 0xd86   : > { %4378 = vmatpush1.bf16.msra.mxu0 %v5930_v4  ;;  %4431 = vmatpush1.bf16.msra.mxu1 %v5932_v30  ;;  %v6013_v4 = vcombine.high %v3550_v31, %v3554_v27  ;;  %v3541_v30 = vld [vmem:[#allocation11 + $0x2d0] sm:$0xff]  ;;  %v5979_v42 = vcombine.high %v3517_v13, %v3521_v53  ;;  %v5978_v27 = vcombine.low %v3517_v13, %v3521_v53 }
 0xd87   : > { %4379 = vmatprep.subr.bf16.mxu0 %v5923_v24  ;;  %4432 = vmatprep.subr.bf16.mxu1 %v5925_v59  ;;  %v3545_v24 = vld [vmem:[#allocation11 + $0x2f0] sm:$0xff]  ;;  %v3542_v59 = vld [vmem:[#allocation11 + $0x2d8] sm:$0xff] }
 0xd88   : > { %v6003_v7 = vcombine.high %v3541_v30, %v3545_v24  ;;  %v6002_v39 = vcombine.low %v3541_v30, %v3545_v24  ;;  %v6004_v25 = vcombine.low %v3542_v59, %v3546_v23  ;;  %v6785_v47 = vld [vmem:[#allocation13 + $0x134] ss:$8 sps:$4 sm:$0xff]   ;;  %v6780_v52 = vld [vmem:[#allocation13 + $0x30] ss:$8 sps:$4 sm:$0xff]  }
 0xd89   : > { %v6792_v13 = vld [vmem:[#allocation13 + $0x10] ss:$8 sps:$4 sm:$0xff]  }
 0xd8a   : > { %4380 = vmatpush1.bf16.msra.mxu0 %v5922_v57  ;;  %4433 = vmatpush1.bf16.msra.mxu1 %v5924_v33  ;;  %v6005_v57 = vcombine.high %v3542_v59, %v3546_v23  ;;  %v3533_v33 = vld [vmem:[#allocation11 + $0x290] sm:$0xff] }
 0xd8b   : > { %4381 = vmatprep.subr.bf16.mxu0 %v5915_v8  ;;  %4434 = vmatprep.subr.bf16.mxu1 %v5917_v16  ;;  %v3537_v8 = vld [vmem:[#allocation11 + $0x2b0] sm:$0xff]  ;;  %v3534_v16 = vld [vmem:[#allocation11 + $0x298] sm:$0xff] }
 0xd8c   : > { %v6795_v53 = vld [vmem:[#allocation13 + $0x110] ss:$8 sps:$4 sm:$0xff]  }
 0xd8e   : > { %4382 = vmatpush1.bf16.msra.mxu0 %v5914_v50  ;;  %4435 = vmatpush1.bf16.msra.mxu1 %v5916_v45  ;;  %v5995_v45 = vcombine.high %v3533_v33, %v3537_v8 }
 0xd8f   : > { %4383 = vmatprep.subr.bf16.mxu0 %v6035_v3  ;;  %4436 = vmatprep.subr.bf16.mxu1 %v6037_v55  ;;  %v5997_v3 = vcombine.high %v3534_v16, %v3538_v32  ;;  %v3525_v55 = vld [vmem:[#allocation11 + $0x250] sm:$0xff] }
 0xd90   : > { %v5987_v0 = vcombine.high %v3525_v55, %v3529_v48 }
 0xd92   : > { %4384 = vmatpush2.bf16.msra.mxu0 %v6034_v29  ;;  %4437 = vmatpush2.bf16.msra.mxu1 %v6036_v26  ;;  %v5994_v26 = vcombine.low %v3533_v33, %v3537_v8 }
 0xd93   : > { %4385 = vmatprep.subr.bf16.mxu0 %v6027_v6  ;;  %4438 = vmatprep.subr.bf16.mxu1 %v6029_v22  ;;  %v5996_v6 = vcombine.low %v3534_v16, %v3538_v32 }
 0xd96   : > { %4386 = vmatpush2.bf16.msra.mxu0 %v6026_v10  ;;  %4439 = vmatpush2.bf16.msra.mxu1 %v6028_v9  ;;  %v3518_v10 = vld [vmem:[#allocation11 + $0x218] sm:$0xff] }
 0xd97   : > { %4387 = vmatprep.subr.bf16.mxu0 %v6019_v18  ;;  %4440 = vmatprep.subr.bf16.mxu1 %v6021_v20  ;;  %v3522_v9 = vld [vmem:[#allocation11 + $0x238] sm:$0xff]  ;;  %v5986_v20 = vcombine.low %v3525_v55, %v3529_v48  ;;  %v6777_v55 = vld [vmem:[#allocation13 + $0x140] ss:$8 sps:$4 sm:$0xff]  }
 0xd98   : > { %v5981_v31 = vcombine.high %v3518_v10, %v3522_v9  ;;  %v6782_v48 = vld [vmem:[#allocation13 + $0x34] ss:$8 sps:$4 sm:$0xff]  }
 0xd9a   : > { %4388 = vmatpush2.bf16.msra.mxu0 %v6018_v28  ;;  %4441 = vmatpush2.bf16.msra.mxu1 %v6020_v62  ;;  %v5980_v28 = vcombine.low %v3518_v10, %v3522_v9  ;;  %v6758_v62 = vld [vmem:[#allocation13 + $0x74] ss:$8 sps:$4 sm:$0xff]   ;;  %v6800_v10 = vld [vmem:[#allocation13 + $0x4] ss:$8 sps:$4 sm:$0xff]  }
 0xd9b   : > { %4389 = vmatprep.subr.bf16.mxu0 %v6011_v21  ;;  %4442 = vmatprep.subr.bf16.mxu1 %v6013_v4  ;;  %v6761_v21 = vld [vmem:[#allocation13 + $0x174] ss:$8 sps:$4 sm:$0xff]   ;;  %v6803_v9 = vld [vmem:[#allocation13 + $0x104] ss:$8 sps:$4 sm:$0xff]  }
 0xd9e   : > { %v3385_v54 = vpop.xlane.xlu0 %3384  ;;  %4390 = vmatpush2.bf16.msra.mxu0 %v6010_v49  ;;  %4443 = vmatpush2.bf16.msra.mxu1 %v6012_v2 }
 0xd9f   : > { %v3391_v50 = vmul.f32 0.00390625, %v3385_v54  ;;  %4391 = vmatprep.subr.bf16.mxu0 %v6003_v7  ;;  %4444 = vmatprep.subr.bf16.mxu1 %v6005_v57  ;;  %v6767_v54 = vld [vmem:[#allocation13 + $0x164] ss:$8 sps:$4 sm:$0xff]  }
 0xda1   : > { %v3395_v38 = vadd.f32 1e-05, %v3391_v50  ;;  %v6771_v50 = vld [vmem:[#allocation13 + $0x150] ss:$8 sps:$4 sm:$0xff]  }
 0xda2   : > { %v3388_v29 = vpop.xlane.xlu1 %3387  ;;  %4392 = vmatpush2.bf16.msra.mxu0 %v6002_v39  ;;  %4445 = vmatpush2.bf16.msra.mxu1 %v6004_v25  ;;  %v6770_v39 = vld [vmem:[#allocation13 + $0x54] ss:$8 sps:$4 sm:$0xff]  }
 0xda3   : > { %7056 = vrsqrt.f32 %v3395_v38  ;;  %v3392_v22 = vmul.f32 0.00390625, %v3388_v29  ;;  %4393 = vmatprep.subr.bf16.mxu0 %v5995_v45  ;;  %4446 = vmatprep.subr.bf16.mxu1 %v5997_v3  ;;  %v6773_v25 = vld [vmem:[#allocation13 + $0x154] ss:$8 sps:$4 sm:$0xff]   ;;  %v6776_v45 = vld [vmem:[#allocation13 + $0x44] ss:$8 sps:$4 sm:$0xff]  }
 0xda4   : > { %v6779_v3 = vld [vmem:[#allocation13 + $0x144] ss:$8 sps:$4 sm:$0xff]   ;;  %v6783_v38 = vld [vmem:[#allocation13 + $0x130] ss:$8 sps:$4 sm:$0xff]  }
 0xda5   : > { %v3396_v18 = vadd.f32 1e-05, %v3392_v22  ;;  %v6788_v29 = vld [vmem:[#allocation13 + $0x24] ss:$8 sps:$4 sm:$0xff]   ;;  %v6789_v22 = vld [vmem:[#allocation13 + $0x120] ss:$8 sps:$4 sm:$0xff]  }
 0xda6   : > { %4394 = vmatpush2.bf16.msra.mxu0 %v5994_v26  ;;  %4447 = vmatpush2.bf16.msra.mxu1 %v5996_v6  ;;  %v6791_v26 = vld [vmem:[#allocation13 + $0x124] ss:$8 sps:$4 sm:$0xff]   ;;  %v6786_v6 = vld [vmem:[#allocation13 + $0x20] ss:$8 sps:$4 sm:$0xff]  }
 0xda7   : > { %7058 = vrsqrt.f32 %v3396_v18  ;;  %4395 = vmatprep.subr.bf16.mxu0 %v5987_v0  ;;  %4448 = vmatprep.subr.bf16.mxu1 %v5989_v43  ;;  %v6794_v0 = vld [vmem:[#allocation13 + $0x14] ss:$8 sps:$4 sm:$0xff]   ;;  %v6798_v18 = vld [vmem:[#allocation13] ss:$8 sps:$4 sm:$0xff]  }
 0xda8   : > { %v6797_v43 = vld [vmem:[#allocation13 + $0x114] ss:$8 sps:$4 sm:$0xff]  }
 0xdaa   : > { %4396 = vmatpush2.bf16.msra.mxu0 %v5986_v20  ;;  %4449 = vmatpush2.bf16.msra.mxu1 %v5988_v12  ;;  %v6801_v20 = vld [vmem:[#allocation13 + $0x100] ss:$8 sps:$4 sm:$0xff]   ;;  %v6806_v12 = vld [vmem:[#allocation13 + $0xf4] ss:$8 sps:$4 sm:$0xff]  }
 0xdab   : > { %4397 = vmatprep.subr.bf16.mxu0 %v5979_v42  ;;  %4450 = vmatprep.subr.bf16.mxu1 %v5981_v31  ;;  %v6809_v42 = vld [vmem:[#allocation13 + $0x1f4] ss:$8 sps:$4 sm:$0xff]   ;;  %v6804_v31 = vld [vmem:[#allocation13 + $0xf0] ss:$8 sps:$4 sm:$0xff]  }
 0xdae   : > { %4398 = vmatpush2.bf16.msra.mxu0 %v5978_v27  ;;  %4451 = vmatpush2.bf16.msra.mxu1 %v5980_v28  ;;  %v6807_v27 = vld [vmem:[#allocation13 + $0x1f0] ss:$8 sps:$4 sm:$0xff]   ;;  %v6812_v28 = vld [vmem:[#allocation13 + $0xe4] ss:$8 sps:$4 sm:$0xff]  }
 0xdaf   : > { %5301 = vmatprep.subr.bf16.mxu0 %v6758_v62  ;;  %5354 = vmatprep.subr.bf16.mxu1 %v6761_v21  ;;  %v6815_v62 = vld [vmem:[#allocation13 + $0x1e4] ss:$8 sps:$4 sm:$0xff]   ;;  %v6810_v21 = vld [vmem:[#allocation13 + $0xe0] ss:$8 sps:$4 sm:$0xff]  }
 0xdb0   : > { %v7057_v4 = vpop.eup %7056 }
 0xdb1   : > { %v3406_v30 = vmul.f32 %v7057_v4, %v8232_v56  ;;  %v3405_v24 = vmul.f32 %v7057_v4, %v8229_v19  ;;  %v6813_v4 = vld [vmem:[#allocation13 + $0x1e0] ss:$8 sps:$4 sm:$0xff]  }
 0xdb3   : > { %v3425_v49 = vmul.f32 %v8257_v37, %v3406_v30  ;;  %v3424_v7 = vmul.f32 %v8254_v35, %v3405_v24  ;;  %v6818_v30 = vld [vmem:[#allocation13 + $0xd4] ss:$8 sps:$4 sm:$0xff]  }
 0xdb4   : > { %v7059_v59 = vpop.eup %7058  ;;  %v6821_v24 = vld [vmem:[#allocation13 + $0x1d4] ss:$8 sps:$4 sm:$0xff]  }
 0xdb5   : > { %v3408_v23 = vmul.f32 %v7059_v59, %v8242_v44  ;;  %v3407_v2 = vmul.f32 %v7059_v59, %v8239_v17  ;;  %v3444_v8 = vadd.f32 %v8263_v15, %v3425_v49  ;;  %v3443_v56 = vadd.f32 %v8260_v14, %v3424_v7  ;;  %v6756_v17 = vld [vmem:[#allocation13 + $0x70] ss:$8 sps:$4 sm:$0xff]   ;;  %v6824_v49 = vld [vmem:[#allocation13 + $0xc4] ss:$8 sps:$4 sm:$0xff]   ;;  %v6822_v7 = vld [vmem:[#allocation13 + $0xc0] ss:$8 sps:$4 sm:$0xff]  }
 0xdb6   : > { %v6816_v59 = vld [vmem:[#allocation13 + $0xd0] ss:$8 sps:$4 sm:$0xff]  }
 0xdb7   : > { %v3427_v57 = vmul.f32 %v8257_v37, %v3408_v23  ;;  %v3426_v33 = vmul.f32 %v8254_v35, %v3407_v2  ;;  %v6759_v35 = vld [vmem:[#allocation13 + $0x170] ss:$8 sps:$4 sm:$0xff]   ;;  %v6764_v37 = vld [vmem:[#allocation13 + $0x64] ss:$8 sps:$4 sm:$0xff]  }
 0xdb8   : > { %v6819_v23 = vld [vmem:[#allocation13 + $0x1d0] ss:$8 sps:$4 sm:$0xff]   ;;  %v6827_v2 = vld [vmem:[#allocation13 + $0x1c4] ss:$8 sps:$4 sm:$0xff]  }
 0xdb9   : > { %v3446_v16 = vadd.f32 %v8263_v15, %v3427_v57  ;;  %v3445_v19 = vadd.f32 %v8260_v14, %v3426_v33  ;;  %v6762_v14 = vld [vmem:[#allocation13 + $0x60] ss:$8 sps:$4 sm:$0xff]   ;;  %v6830_v33 = vld [vmem:[#allocation13 + $0xb4] ss:$8 sps:$4 sm:$0xff]  }
 0xdba   : > { %v6765_v15 = vld [vmem:[#allocation13 + $0x160] ss:$8 sps:$4 sm:$0xff]  }
 0xdbb   : > { %v3450_v32 = vpack.c.bf16 %v3446_v16, %v3444_v8  ;;  %v3449_v44 = vpack.c.bf16 %v3445_v19, %v3443_v56  ;;  %v6825_v57 = vld [vmem:[#allocation13 + $0x1c0] ss:$8 sps:$4 sm:$0xff]   ;;  %v6833_v8 = vld [vmem:[#allocation13 + $0x1b4] ss:$8 sps:$4 sm:$0xff]   ;;  %v6828_v16 = vld [vmem:[#allocation13 + $0xb0] ss:$8 sps:$4 sm:$0xff]  }
 0xdbc   : > { %v6831_v56 = vld [vmem:[#allocation13 + $0x1b0] ss:$8 sps:$4 sm:$0xff]   ;;  %v6836_v19 = vld [vmem:[#allocation13 + $0xa4] ss:$8 sps:$4 sm:$0xff]  }
 0xdbd   : > { %4303 = vmatprep.mubr.bf16.mxu0 %v3450_v32  ;;  %4356 = vmatprep.mubr.bf16.mxu1 %v3450_v32 }
 0xdbe   : > { %4304 = vmatmul.mubr.bf16.gmra.mxu0 %v3449_v44  ;;  %4357 = vmatmul.mubr.bf16.gmra.mxu1 %v3449_v44 }
 0xdbf   : > { %4399 = vmatprep.mubr.bf16.mxu0 %v8275_v5  ;;  %4452 = vmatprep.mubr.bf16.mxu1 %v8275_v5  ;;  %v6768_v5 = vld [vmem:[#allocation13 + $0x50] ss:$8 sps:$4 sm:$0xff]  }
 0xdc6   : > { %4400 = vmatmul.mubr.bf16.vlgmr.msra.gmra.mxu0 %v8277_v46  ;;  %4453 = vmatmul.mubr.bf16.vlgmr.msra.gmra.mxu1 %v8277_v46  ;;  %v6774_v46 = vld [vmem:[#allocation13 + $0x40] ss:$8 sps:$4 sm:$0xff]  }
 0xdc7   : > { %4409 = vmatprep.mubr.bf16.mxu0 %v3450_v32  ;;  %4462 = vmatprep.mubr.bf16.mxu1 %v3450_v32  ;;  %v6839_v32 = vld [vmem:[#allocation13 + $0x1a4] ss:$8 sps:$4 sm:$0xff]  }
 0xdc8   : > { %5302 = vmatpush1.bf16.msra.mxu0 %v6756_v17  ;;  %5355 = vmatpush1.bf16.msra.mxu1 %v6759_v35  ;;  %v6837_v17 = vld [vmem:[#allocation13 + $0x1a0] ss:$8 sps:$4 sm:$0xff]   ;;  %v6842_v35 = vld [vmem:[#allocation13 + $0x94] ss:$8 sps:$4 sm:$0xff]  }
 0xdc9   : > { %5303 = vmatprep.subr.bf16.mxu0 %v6764_v37  ;;  %5356 = vmatprep.subr.bf16.mxu1 %v6767_v54  ;;  %v6845_v37 = vld [vmem:[#allocation13 + $0x194] ss:$8 sps:$4 sm:$0xff]   ;;  %v6840_v54 = vld [vmem:[#allocation13 + $0x90] ss:$8 sps:$4 sm:$0xff]  }
 0xdcc   : > { %5304 = vmatpush1.bf16.msra.mxu0 %v6762_v14  ;;  %5357 = vmatpush1.bf16.msra.mxu1 %v6765_v15  ;;  %v6843_v14 = vld [vmem:[#allocation13 + $0x190] ss:$8 sps:$4 sm:$0xff]   ;;  %v6848_v15 = vld [vmem:[#allocation13 + $0x84] ss:$8 sps:$4 sm:$0xff]  }
 0xdcd   : > { %5305 = vmatprep.subr.bf16.mxu0 %v6770_v39  ;;  %5358 = vmatprep.subr.bf16.mxu1 %v6773_v25  ;;  %v6851_v39 = vld [vmem:[#allocation13 + $0x184] ss:$8 sps:$4 sm:$0xff]   ;;  %v6846_v25 = vld [vmem:[#allocation13 + $0x80] ss:$8 sps:$4 sm:$0xff]  }
 0xdce   : > { %4410 = vmatmul.mubr.bf16.gmra.mxu0 %v3449_v44  ;;  %4463 = vmatmul.mubr.bf16.gmra.mxu1 %v3449_v44  ;;  %v6834_v44 = vld [vmem:[#allocation13 + $0xa0] ss:$8 sps:$4 sm:$0xff]  }
 0xdd0   : > { %5306 = vmatpush1.bf16.msra.mxu0 %v6768_v5  ;;  %5359 = vmatpush1.bf16.msra.mxu1 %v6771_v50  ;;  %v6849_v5 = vld [vmem:[#allocation13 + $0x180] ss:$8 sps:$4 sm:$0xff]   ;;  %v6854_v50 = vld [vmem:[#allocation13 + $0x274] ss:$8 sps:$4 sm:$0xff]  }
 0xdd1   : > { %5307 = vmatprep.subr.bf16.mxu0 %v6776_v45  ;;  %5360 = vmatprep.subr.bf16.mxu1 %v6779_v3  ;;  %v6857_v45 = vld [vmem:[#allocation13 + $0x374] ss:$8 sps:$4 sm:$0xff]   ;;  %v3595_v3 = vsub.s32 3, %v7700_v58 }
 0xdd4   : > { %5308 = vmatpush1.bf16.msra.mxu0 %v6774_v46  ;;  %5361 = vmatpush1.bf16.msra.mxu1 %v6777_v55  ;;  %v3591_v46 = vsub.s32 2, %v7700_v58  ;;  %v8310_v55 = vld [vmem:[%s8435_s10] sm:$0xff] }
 0xdd5   : > { %5309 = vmatprep.subr.bf16.mxu0 %v6782_v48  ;;  %5362 = vmatprep.subr.bf16.mxu1 %v6785_v47 }
 0xdd8   : > { %5310 = vmatpush1.bf16.msra.mxu0 %v6780_v52  ;;  %5363 = vmatpush1.bf16.msra.mxu1 %v6783_v38  ;;  %v8314_v52 = vrot.slane %v8310_v55, %v7703_v60  ;;  %v8317_v38 = vrot.slane %v8310_v55, %v3595_v3  ;;  %v6884_v3 = vld [vmem:[#allocation13 + $0x224] ss:$8 sps:$4 sm:$0xff]  }
 0xdd9   : > { %5311 = vmatprep.subr.bf16.mxu0 %v6788_v29  ;;  %5364 = vmatprep.subr.bf16.mxu1 %v6791_v26  ;;  %v8321_v29 = vrot.slane %v8310_v55, %v7706_v61  ;;  %v8324_v26 = vrot.slane %v8310_v55, %v3591_v46  ;;  %v6887_v46 = vld [vmem:[#allocation13 + $0x324] ss:$8 sps:$4 sm:$0xff]  }
 0xddc   : > { %5312 = vmatpush1.bf16.msra.mxu0 %v6786_v6  ;;  %5365 = vmatpush1.bf16.msra.mxu1 %v6789_v22 }
 0xddd   : > { %5313 = vmatprep.subr.bf16.mxu0 %v6794_v0  ;;  %5366 = vmatprep.subr.bf16.mxu1 %v6797_v43 }
 0xde0   : > { %5314 = vmatpush1.bf16.msra.mxu0 %v6792_v13  ;;  %5367 = vmatpush1.bf16.msra.mxu1 %v6795_v53 }
 0xde1   : > { %5315 = vmatprep.subr.bf16.mxu0 %v6800_v10  ;;  %5368 = vmatprep.subr.bf16.mxu1 %v6803_v9 }
 0xde4   : > { %5316 = vmatpush1.bf16.msra.mxu0 %v6798_v18  ;;  %5369 = vmatpush1.bf16.msra.mxu1 %v6801_v20 }
 0xde5   : > { %5317 = vmatprep.subr.bf16.mxu0 %v6806_v12  ;;  %5370 = vmatprep.subr.bf16.mxu1 %v6809_v42 }
 0xde8   : > { %5318 = vmatpush2.bf16.msra.mxu0 %v6804_v31  ;;  %5371 = vmatpush2.bf16.msra.mxu1 %v6807_v27 }
 0xde9   : > { %5319 = vmatprep.subr.bf16.mxu0 %v6812_v28  ;;  %5372 = vmatprep.subr.bf16.mxu1 %v6815_v62 }
 0xdec   : > { %5320 = vmatpush2.bf16.msra.mxu0 %v6810_v21  ;;  %5373 = vmatpush2.bf16.msra.mxu1 %v6813_v4 }
 0xded   : > { %5321 = vmatprep.subr.bf16.mxu0 %v6818_v30  ;;  %5374 = vmatprep.subr.bf16.mxu1 %v6821_v24 }
 0xdf0   : > { %5322 = vmatpush2.bf16.msra.mxu0 %v6816_v59  ;;  %5375 = vmatpush2.bf16.msra.mxu1 %v6819_v23 }
 0xdf1   : > { %5323 = vmatprep.subr.bf16.mxu0 %v6824_v49  ;;  %5376 = vmatprep.subr.bf16.mxu1 %v6827_v2 }
 0xdf4   : > { %5324 = vmatpush2.bf16.msra.mxu0 %v6822_v7  ;;  %5377 = vmatpush2.bf16.msra.mxu1 %v6825_v57  ;;  %v6852_v7 = vld [vmem:[#allocation13 + $0x270] ss:$8 sps:$4 sm:$0xff]  }
 0xdf5   : > { %5325 = vmatprep.subr.bf16.mxu0 %v6830_v33  ;;  %5378 = vmatprep.subr.bf16.mxu1 %v6833_v8  ;;  %v6855_v57 = vld [vmem:[#allocation13 + $0x370] ss:$8 sps:$4 sm:$0xff]  }
 0xdf8   : > { %5326 = vmatpush2.bf16.msra.mxu0 %v6828_v16  ;;  %5379 = vmatpush2.bf16.msra.mxu1 %v6831_v56  ;;  %v6860_v16 = vld [vmem:[#allocation13 + $0x264] ss:$8 sps:$4 sm:$0xff]  }
 0xdf9   : > { %5327 = vmatprep.subr.bf16.mxu0 %v6836_v19  ;;  %5380 = vmatprep.subr.bf16.mxu1 %v6839_v32  ;;  %v6863_v56 = vld [vmem:[#allocation13 + $0x364] ss:$8 sps:$4 sm:$0xff]   ;;  %v6858_v19 = vld [vmem:[#allocation13 + $0x260] ss:$8 sps:$4 sm:$0xff]  }
 0xdfa   : > { %v6861_v32 = vld [vmem:[#allocation13 + $0x360] ss:$8 sps:$4 sm:$0xff]  }
 0xdfc   : > { %5328 = vmatpush2.bf16.msra.mxu0 %v6834_v44  ;;  %5381 = vmatpush2.bf16.msra.mxu1 %v6837_v17  ;;  %v6866_v44 = vld [vmem:[#allocation13 + $0x254] ss:$8 sps:$4 sm:$0xff]  }
 0xdfd   : > { %5329 = vmatprep.subr.bf16.mxu0 %v6842_v35  ;;  %5382 = vmatprep.subr.bf16.mxu1 %v6845_v37  ;;  %v6869_v17 = vld [vmem:[#allocation13 + $0x354] ss:$8 sps:$4 sm:$0xff]   ;;  %v6864_v35 = vld [vmem:[#allocation13 + $0x250] ss:$8 sps:$4 sm:$0xff]  }
 0xdfe   : > { %v6867_v37 = vld [vmem:[#allocation13 + $0x350] ss:$8 sps:$4 sm:$0xff]  }
 0xe00   : > { %5330 = vmatpush2.bf16.msra.mxu0 %v6840_v54  ;;  %5383 = vmatpush2.bf16.msra.mxu1 %v6843_v14  ;;  %v6872_v54 = vld [vmem:[#allocation13 + $0x244] ss:$8 sps:$4 sm:$0xff]  }
 0xe01   : > { %5331 = vmatprep.subr.bf16.mxu0 %v6848_v15  ;;  %5384 = vmatprep.subr.bf16.mxu1 %v6851_v39  ;;  %v6875_v14 = vld [vmem:[#allocation13 + $0x344] ss:$8 sps:$4 sm:$0xff]   ;;  %v6870_v15 = vld [vmem:[#allocation13 + $0x240] ss:$8 sps:$4 sm:$0xff]  }
 0xe02   : > { %v6873_v39 = vld [vmem:[#allocation13 + $0x340] ss:$8 sps:$4 sm:$0xff]  }
 0xe04   : > { %5332 = vmatpush2.bf16.msra.mxu0 %v6846_v25  ;;  %5385 = vmatpush2.bf16.msra.mxu1 %v6849_v5  ;;  %v6878_v25 = vld [vmem:[#allocation13 + $0x234] ss:$8 sps:$4 sm:$0xff]  }
 0xe05   : > { %5407 = vmatprep.subr.bf16.mxu0 %v6854_v50  ;;  %5460 = vmatprep.subr.bf16.mxu1 %v6857_v45  ;;  %v6881_v5 = vld [vmem:[#allocation13 + $0x334] ss:$8 sps:$4 sm:$0xff]   ;;  %v6876_v50 = vld [vmem:[#allocation13 + $0x230] ss:$8 sps:$4 sm:$0xff]  }
 0xe06   : > { %v6879_v45 = vld [vmem:[#allocation13 + $0x330] ss:$8 sps:$4 sm:$0xff]  }
 0xe31   : > { %v4295_v48 = vpop.f32.mrf.mxu0  ;;  %v4348_v47 = vpop.f32.mrf.mxu1 }
 0xe32   : > { %v4296_v18 = vadd.f32 %v4295_v48, %v8321_v29  ;;  %v4349_v20 = vadd.f32 %v4348_v47, %v8324_v26  ;;  %v6882_v48 = vld [vmem:[#allocation13 + $0x220] ss:$8 sps:$4 sm:$0xff]  }
 0xe33   : > { %v4297_v6 = vpop.f32.mrf.mxu0  ;;  %v4350_v22 = vpop.f32.mrf.mxu1  ;;  %v6885_v47 = vld [vmem:[#allocation13 + $0x320] ss:$8 sps:$4 sm:$0xff]  }
 0xe34   : > { %v4298_v13 = vadd.f32 %v4297_v6, %v8314_v52  ;;  %v4351_v53 = vadd.f32 %v4350_v22, %v8317_v38  ;;  %v4473_v59 = vmax.f32 %v4296_v18, 0.0  ;;  %v4475_v23 = vmax.f32 %v4349_v20, 0.0  ;;  %v6890_v6 = vld [vmem:[#allocation13 + $0x214] ss:$8 sps:$4 sm:$0xff]  }
 0xe35   : > { %v4299_v0 = vpop.f32.mrf.mxu0  ;;  %v4352_v43 = vpop.f32.mrf.mxu1  ;;  %v6893_v22 = vld [vmem:[#allocation13 + $0x314] ss:$8 sps:$4 sm:$0xff]  }
 0xe36   : > { %v4300_v10 = vadd.f32 %v4299_v0, %v8321_v29  ;;  %v4353_v9 = vadd.f32 %v4352_v43, %v8324_v26  ;;  %v4474_v21 = vmax.f32 %v4298_v13, 0.0  ;;  %v4476_v4 = vmax.f32 %v4351_v53, 0.0  ;;  %v6888_v0 = vld [vmem:[#allocation13 + $0x210] ss:$8 sps:$4 sm:$0xff]   ;;  %v6896_v13 = vld [vmem:[#allocation13 + $0x204] ss:$8 sps:$4 sm:$0xff]  }
 0xe37   : > { %v4301_v12 = vpop.f32.mrf.mxu0  ;;  %v4354_v42 = vpop.f32.mrf.mxu1  ;;  %v6891_v43 = vld [vmem:[#allocation13 + $0x310] ss:$8 sps:$4 sm:$0xff]   ;;  %v6899_v53 = vld [vmem:[#allocation13 + $0x304] ss:$8 sps:$4 sm:$0xff]   ;;  %v6902_v18 = vld [vmem:[#allocation13 + $0x2f4] ss:$8 sps:$4 sm:$0xff]  }
 0xe38   : > { %v4302_v31 = vadd.f32 %v4301_v12, %v8314_v52  ;;  %v4355_v27 = vadd.f32 %v4354_v42, %v8317_v38  ;;  %v4481_v28 = vmax.f32 %v4300_v10, 0.0  ;;  %v4483_v62 = vmax.f32 %v4353_v9, 0.0  ;;  %v6894_v10 = vld [vmem:[#allocation13 + $0x200] ss:$8 sps:$4 sm:$0xff]   ;;  %v6905_v20 = vld [vmem:[#allocation13 + $0x3f4] ss:$8 sps:$4 sm:$0xff]  }
 0xe39   : > { %v6897_v9 = vld [vmem:[#allocation13 + $0x300] ss:$8 sps:$4 sm:$0xff]   ;;  %v6900_v12 = vld [vmem:[#allocation13 + $0x2f0] ss:$8 sps:$4 sm:$0xff]  }
 0xe3a   : > { %v4482_v30 = vmax.f32 %v4302_v31, 0.0  ;;  %v4484_v24 = vmax.f32 %v4355_v27, 0.0  ;;  %v4505_v33 = vpack.c.bf16 %v4481_v28, %v4473_v59  ;;  %v4507_v8 = vpack.c.bf16 %v4483_v62, %v4475_v23  ;;  %v6903_v42 = vld [vmem:[#allocation13 + $0x3f0] ss:$8 sps:$4 sm:$0xff]   ;;  %v6908_v31 = vld [vmem:[#allocation13 + $0x2e4] ss:$8 sps:$4 sm:$0xff]  }
 0xe3b   : > { %v6911_v27 = vld [vmem:[#allocation13 + $0x3e4] ss:$8 sps:$4 sm:$0xff]   ;;  %v6906_v28 = vld [vmem:[#allocation13 + $0x2e0] ss:$8 sps:$4 sm:$0xff]  }
 0xe3c   : > { %v4506_v49 = vpack.c.bf16 %v4482_v30, %v4474_v21  ;;  %v4508_v2 = vpack.c.bf16 %v4484_v24, %v4476_v4  ;;  %v6909_v62 = vld [vmem:[#allocation13 + $0x3e0] ss:$8 sps:$4 sm:$0xff]   ;;  %v6914_v21 = vld [vmem:[#allocation13 + $0x2d4] ss:$8 sps:$4 sm:$0xff]   ;;  %v6912_v30 = vld [vmem:[#allocation13 + $0x2d0] ss:$8 sps:$4 sm:$0xff]  }
 0xe3d   : > { %v6917_v4 = vld [vmem:[#allocation13 + $0x3d4] ss:$8 sps:$4 sm:$0xff]   ;;  %v6915_v24 = vld [vmem:[#allocation13 + $0x3d0] ss:$8 sps:$4 sm:$0xff]   ;;  %v6920_v59 = vld [vmem:[#allocation13 + $0x2c4] ss:$8 sps:$4 sm:$0xff]  }
 0xe3e   : > { %5333 = vmatprep.mubr.bf16.mxu0 %v4506_v49  ;;  %5386 = vmatprep.mubr.bf16.mxu1 %v4508_v2  ;;  %v6923_v23 = vld [vmem:[#allocation13 + $0x3c4] ss:$8 sps:$4 sm:$0xff]   ;;  %v6918_v49 = vld [vmem:[#allocation13 + $0x2c0] ss:$8 sps:$4 sm:$0xff]  }
 0xe3f   : > { %5334 = vmatmul.mubr.bf16.vlgmr.msra.gmra.mxu0 %v4505_v33  ;;  %5387 = vmatmul.mubr.bf16.vlgmr.msra.gmra.mxu1 %v4507_v8  ;;  %v6921_v2 = vld [vmem:[#allocation13 + $0x3c0] ss:$8 sps:$4 sm:$0xff]   ;;  %v6924_v33 = vld [vmem:[#allocation13 + $0x2b0] ss:$8 sps:$4 sm:$0xff]  }
 0xe40   : > { %5408 = vmatpush1.bf16.msra.mxu0 %v6852_v7  ;;  %5461 = vmatpush1.bf16.msra.mxu1 %v6855_v57  ;;  %v6926_v7 = vld [vmem:[#allocation13 + $0x2b4] ss:$8 sps:$4 sm:$0xff]   ;;  %v6927_v8 = vld [vmem:[#allocation13 + $0x3b0] ss:$8 sps:$4 sm:$0xff]  }
 0xe41   : > { %5409 = vmatprep.subr.bf16.mxu0 %v6860_v16  ;;  %5462 = vmatprep.subr.bf16.mxu1 %v6863_v56  ;;  %v6929_v57 = vld [vmem:[#allocation13 + $0x3b4] ss:$8 sps:$4 sm:$0xff]   ;;  %v6932_v16 = vld [vmem:[#allocation13 + $0x2a4] ss:$8 sps:$4 sm:$0xff]  }
 0xe42   : > { %v6935_v56 = vld [vmem:[#allocation13 + $0x3a4] ss:$8 sps:$4 sm:$0xff]  }
 0xe44   : > { %5410 = vmatpush1.bf16.msra.mxu0 %v6858_v19  ;;  %5463 = vmatpush1.bf16.msra.mxu1 %v6861_v32  ;;  %v6930_v19 = vld [vmem:[#allocation13 + $0x2a0] ss:$8 sps:$4 sm:$0xff]  }
 0xe45   : > { %5411 = vmatprep.subr.bf16.mxu0 %v6866_v44  ;;  %5464 = vmatprep.subr.bf16.mxu1 %v6869_v17  ;;  %v6933_v32 = vld [vmem:[#allocation13 + $0x3a0] ss:$8 sps:$4 sm:$0xff]   ;;  %v6938_v44 = vld [vmem:[#allocation13 + $0x294] ss:$8 sps:$4 sm:$0xff]  }
 0xe46   : > { %v6941_v17 = vld [vmem:[#allocation13 + $0x394] ss:$8 sps:$4 sm:$0xff]  }
 0xe48   : > { %5412 = vmatpush1.bf16.msra.mxu0 %v6864_v35  ;;  %5465 = vmatpush1.bf16.msra.mxu1 %v6867_v37  ;;  %v6936_v35 = vld [vmem:[#allocation13 + $0x290] ss:$8 sps:$4 sm:$0xff]  }
 0xe49   : > { %5413 = vmatprep.subr.bf16.mxu0 %v6872_v54  ;;  %5466 = vmatprep.subr.bf16.mxu1 %v6875_v14  ;;  %v6939_v37 = vld [vmem:[#allocation13 + $0x390] ss:$8 sps:$4 sm:$0xff]   ;;  %v6944_v54 = vld [vmem:[#allocation13 + $0x284] ss:$8 sps:$4 sm:$0xff]  }
 0xe4a   : > { %v6947_v14 = vld [vmem:[#allocation13 + $0x384] ss:$8 sps:$4 sm:$0xff]  }
 0xe4c   : > { %5414 = vmatpush1.bf16.msra.mxu0 %v6870_v15  ;;  %5467 = vmatpush1.bf16.msra.mxu1 %v6873_v39  ;;  %v6942_v15 = vld [vmem:[#allocation13 + $0x280] ss:$8 sps:$4 sm:$0xff]  }
 0xe4d   : > { %5415 = vmatprep.subr.bf16.mxu0 %v6878_v25  ;;  %5468 = vmatprep.subr.bf16.mxu1 %v6881_v5  ;;  %v6945_v39 = vld [vmem:[#allocation13 + $0x380] ss:$8 sps:$4 sm:$0xff]  }
 0xe50   : > { %5416 = vmatpush1.bf16.msra.mxu0 %v6876_v50  ;;  %5469 = vmatpush1.bf16.msra.mxu1 %v6879_v45 }
 0xe51   : > { %5417 = vmatprep.subr.bf16.mxu0 %v6884_v3  ;;  %5470 = vmatprep.subr.bf16.mxu1 %v6887_v46 }
 0xe54   : > { %5418 = vmatpush1.bf16.msra.mxu0 %v6882_v48  ;;  %5471 = vmatpush1.bf16.msra.mxu1 %v6885_v47  ;;  %v3603_v48 = vsub.s32 5, %v7700_v58  ;;  %v3611_v47 = vsub.s32 7, %v7700_v58 }
 0xe55   : > { %5419 = vmatprep.subr.bf16.mxu0 %v6890_v6  ;;  %5472 = vmatprep.subr.bf16.mxu1 %v6893_v22 }
 0xe58   : > { %5420 = vmatpush1.bf16.msra.mxu0 %v6888_v0  ;;  %5473 = vmatpush1.bf16.msra.mxu1 %v6891_v43 }
 0xe59   : > { %5421 = vmatprep.subr.bf16.mxu0 %v6896_v13  ;;  %5474 = vmatprep.subr.bf16.mxu1 %v6899_v53 }
 0xe5c   : > { %5422 = vmatpush1.bf16.msra.mxu0 %v6894_v10  ;;  %5475 = vmatpush1.bf16.msra.mxu1 %v6897_v9 }
 0xe5d   : > { %5423 = vmatprep.subr.bf16.mxu0 %v6902_v18  ;;  %5476 = vmatprep.subr.bf16.mxu1 %v6905_v20  ;;  %v3599_v18 = vsub.s32 4, %v7700_v58  ;;  %v3607_v20 = vsub.s32 6, %v7700_v58 }
 0xe5f   : > { %v3600_v58 = vrot.slane %v8310_v55, %v3599_v18 }
 0xe60   : > { %5424 = vmatpush2.bf16.msra.mxu0 %v6900_v12  ;;  %5477 = vmatpush2.bf16.msra.mxu1 %v6903_v42 }
 0xe61   : > { %5425 = vmatprep.subr.bf16.mxu0 %v6908_v31  ;;  %5478 = vmatprep.subr.bf16.mxu1 %v6911_v27 }
 0xe64   : > { %5426 = vmatpush2.bf16.msra.mxu0 %v6906_v28  ;;  %5479 = vmatpush2.bf16.msra.mxu1 %v6909_v62 }
 0xe65   : > { %5427 = vmatprep.subr.bf16.mxu0 %v6914_v21  ;;  %5480 = vmatprep.subr.bf16.mxu1 %v6917_v4  ;;  %v3604_v21 = vrot.slane %v8310_v55, %v3603_v48 }
 0xe68   : > { %5428 = vmatpush2.bf16.msra.mxu0 %v6912_v30  ;;  %5481 = vmatpush2.bf16.msra.mxu1 %v6915_v24 }
 0xe69   : > { %5429 = vmatprep.subr.bf16.mxu0 %v6920_v59  ;;  %5482 = vmatprep.subr.bf16.mxu1 %v6923_v23 }
 0xe6c   : > { %5430 = vmatpush2.bf16.msra.mxu0 %v6918_v49  ;;  %5483 = vmatpush2.bf16.msra.mxu1 %v6921_v2 }
 0xe6d   : > { %5431 = vmatprep.subr.bf16.mxu0 %v6926_v7  ;;  %5484 = vmatprep.subr.bf16.mxu1 %v6929_v57 }
 0xe70   : > { %5432 = vmatpush2.bf16.msra.mxu0 %v6924_v33  ;;  %5485 = vmatpush2.bf16.msra.mxu1 %v6927_v8 }
 0xe71   : > { %5433 = vmatprep.subr.bf16.mxu0 %v6932_v16  ;;  %5486 = vmatprep.subr.bf16.mxu1 %v6935_v56 }
 0xe74   : > { %5434 = vmatpush2.bf16.msra.mxu0 %v6930_v19  ;;  %5487 = vmatpush2.bf16.msra.mxu1 %v6933_v32 }
 0xe75   : > { %5435 = vmatprep.subr.bf16.mxu0 %v6938_v44  ;;  %5488 = vmatprep.subr.bf16.mxu1 %v6941_v17 }
 0xe78   : > { %5436 = vmatpush2.bf16.msra.mxu0 %v6936_v35  ;;  %5489 = vmatpush2.bf16.msra.mxu1 %v6939_v37 }
 0xe79   : > { %5437 = vmatprep.subr.bf16.mxu0 %v6944_v54  ;;  %5490 = vmatprep.subr.bf16.mxu1 %v6947_v14 }
 0xe7c   : > { %5438 = vmatpush2.bf16.msra.mxu0 %v6942_v15  ;;  %5491 = vmatpush2.bf16.msra.mxu1 %v6945_v39 }
 0xe7e   : > { %v4305_v25 = vpop.f32.mrf.mxu0  ;;  %v4358_v5 = vpop.f32.mrf.mxu1 }
 0xe7f   : > { %v4306_v13 = vadd.f32 %v4305_v25, %v8321_v29  ;;  %v4359_v53 = vadd.f32 %v4358_v5, %v8324_v26 }
 0xe80   : > { %v4307_v50 = vpop.f32.mrf.mxu0  ;;  %v4360_v45 = vpop.f32.mrf.mxu1 }
 0xe81   : > { %v4308_v6 = vadd.f32 %v4307_v50, %v8314_v52  ;;  %v4361_v22 = vadd.f32 %v4360_v45, %v8317_v38  ;;  %v4489_v59 = vmax.f32 %v4306_v13, 0.0  ;;  %v4491_v23 = vmax.f32 %v4359_v53, 0.0 }
 0xe82   : > { %v4309_v3 = vpop.f32.mrf.mxu0  ;;  %v4362_v46 = vpop.f32.mrf.mxu1 }
 0xe83   : > { %v4310_v0 = vadd.f32 %v4309_v3, %v8321_v29  ;;  %v4363_v43 = vadd.f32 %v4362_v46, %v8324_v26  ;;  %v3612_v29 = vrot.slane %v8310_v55, %v3611_v47  ;;  %v4490_v4 = vmax.f32 %v4308_v6, 0.0 }
 0xe84   : > { %v4311_v10 = vpop.f32.mrf.mxu0  ;;  %v4364_v9 = vpop.f32.mrf.mxu1  ;;  %v4492_v26 = vmax.f32 %v4361_v22, 0.0 }
 0xe85   : > { %v4312_v12 = vadd.f32 %v4311_v10, %v8314_v52  ;;  %v4365_v42 = vadd.f32 %v4364_v9, %v8317_v38  ;;  %v4497_v31 = vmax.f32 %v4310_v0, 0.0  ;;  %v4499_v27 = vmax.f32 %v4363_v43, 0.0 }
 0xe86   : > { %v4401_v28 = vpop.f32.mrf.mxu0  ;;  %v4454_v62 = vpop.f32.mrf.mxu1  ;;  %v3608_v52 = vrot.slane %v8310_v55, %v3607_v20 }
 0xe87   : > { %v4498_v30 = vmax.f32 %v4312_v12, 0.0  ;;  %v4500_v24 = vmax.f32 %v4365_v42, 0.0  ;;  %v4513_v57 = vpack.c.bf16 %v4497_v31, %v4489_v59  ;;  %v4515_v33 = vpack.c.bf16 %v4499_v27, %v4491_v23 }
 0xe88   : > { %v4403_v49 = vpop.f32.mrf.mxu0  ;;  %v4456_v38 = vpop.f32.mrf.mxu1  ;;  %v4402_v17 = vadd.f32 %v4401_v28, %v3600_v58  ;;  %v4455_v35 = vadd.f32 %v4454_v62, %v3608_v52 }
 0xe89   : > { %v4514_v2 = vpack.c.bf16 %v4498_v30, %v4490_v4  ;;  %v4516_v7 = vpack.c.bf16 %v4500_v24, %v4492_v26  ;;  %v4404_v8 = vadd.f32 %v4403_v49, %v3604_v21  ;;  %v4457_v19 = vadd.f32 %v4456_v38, %v3612_v29 }
 0xe8a   : > { %v4405_v16 = vpop.f32.mrf.mxu0  ;;  %v4458_v56 = vpop.f32.mrf.mxu1  ;;  %v4477_v48 = vmax.f32 %v4402_v17, 0.0  ;;  %v4479_v47 = vmax.f32 %v4455_v35, 0.0 }
 0xe8b   : > { %v4406_v32 = vadd.f32 %v4405_v16, %v3600_v58  ;;  %v4459_v44 = vadd.f32 %v4458_v56, %v3608_v52  ;;  %5343 = vmatprep.mubr.bf16.mxu0 %v4514_v2  ;;  %5396 = vmatprep.mubr.bf16.mxu1 %v4516_v7  ;;  %v4478_v50 = vmax.f32 %v4404_v8, 0.0  ;;  %v4480_v45 = vmax.f32 %v4457_v19, 0.0 }
 0xe8c   : > { %v4407_v37 = vpop.f32.mrf.mxu0  ;;  %v4460_v54 = vpop.f32.mrf.mxu1  ;;  %5344 = vmatmul.mubr.bf16.gmra.mxu0 %v4513_v57  ;;  %5397 = vmatmul.mubr.bf16.gmra.mxu1 %v4515_v33 }
 0xe8d   : > { %v4408_v55 = vadd.f32 %v4407_v37, %v3604_v21  ;;  %v4461_v14 = vadd.f32 %v4460_v54, %v3612_v29  ;;  %v4485_v15 = vmax.f32 %v4406_v32, 0.0  ;;  %v4487_v39 = vmax.f32 %v4459_v44, 0.0  ;;  %v4649_v32 = vld [vmem:[%s8437_s12] sm:$0x3] }
 0xe8e   : > { %v4411_v25 = vpop.f32.mrf.mxu0  ;;  %v4464_v5 = vpop.f32.mrf.mxu1  ;;  %v4654_v35 = vrot.slane %v4649_v32, %v7706_v61 }
 0xe8f   : > { %v4486_v3 = vmax.f32 %v4408_v55, 0.0  ;;  %v4488_v46 = vmax.f32 %v4461_v14, 0.0  ;;  %v4509_v13 = vpack.c.bf16 %v4485_v15, %v4477_v48  ;;  %v4511_v53 = vpack.c.bf16 %v4487_v39, %v4479_v47 }
 0xe90   : > { %v4413_v6 = vpop.f32.mrf.mxu0  ;;  %v4466_v22 = vpop.f32.mrf.mxu1  ;;  %v4412_v31 = vadd.f32 %v4411_v25, %v3600_v58  ;;  %v4465_v27 = vadd.f32 %v4464_v5, %v3608_v52  ;;  %v4658_v55 = vrot.slane %v4649_v32, %v7703_v60 }
 0xe91   : > { %v4510_v0 = vpack.c.bf16 %v4486_v3, %v4478_v50  ;;  %v4512_v43 = vpack.c.bf16 %v4488_v46, %v4480_v45  ;;  %v4414_v10 = vadd.f32 %v4413_v6, %v3604_v21  ;;  %v4467_v20 = vadd.f32 %v4466_v22, %v3612_v29 }
 0xe92   : > { %v4415_v9 = vpop.f32.mrf.mxu0  ;;  %v4468_v18 = vpop.f32.mrf.mxu1  ;;  %v4493_v2 = vmax.f32 %v4412_v31, 0.0  ;;  %v4495_v7 = vmax.f32 %v4465_v27, 0.0 }
 0xe93   : > { %v4416_v12 = vadd.f32 %v4415_v9, %v3600_v58  ;;  %v4469_v42 = vadd.f32 %v4468_v18, %v3608_v52  ;;  %5439 = vmatprep.mubr.bf16.mxu0 %v4510_v0  ;;  %5492 = vmatprep.mubr.bf16.mxu1 %v4512_v43  ;;  %v4494_v59 = vmax.f32 %v4414_v10, 0.0  ;;  %v4496_v23 = vmax.f32 %v4467_v20, 0.0 }
 0xe94   : > { %v4417_v28 = vpop.f32.mrf.mxu0  ;;  %v4470_v62 = vpop.f32.mrf.mxu1  ;;  %5440 = vmatmul.mubr.bf16.vlgmr.msra.gmra.mxu0 %v4509_v13  ;;  %5493 = vmatmul.mubr.bf16.vlgmr.msra.gmra.mxu1 %v4511_v53 }
 0xe95   : > { %v4418_v4 = vadd.f32 %v4417_v28, %v3604_v21  ;;  %v4471_v26 = vadd.f32 %v4470_v62, %v3612_v29  ;;  %v4501_v30 = vmax.f32 %v4416_v12, 0.0  ;;  %v4503_v24 = vmax.f32 %v4469_v42, 0.0 }
 0xe97   : > { %v4502_v49 = vmax.f32 %v4418_v4, 0.0  ;;  %v4504_v38 = vmax.f32 %v4471_v26, 0.0  ;;  %v4517_v8 = vpack.c.bf16 %v4501_v30, %v4493_v2  ;;  %v4519_v16 = vpack.c.bf16 %v4503_v24, %v4495_v7 }
 0xe99   : > { %v4518_v57 = vpack.c.bf16 %v4502_v49, %v4494_v59  ;;  %v4520_v33 = vpack.c.bf16 %v4504_v38, %v4496_v23 }
 0xe9b   : > { %5449 = vmatprep.mubr.bf16.mxu0 %v4518_v57  ;;  %5502 = vmatprep.mubr.bf16.mxu1 %v4520_v33 }
 0xe9c   : > { %5450 = vmatmul.mubr.bf16.gmra.mxu0 %v4517_v8  ;;  %5503 = vmatmul.mubr.bf16.gmra.mxu1 %v4519_v16 }
 0xeff   : > { %v5335_v58 = vpop.f32.mrf.mxu0  ;;  %v5388_v52 = vpop.f32.mrf.mxu1 }
 0xf00   : > { %v5336_v39 = vadd.f32 %v5335_v58, %v4654_v35 }
 0xf01   : > { %v5337_v21 = vpop.f32.mrf.mxu0  ;;  %v5390_v29 = vpop.f32.mrf.mxu1 }
 0xf02   : > { %v5338_v50 = vadd.f32 %v5337_v21, %v4658_v55  ;;  %v5389_v46 = vadd.f32 %v5388_v52, %v5336_v39 }
 0xf03   : > { %v5339_v56 = vpop.f32.mrf.mxu0  ;;  %v5392_v19 = vpop.f32.mrf.mxu1 }
 0xf04   : > { %v5340_v48 = vadd.f32 %v5339_v56, %v4654_v35  ;;  %v5391_v22 = vadd.f32 %v5390_v29, %v5338_v50 }
 0xf05   : > { %v5341_v44 = vpop.f32.mrf.mxu0  ;;  %v5394_v17 = vpop.f32.mrf.mxu1 }
 0xf06   : > { %v5342_v0 = vadd.f32 %v5341_v44, %v4658_v55  ;;  %v5393_v60 = vadd.f32 %v5392_v19, %v5340_v48 }
 0xf08   : > { %v5395_v42 = vadd.f32 %v5394_v17, %v5342_v0 }
 0xf4c   : > { %v5345_v37 = vpop.f32.mrf.mxu0  ;;  %v5398_v54 = vpop.f32.mrf.mxu1 }
 0xf4d   : > { %v5346_v61 = vadd.f32 %v5345_v37, %v4654_v35 }
 0xf4e   : > { %v5347_v14 = vpop.f32.mrf.mxu0  ;;  %v5400_v15 = vpop.f32.mrf.mxu1 }
 0xf4f   : > { %v5348_v18 = vadd.f32 %v5347_v14, %v4658_v55  ;;  %v5399_v62 = vadd.f32 %v5398_v54, %v5346_v61 }
 0xf50   : > { %v5349_v25 = vpop.f32.mrf.mxu0  ;;  %v5402_v5 = vpop.f32.mrf.mxu1 }
 0xf51   : > { %v5350_v30 = vadd.f32 %v5349_v25, %v4654_v35  ;;  %v5401_v49 = vadd.f32 %v5400_v15, %v5348_v18 }
 0xf52   : > { %v5351_v45 = vpop.f32.mrf.mxu0  ;;  %v5404_v3 = vpop.f32.mrf.mxu1 }
 0xf53   : > { %v5352_v2 = vadd.f32 %v5351_v45, %v4658_v55  ;;  %v5403_v58 = vadd.f32 %v5402_v5, %v5350_v30 }
 0xf54   : > { %v5441_v47 = vpop.f32.mrf.mxu0  ;;  %v5494_v6 = vpop.f32.mrf.mxu1 }
 0xf55   : > { %v5442_v43 = vadd.f32 %v5441_v47, %v5389_v46  ;;  %v5405_v19 = vadd.f32 %v5404_v3, %v5352_v2 }
 0xf56   : > { %v5443_v13 = vpop.f32.mrf.mxu0  ;;  %v5496_v53 = vpop.f32.mrf.mxu1 }
 0xf57   : > { %v5495_v10 = vadd.f32 %v5494_v6, %v5442_v43  ;;  %v5444_v9 = vadd.f32 %v5443_v13, %v5391_v22 }
 0xf58   : > { %v5445_v20 = vpop.f32.mrf.mxu0  ;;  %v5498_v12 = vpop.f32.mrf.mxu1 }
 0xf59   : > { %v5513_v31 = vadd.f32 %v5495_v10, %v8161_v40  ;;  %v5497_v27 = vadd.f32 %v5496_v53, %v5444_v9  ;;  %v5446_v28 = vadd.f32 %v5445_v20, %v5393_v60 }
 0xf5a   : > { %v5447_v4 = vpop.f32.mrf.mxu0  ;;  %v5500_v26 = vpop.f32.mrf.mxu1 }
 0xf5b   : > { %5521 = vst [vmem:[%s8358_s4] sm:$0xff] %v5513_v31  ;;  %v5514_v24 = vadd.f32 %v5497_v27, %v8164_v11  ;;  %v5499_v59 = vadd.f32 %v5498_v12, %v5446_v28  ;;  %v5448_v23 = vadd.f32 %v5447_v4, %v5395_v42 }
 0xf5c   : > { %v5451_v38 = vpop.f32.mrf.mxu0  ;;  %v5504_v40 = vpop.f32.mrf.mxu1 }
 0xf5d   : > { %5522 = vst [vmem:[%s8358_s4 + $0x8] sm:$0xff] %v5514_v24  ;;  %v5515_v7 = vadd.f32 %v5499_v59, %v8169_v63  ;;  %v5501_v57 = vadd.f32 %v5500_v26, %v5448_v23  ;;  %v5452_v33 = vadd.f32 %v5451_v38, %v5399_v62 }
 0xf5e   : > { %v5453_v8 = vpop.f32.mrf.mxu0  ;;  %v5506_v16 = vpop.f32.mrf.mxu1 }
 0xf5f   : > { %5523 = vst [vmem:[%s8358_s4 + $0x10] sm:$0xff] %v5515_v7  ;;  %v5516_v11 = vadd.f32 %v5501_v57, %v8172_v1  ;;  %v5505_v52 = vadd.f32 %v5504_v40, %v5452_v33  ;;  %v5454_v21 = vadd.f32 %v5453_v8, %v5401_v49 }
 0xf60   : > { %v5455_v29 = vpop.f32.mrf.mxu0  ;;  %v5508_v56 = vpop.f32.mrf.mxu1 }
 0xf61   : > { %5524 = vst [vmem:[%s8358_s4 + $0x18] sm:$0xff] %v5516_v11  ;;  %v5517_v63 = vadd.f32 %v5505_v52, %v8177_v51  ;;  %v5507_v32 = vadd.f32 %v5506_v16, %v5454_v21  ;;  %v5456_v44 = vadd.f32 %v5455_v29, %v5403_v58 }
 0xf62   : > { %v5457_v17 = vpop.f32.mrf.mxu0  ;;  %v5510_v54 = vpop.f32.mrf.mxu1 }
 0xf63   : > { %5525 = vst [vmem:[%s8358_s4 + $0x20] sm:$0xff] %v5517_v63  ;;  %v5518_v1 = vadd.f32 %v5507_v32, %v8180_v36  ;;  %v5509_v35 = vadd.f32 %v5508_v56, %v5456_v44  ;;  %v5458_v37 = vadd.f32 %v5457_v17, %v5405_v19 }
 0xf65   : > { %5526 = vst [vmem:[%s8358_s4 + $0x28] sm:$0xff] %v5518_v1  ;;  %v5519_v51 = vadd.f32 %v5509_v35, %v8185_v34  ;;  %v5511_v55 = vadd.f32 %v5510_v54, %v5458_v37 }
 0xf67   : > { %5527 = vst [vmem:[%s8358_s4 + $0x30] sm:$0xff] %v5519_v51  ;;  %v5520_v36 = vadd.f32 %v5511_v55, %v8188_v41 }
 0xf69   : > { %5528 = vst [vmem:[%s8358_s4 + $0x38] sm:$0xff] %v5520_v36 }
 0xf6a   : > { %7265 = shalt.err (!%p7262_p6)
}
 0xf6b   : > { %s7266_s11 = scalar_lea.hbm %s8379_s17, 1024  ;;  %s7270_s18 = scalar_lea.hbm %s8438_s13, 2048 }
 0xf6c   : > { %p7267_p5 = scmp.ne.s32.totalorder %s8379_s17, %s7266_s11  ;;  %p7271_p4 = scmp.lt.s32.totalorder %s8379_s17, %s8438_s13 }
 0xf6d   : > { %p7272_p7 = scmp.lt.s32.totalorder %s7270_s18, %s7266_s11 }
 0xf6e   : > { %p7268_p8 = pnand %p7267_p5, %p8477_p13 }
 0xf6f   : > { %p7273_p11 = por %p7272_p7, %p7271_p4 }
 0xf70   : > { %p7269_p9 = pneg %p7268_p8 }
 0xf72   : > { %p7274_p12 = pnand %p7273_p11, %p7269_p9 }
 0xf74   : > { %7277 = shalt.err (!%p7274_p12)
}
 0xf75   : > { %s7348_s9 = smov 256   ;;  %s7349_s15 = smov 16  }
 0xf76   : > { %6383 = dma.vmem_to_hbm [thread:$0]  (%p8477_p13), %s8372_s29, 1024, %s8379_s17, %s5530_s14, %s7348_s9, %s7348_s9, %s7349_s15  }
 0xf77 PF: > { %s5558_s19 = sand.u32 1, %s7316_s25   ;;  %p8478_p0 = scmp.ne.s32.totalorder %s8467_s5, 0 }
 0xf78   : > { %p8479_p2 = scmp.ge.s32.totalorder %s7328_s28, 2  ;;  %s5559_s24 = scalar_lea.sflag [#allocation4], %s5558_s19 }
 0xf7a   : > { %p6409_p10 = pnand %p8479_p2, %p8478_p0 }
 0xf7c   : > { %p6410_p3 = pneg %p6409_p10 }
 0xf7e   : > { %7311 = dma.done.wait (%p6410_p3), %s5559_s24, 1024  }
 0xf7f   : > { %7313 = vsyncadd (%p6410_p3), %s5559_s24, 4294966272  ;;  %s8480_s1 = sld [smem:[#allocation20_spill]]  ;;  %p29_p1 = scmp.ge.s32.totalorder %s7532_s21, 4  }
 0xf80   : > { %s8481_s25 = smov %s7320_s26  ;;  %s8482_s26 = smov %s7324_s27 }
 0xf81   : > { %s8484_s28 = smov %s7532_s21  ;;  %31 = sbr.rel (!%p29_p1) target bundleno = 15 (0xf), region = 141 }
 0xf85   : > { %s8483_s27 = smov %s8480_s1 }
 0xf86   :  { %5564 = vsyncpa [#allocation3], 1 }
 0xf87   :  { %5566 = vsyncpa [#allocation3 + $0x1], 1 }
 0xf88   :  { %5567 = vsyncpa [#allocation6], 1 }
 0xf89   :  { %5568 = vsyncpa [#allocation9], 1 }
 0xf8a   :  { %5569 = vsyncpa [#allocation12], 1 }
 0xf8b   :  { %5570 = vsyncpa [#allocation4], 1 }
 0xf8c   :  { %5572 = vsyncpa [#allocation4 + $0x1], 1 }

</bundles_post_ra>
